<compile_context>
chip_gen: v7x
topology: tpu7x:2x2x1
jax: 0.10.0
libtpu: 0.0.40
codegen_flags: <defaults>
</compile_context>

<pallas_src>
import functools

import jax
import jax.numpy as jnp
from jax.experimental import pallas as pl
from jax.experimental.pallas import tpu as pltpu

BN_EPS = 1e-5
LANE = 128
TB_MAX = 512          # max batch-tile rows; per-step footprint stays well under 32 MiB


def _cdiv(a, b):
    return -(-a // b)


def _round_up(x, m):
    return _cdiv(x, m) * m


def _gelu(x):
    # tanh-approx GELU: transcendental goes to the EUP slot, unlike the ~20-op
    # erf VALU polynomial that previously saturated the vector-ALU slot.
    # TODO(synk): deviates slightly from torch.nn.functional.gelu's erf default.
    return jax.nn.gelu(x, approximate=True)


def _chip_config():
    """Pick tiling / elementwise-dtype knobs from the local TPU generation."""
    kind = getattr(jax.devices()[0], "device_kind", "").lower()
    is_v5e = ("v5 lite" in kind) or ("v5e" in kind) or ("v5litepod" in kind)
    # v7x has 2 TensorCores per chip -> want >=2 'parallel' grid steps.
    min_steps = 2 if "v7" in kind else 1
    # v6e/v7x VPU & EUP are bf16-native; v5e is not -> keep f32 elementwise there.
    act_dtype = jnp.float32 if is_v5e else jnp.bfloat16
    return min_steps, act_dtype


def _pick_tiling(batch, min_steps, tb_max=TB_MAX):
    """Choose (tile_rows, padded_batch): pick step count first, then the
    smallest 8/128-aligned tile, to avoid near-2x batch padding."""
    n_steps = max(min_steps, _cdiv(batch, tb_max))
    per = _cdiv(batch, n_steps)
    tb = _round_up(per, LANE) if per >= LANE else _round_up(per, 8)
    b_pad = _round_up(batch, tb)
    return tb, b_pad


# ----------------------------------------------------------------------------- kernel


def mlp_kernel(x_ref,
               w1_ref, b1_ref,
               w2_ref, b2_ref,
               w3r_ref, b3r_ref,
               w4_ref, b4_ref,
               w5_ref, b5_ref,
               w6_ref, b6_ref,
               o_ref,
               *, h3_dim, act_dtype):
    def dense(h, w_ref, b_ref, out_dtype):
        # bf16 x bf16 -> f32 MXU accumulation; bias add in f32; single cast to
        # the elementwise dtype (no-op cast before the dot when h is already bf16).
        w = w_ref[...]
        acc = jnp.dot(h.astype(w.dtype), w, preferred_element_type=jnp.float32)
        return (acc + b_ref[...]).astype(out_dtype)

    x = x_ref[...]

    # fc1 -> bn1(folded) -> gelu      (dropout1 = identity at inference)
    h = _gelu(dense(x, w1_ref, b1_ref, act_dtype))
    # fc2 -> bn2(folded) -> gelu      (dropout2 = identity)
    h = _gelu(dense(h, w2_ref, b2_ref, act_dtype))

    # Fused [fc3 (bn3 folded) | residual1]: one MXU pass over a 1024-wide RHS,
    # then split: gelu(first half) + second half.      (dropout3 = identity)
    hr = dense(h, w3r_ref, b3r_ref, act_dtype)
    h = _gelu(hr[:, :h3_dim]) + hr[:, h3_dim:]

    # fc4 -> bn4(folded) -> gelu      (dropout4 = identity)
    h = _gelu(dense(h, w4_ref, b4_ref, act_dtype))
    # fc5 -> bn5(folded) -> gelu      (dropout5 = identity)
    h = _gelu(dense(h, w5_ref, b5_ref, act_dtype))

    # fc6 -> softmax (f32).  Padded output columns carry bias = -1e30 so their
    # exp underflows to exactly 0 and contributes nothing to the row sum.
    logits = dense(h, w6_ref, b6_ref, jnp.float32)
    m = jnp.max(logits, axis=-1, keepdims=True)
    e = jnp.exp(logits - m)
    inv = pl.reciprocal(jnp.sum(e, axis=-1, keepdims=True), approx=True)  # EUP
    o_ref[...] = (e * inv).astype(o_ref.dtype)


# ----------------------------------------------------------------------------- params


def init_params(key, input_size, n_labels):
    """Kaiming-normal (fan_in, relu) weights, zero biases — matches _init_weights.
    Weights stored as [in, out] (transpose of torch's [out, in]); biases kept 2D."""
    dims = [
        ("w1", "b1", input_size, 1024),
        ("w2", "b2", 1024, 512),
        ("w3", "b3", 512, 512),
        ("wr", "br", 512, 512),   # residual1
        ("w4", "b4", 512, 256),
        ("w5", "b5", 256, 128),
        ("w6", "b6", 128, n_labels),
    ]
    params = {}
    for wname, bname, fan_in, fan_out in dims:
        key, sub = jax.random.split(key)
        std = (2.0 / fan_in) ** 0.5
        params[wname] = jax.random.normal(sub, (fan_in, fan_out), jnp.float32) * std
        params[bname] = jnp.zeros((1, fan_out), jnp.float32)
    return params


def prepare_params(raw, *, weight_dtype=jnp.bfloat16):
    """Offline prep: fold the BN eval scale 1/sqrt(1+eps) into the preceding
    Linear layers, fuse fc3 || residual1 into one matmul, pad fc6 to lane-dense
    (multiple-of-128) output columns, cast weights to bf16 (biases stay f32)."""
    # TODO(synk): for a trained checkpoint, fold the real per-feature BN affine
    # (gamma/sqrt(var+eps) scale and beta - mean*scale shift) instead of the
    # fresh-stats constant below.
    s = (1.0 + BN_EPS) ** -0.5
    p = {}
    for w, b in (("w1", "b1"), ("w2", "b2"), ("w4", "b4"), ("w5", "b5")):
        p[w] = (raw[w] * s).astype(weight_dtype)
        p[b] = (raw[b] * s).astype(jnp.float32)
    # fc3 gets the BN fold; residual1 does not (no BN on the residual branch).
    p["w3r"] = jnp.concatenate([raw["w3"] * s, raw["wr"]], axis=1).astype(weight_dtype)
    p["b3r"] = jnp.concatenate([raw["b3"] * s, raw["br"]], axis=1).astype(jnp.float32)
    # fc6: pad output columns to a multiple of 128 for lane-dense stores.
    n_labels = raw["w6"].shape[1]
    n_out = _round_up(max(n_labels, LANE), LANE)
    w6 = jnp.zeros((raw["w6"].shape[0], n_out), jnp.float32)
    w6 = w6.at[:, :n_labels].set(raw["w6"])
    b6 = jnp.full((1, n_out), -1e30, jnp.float32)   # must stay f32
    b6 = b6.at[:, :n_labels].set(raw["b6"][0])
    p["w6"] = w6.astype(weight_dtype)
    p["b6"] = b6
    return p


_WEIGHT_NAMES = ("w1", "b1", "w2", "b2", "w3r", "b3r",
                 "w4", "b4", "w5", "b5", "w6", "b6")


# ----------------------------------------------------------------------------- wrapper


def robust_nn_forward(x, params, n_labels):
    """x: [B, input_size] float32 (or bf16). params: output of prepare_params."""
    B, in_dim = x.shape
    n_out = params["w6"].shape[1]
    h3_dim = params["w3r"].shape[1] // 2     # fc3 and residual1 are equal width

    min_steps, act_dtype = _chip_config()
    tb, b_pad = _pick_tiling(B, min_steps)

    # Pre-cast to the matmul input dtype and pad the batch to the tile grid.
    x = x.astype(jnp.bfloat16)
    if b_pad != B:
        x = jnp.concatenate([x, jnp.zeros((b_pad - B, in_dim), x.dtype)], axis=0)

    weight_args = [params[name] for name in _WEIGHT_NAMES]

    out = pl.pallas_call(
        functools.partial(mlp_kernel, h3_dim=h3_dim, act_dtype=act_dtype),
        out_shape=jax.ShapeDtypeStruct((b_pad, n_out), jnp.float32),
        grid_spec=pltpu.PrefetchScalarGridSpec(
            num_scalar_prefetch=0,
            grid=(b_pad // tb,),
            in_specs=[pl.BlockSpec((tb, in_dim), lambda i: (i, 0))]
                     + [pl.BlockSpec(a.shape, lambda i: (0, 0))
                        for a in weight_args],
            out_specs=pl.BlockSpec((tb, n_out), lambda i: (i, 0)),
        ),
        compiler_params=pltpu.CompilerParams(
            dimension_semantics=("parallel",),
            vmem_limit_bytes=32 << 20,
        ),
    )(x, *weight_args)

    return out[:B, :n_labels]


def reference_forward(x, params, n_labels):
    """Pure-JAX mirror of the fused kernel (same folded bf16 weights, same
    activation dtype; exact divide instead of the approx EUP reciprocal)."""
    _, act_dtype = _chip_config()
    h3_dim = params["w3r"].shape[1] // 2

    def dense(h, wk, bk, out_dtype):
        w = params[wk]
        acc = jnp.dot(h.astype(w.dtype), w, preferred_element_type=jnp.float32)
        return (acc + params[bk]).astype(out_dtype)

    h = x.astype(jnp.bfloat16)
    h = _gelu(dense(h, "w1", "b1", act_dtype))
    h = _gelu(dense(h, "w2", "b2", act_dtype))
    hr = dense(h, "w3r", "b3r", act_dtype)
    h = _gelu(hr[:, :h3_dim]) + hr[:, h3_dim:]
    h = _gelu(dense(h, "w4", "b4", act_dtype))
    h = _gelu(dense(h, "w5", "b5", act_dtype))
    logits = dense(h, "w6", "b6", jnp.float32)
    return jax.nn.softmax(logits, axis=-1)[:, :n_labels]


# ----------------------------------------------------------------------------- main


if __name__ == "__main__":
    B, INPUT_SIZE, N_LABELS = 64, 32, 8

    key = jax.random.PRNGKey(0)
    key, xkey = jax.random.split(key)
    x = jax.random.normal(xkey, (B, INPUT_SIZE), jnp.float32)

    raw_params = init_params(key, INPUT_SIZE, N_LABELS)
    params = prepare_params(raw_params)

    out = jax.block_until_ready(robust_nn_forward(x, params, N_LABELS))

    assert out.shape == (B, N_LABELS)
    assert bool(jnp.all(jnp.isfinite(out)))
    # Rows sum to ~1 (approx EUP reciprocal -> not exactly 1; padded logit
    # columns contribute exactly 0).
    assert bool(jnp.allclose(jnp.sum(out, axis=1), 1.0, atol=5e-3))

    # Pure-JAX mirror reference (same folded bf16 weights / activation dtype).
    ref = jax.block_until_ready(reference_forward(x, params, N_LABELS))
    assert bool(jnp.allclose(out, ref, atol=2e-2)), float(jnp.max(jnp.abs(out - ref)))

    print("KERNEL_OK")
</pallas_src>

<mosaic_0001>
module attributes {stable_mosaic.version = 11 : i64} {
  func.func @mlp_kernel(%arg0: i32, %arg1: memref<64x32xbf16, #tpu.memory_space<vmem>>, %arg2: memref<32x1024xbf16, #tpu.memory_space<vmem>>, %arg3: memref<1x1024xf32, #tpu.memory_space<vmem>>, %arg4: memref<1024x512xbf16, #tpu.memory_space<vmem>>, %arg5: memref<1x512xf32, #tpu.memory_space<vmem>>, %arg6: memref<512x1024xbf16, #tpu.memory_space<vmem>>, %arg7: memref<1x1024xf32, #tpu.memory_space<vmem>>, %arg8: memref<512x256xbf16, #tpu.memory_space<vmem>>, %arg9: memref<1x256xf32, #tpu.memory_space<vmem>>, %arg10: memref<256x128xbf16, #tpu.memory_space<vmem>>, %arg11: memref<1x128xf32, #tpu.memory_space<vmem>>, %arg12: memref<128x128xbf16, #tpu.memory_space<vmem>>, %arg13: memref<1x128xf32, #tpu.memory_space<vmem>>, %arg14: memref<64x128xf32, #tpu.memory_space<vmem>>) attributes {dimension_semantics = [#tpu.dimension_semantics<parallel>], iteration_bounds = array<i64: 1>, scalar_prefetch = 0 : i64, scratch_operands = 0 : i64, tpu.core_type = #tpu.core_type<tc>, window_params = [{transform_indices = @transform_0, window_bounds = array<i64: 64, 32>}, {pipeline_mode = #tpu.pipeline_mode<synchronous>, transform_indices = @transform_1, window_bounds = array<i64: 32, 1024>}, {pipeline_mode = #tpu.pipeline_mode<synchronous>, transform_indices = @transform_2, window_bounds = array<i64: 1, 1024>}, {pipeline_mode = #tpu.pipeline_mode<synchronous>, transform_indices = @transform_3, window_bounds = array<i64: 1024, 512>}, {pipeline_mode = #tpu.pipeline_mode<synchronous>, transform_indices = @transform_4, window_bounds = array<i64: 1, 512>}, {pipeline_mode = #tpu.pipeline_mode<synchronous>, transform_indices = @transform_5, window_bounds = array<i64: 512, 1024>}, {pipeline_mode = #tpu.pipeline_mode<synchronous>, transform_indices = @transform_6, window_bounds = array<i64: 1, 1024>}, {pipeline_mode = #tpu.pipeline_mode<synchronous>, transform_indices = @transform_7, window_bounds = array<i64: 512, 256>}, {pipeline_mode = #tpu.pipeline_mode<synchronous>, transform_indices = @transform_8, window_bounds = array<i64: 1, 256>}, {pipeline_mode = #tpu.pipeline_mode<synchronous>, transform_indices = @transform_9, window_bounds = array<i64: 256, 128>}, {pipeline_mode = #tpu.pipeline_mode<synchronous>, transform_indices = @transform_10, window_bounds = array<i64: 1, 128>}, {pipeline_mode = #tpu.pipeline_mode<synchronous>, transform_indices = @transform_11, window_bounds = array<i64: 128, 128>}, {pipeline_mode = #tpu.pipeline_mode<synchronous>, transform_indices = @transform_12, window_bounds = array<i64: 1, 128>}, {transform_indices = @transform_13, window_bounds = array<i64: 64, 128>}]} {
    %c0 = arith.constant 0 : index
    %c0_0 = arith.constant 0 : index
    %0 = vector.load %arg1[%c0, %c0_0] : memref<64x32xbf16, #tpu.memory_space<vmem>>, vector<64x32xbf16>
    %c0_1 = arith.constant 0 : index
    %c0_2 = arith.constant 0 : index
    %1 = vector.load %arg2[%c0_1, %c0_2] : memref<32x1024xbf16, #tpu.memory_space<vmem>>, vector<32x1024xbf16>
    %cst = arith.constant dense<0.000000e+00> : vector<64x1024xf32>
    %2 = tpu.matmul %0, %1, %cst {dimension_numbers = #tpu.dot_dimension_numbers<[1], [0], [0], [1], [0, 0, 1, 1], [], []>} : vector<64x32xbf16>, vector<32x1024xbf16>, vector<64x1024xf32> -> vector<64x1024xf32>
    %c0_3 = arith.constant 0 : index
    %c0_4 = arith.constant 0 : index
    %3 = vector.load %arg3[%c0_3, %c0_4] : memref<1x1024xf32, #tpu.memory_space<vmem>>, vector<1x1024xf32>
    %4 = vector.broadcast %3 : vector<1x1024xf32> to vector<64x1024xf32>
    %5 = arith.addf %2, %4 : vector<64x1024xf32>
    %6 = arith.truncf %5 : vector<64x1024xf32> to vector<64x1024xbf16>
    %7 = arith.mulf %6, %6 : vector<64x1024xbf16>
    %8 = arith.mulf %6, %7 : vector<64x1024xbf16>
    %cst_5 = arith.constant 4.467770e-02 : bf16
    %9 = vector.broadcast %cst_5 : bf16 to vector<64x1024xbf16>
    %10 = arith.mulf %9, %8 : vector<64x1024xbf16>
    %11 = arith.addf %6, %10 : vector<64x1024xbf16>
    %cst_6 = arith.constant 7.968750e-01 : bf16
    %12 = vector.broadcast %cst_6 : bf16 to vector<64x1024xbf16>
    %13 = arith.mulf %12, %11 : vector<64x1024xbf16>
    %14 = math.tanh %13 : vector<64x1024xbf16>
    %cst_7 = arith.constant 1.000000e+00 : bf16
    %15 = vector.broadcast %cst_7 : bf16 to vector<64x1024xbf16>
    %16 = arith.addf %15, %14 : vector<64x1024xbf16>
    %cst_8 = arith.constant 5.000000e-01 : bf16
    %17 = vector.broadcast %cst_8 : bf16 to vector<64x1024xbf16>
    %18 = arith.mulf %17, %16 : vector<64x1024xbf16>
    %19 = arith.mulf %6, %18 : vector<64x1024xbf16>
    %c0_9 = arith.constant 0 : index
    %c0_10 = arith.constant 0 : index
    %20 = vector.load %arg4[%c0_9, %c0_10] : memref<1024x512xbf16, #tpu.memory_space<vmem>>, vector<1024x512xbf16>
    %cst_11 = arith.constant dense<0.000000e+00> : vector<64x512xf32>
    %21 = tpu.matmul %19, %20, %cst_11 {dimension_numbers = #tpu.dot_dimension_numbers<[1], [0], [0], [1], [0, 0, 1, 1], [], []>} : vector<64x1024xbf16>, vector<1024x512xbf16>, vector<64x512xf32> -> vector<64x512xf32>
    %c0_12 = arith.constant 0 : index
    %c0_13 = arith.constant 0 : index
    %22 = vector.load %arg5[%c0_12, %c0_13] : memref<1x512xf32, #tpu.memory_space<vmem>>, vector<1x512xf32>
    %23 = vector.broadcast %22 : vector<1x512xf32> to vector<64x512xf32>
    %24 = arith.addf %21, %23 : vector<64x512xf32>
    %25 = arith.truncf %24 : vector<64x512xf32> to vector<64x512xbf16>
    %26 = arith.mulf %25, %25 : vector<64x512xbf16>
    %27 = arith.mulf %25, %26 : vector<64x512xbf16>
    %cst_14 = arith.constant 4.467770e-02 : bf16
    %28 = vector.broadcast %cst_14 : bf16 to vector<64x512xbf16>
    %29 = arith.mulf %28, %27 : vector<64x512xbf16>
    %30 = arith.addf %25, %29 : vector<64x512xbf16>
    %cst_15 = arith.constant 7.968750e-01 : bf16
    %31 = vector.broadcast %cst_15 : bf16 to vector<64x512xbf16>
    %32 = arith.mulf %31, %30 : vector<64x512xbf16>
    %33 = math.tanh %32 : vector<64x512xbf16>
    %cst_16 = arith.constant 1.000000e+00 : bf16
    %34 = vector.broadcast %cst_16 : bf16 to vector<64x512xbf16>
    %35 = arith.addf %34, %33 : vector<64x512xbf16>
    %cst_17 = arith.constant 5.000000e-01 : bf16
    %36 = vector.broadcast %cst_17 : bf16 to vector<64x512xbf16>
    %37 = arith.mulf %36, %35 : vector<64x512xbf16>
    %38 = arith.mulf %25, %37 : vector<64x512xbf16>
    %c0_18 = arith.constant 0 : index
    %c0_19 = arith.constant 0 : index
    %39 = vector.load %arg6[%c0_18, %c0_19] : memref<512x1024xbf16, #tpu.memory_space<vmem>>, vector<512x1024xbf16>
    %cst_20 = arith.constant dense<0.000000e+00> : vector<64x1024xf32>
    %40 = tpu.matmul %38, %39, %cst_20 {dimension_numbers = #tpu.dot_dimension_numbers<[1], [0], [0], [1], [0, 0, 1, 1], [], []>} : vector<64x512xbf16>, vector<512x1024xbf16>, vector<64x1024xf32> -> vector<64x1024xf32>
    %c0_21 = arith.constant 0 : index
    %c0_22 = arith.constant 0 : index
    %41 = vector.load %arg7[%c0_21, %c0_22] : memref<1x1024xf32, #tpu.memory_space<vmem>>, vector<1x1024xf32>
    %42 = vector.broadcast %41 : vector<1x1024xf32> to vector<64x1024xf32>
    %43 = arith.addf %40, %42 : vector<64x1024xf32>
    %44 = arith.truncf %43 : vector<64x1024xf32> to vector<64x1024xbf16>
    %45 = vector.extract_strided_slice %44 {offsets = [0, 0], sizes = [64, 512], strides = [1, 1]} : vector<64x1024xbf16> to vector<64x512xbf16>
    %46 = arith.mulf %45, %45 : vector<64x512xbf16>
    %47 = arith.mulf %45, %46 : vector<64x512xbf16>
    %cst_23 = arith.constant 4.467770e-02 : bf16
    %48 = vector.broadcast %cst_23 : bf16 to vector<64x512xbf16>
    %49 = arith.mulf %48, %47 : vector<64x512xbf16>
    %50 = arith.addf %45, %49 : vector<64x512xbf16>
    %cst_24 = arith.constant 7.968750e-01 : bf16
    %51 = vector.broadcast %cst_24 : bf16 to vector<64x512xbf16>
    %52 = arith.mulf %51, %50 : vector<64x512xbf16>
    %53 = math.tanh %52 : vector<64x512xbf16>
    %cst_25 = arith.constant 1.000000e+00 : bf16
    %54 = vector.broadcast %cst_25 : bf16 to vector<64x512xbf16>
    %55 = arith.addf %54, %53 : vector<64x512xbf16>
    %cst_26 = arith.constant 5.000000e-01 : bf16
    %56 = vector.broadcast %cst_26 : bf16 to vector<64x512xbf16>
    %57 = arith.mulf %56, %55 : vector<64x512xbf16>
    %58 = arith.mulf %45, %57 : vector<64x512xbf16>
    %59 = vector.extract_strided_slice %44 {offsets = [0, 512], sizes = [64, 512], strides = [1, 1]} : vector<64x1024xbf16> to vector<64x512xbf16>
    %60 = arith.addf %58, %59 : vector<64x512xbf16>
    %c0_27 = arith.constant 0 : index
    %c0_28 = arith.constant 0 : index
    %61 = vector.load %arg8[%c0_27, %c0_28] : memref<512x256xbf16, #tpu.memory_space<vmem>>, vector<512x256xbf16>
    %cst_29 = arith.constant dense<0.000000e+00> : vector<64x256xf32>
    %62 = tpu.matmul %60, %61, %cst_29 {dimension_numbers = #tpu.dot_dimension_numbers<[1], [0], [0], [1], [0, 0, 1, 1], [], []>} : vector<64x512xbf16>, vector<512x256xbf16>, vector<64x256xf32> -> vector<64x256xf32>
    %c0_30 = arith.constant 0 : index
    %c0_31 = arith.constant 0 : index
    %63 = vector.load %arg9[%c0_30, %c0_31] : memref<1x256xf32, #tpu.memory_space<vmem>>, vector<1x256xf32>
    %64 = vector.broadcast %63 : vector<1x256xf32> to vector<64x256xf32>
    %65 = arith.addf %62, %64 : vector<64x256xf32>
    %66 = arith.truncf %65 : vector<64x256xf32> to vector<64x256xbf16>
    %67 = arith.mulf %66, %66 : vector<64x256xbf16>
    %68 = arith.mulf %66, %67 : vector<64x256xbf16>
    %cst_32 = arith.constant 4.467770e-02 : bf16
    %69 = vector.broadcast %cst_32 : bf16 to vector<64x256xbf16>
    %70 = arith.mulf %69, %68 : vector<64x256xbf16>
    %71 = arith.addf %66, %70 : vector<64x256xbf16>
    %cst_33 = arith.constant 7.968750e-01 : bf16
    %72 = vector.broadcast %cst_33 : bf16 to vector<64x256xbf16>
    %73 = arith.mulf %72, %71 : vector<64x256xbf16>
    %74 = math.tanh %73 : vector<64x256xbf16>
    %cst_34 = arith.constant 1.000000e+00 : bf16
    %75 = vector.broadcast %cst_34 : bf16 to vector<64x256xbf16>
    %76 = arith.addf %75, %74 : vector<64x256xbf16>
    %cst_35 = arith.constant 5.000000e-01 : bf16
    %77 = vector.broadcast %cst_35 : bf16 to vector<64x256xbf16>
    %78 = arith.mulf %77, %76 : vector<64x256xbf16>
    %79 = arith.mulf %66, %78 : vector<64x256xbf16>
    %c0_36 = arith.constant 0 : index
    %c0_37 = arith.constant 0 : index
    %80 = vector.load %arg10[%c0_36, %c0_37] : memref<256x128xbf16, #tpu.memory_space<vmem>>, vector<256x128xbf16>
    %cst_38 = arith.constant dense<0.000000e+00> : vector<64x128xf32>
    %81 = tpu.matmul %79, %80, %cst_38 {dimension_numbers = #tpu.dot_dimension_numbers<[1], [0], [0], [1], [0, 0, 1, 1], [], []>} : vector<64x256xbf16>, vector<256x128xbf16>, vector<64x128xf32> -> vector<64x128xf32>
    %c0_39 = arith.constant 0 : index
    %c0_40 = arith.constant 0 : index
    %82 = vector.load %arg11[%c0_39, %c0_40] : memref<1x128xf32, #tpu.memory_space<vmem>>, vector<1x128xf32>
    %83 = vector.broadcast %82 : vector<1x128xf32> to vector<64x128xf32>
    %84 = arith.addf %81, %83 : vector<64x128xf32>
    %85 = arith.truncf %84 : vector<64x128xf32> to vector<64x128xbf16>
    %86 = arith.mulf %85, %85 : vector<64x128xbf16>
    %87 = arith.mulf %85, %86 : vector<64x128xbf16>
    %cst_41 = arith.constant 4.467770e-02 : bf16
    %88 = vector.broadcast %cst_41 : bf16 to vector<64x128xbf16>
    %89 = arith.mulf %88, %87 : vector<64x128xbf16>
    %90 = arith.addf %85, %89 : vector<64x128xbf16>
    %cst_42 = arith.constant 7.968750e-01 : bf16
    %91 = vector.broadcast %cst_42 : bf16 to vector<64x128xbf16>
    %92 = arith.mulf %91, %90 : vector<64x128xbf16>
    %93 = math.tanh %92 : vector<64x128xbf16>
    %cst_43 = arith.constant 1.000000e+00 : bf16
    %94 = vector.broadcast %cst_43 : bf16 to vector<64x128xbf16>
    %95 = arith.addf %94, %93 : vector<64x128xbf16>
    %cst_44 = arith.constant 5.000000e-01 : bf16
    %96 = vector.broadcast %cst_44 : bf16 to vector<64x128xbf16>
    %97 = arith.mulf %96, %95 : vector<64x128xbf16>
    %98 = arith.mulf %85, %97 : vector<64x128xbf16>
    %c0_45 = arith.constant 0 : index
    %c0_46 = arith.constant 0 : index
    %99 = vector.load %arg12[%c0_45, %c0_46] : memref<128x128xbf16, #tpu.memory_space<vmem>>, vector<128x128xbf16>
    %cst_47 = arith.constant dense<0.000000e+00> : vector<64x128xf32>
    %100 = tpu.matmul %98, %99, %cst_47 {dimension_numbers = #tpu.dot_dimension_numbers<[1], [0], [0], [1], [0, 0, 1, 1], [], []>} : vector<64x128xbf16>, vector<128x128xbf16>, vector<64x128xf32> -> vector<64x128xf32>
    %c0_48 = arith.constant 0 : index
    %c0_49 = arith.constant 0 : index
    %101 = vector.load %arg13[%c0_48, %c0_49] : memref<1x128xf32, #tpu.memory_space<vmem>>, vector<1x128xf32>
    %102 = vector.broadcast %101 : vector<1x128xf32> to vector<64x128xf32>
    %103 = arith.addf %100, %102 : vector<64x128xf32>
    %cst_50 = arith.constant dense<0xFF800000> : vector<64xf32>
    %104 = vector.multi_reduction <maximumf>, %103, %cst_50 [1] : vector<64x128xf32> to vector<64xf32>
    %105 = vector.shape_cast %104 : vector<64xf32> to vector<64x1xf32>
    %106 = vector.broadcast %105 : vector<64x1xf32> to vector<64x128xf32>
    %107 = arith.subf %103, %106 : vector<64x128xf32>
    %108 = math.exp %107 : vector<64x128xf32>
    %cst_51 = arith.constant dense<0.000000e+00> : vector<64xf32>
    %109 = vector.multi_reduction <add>, %108, %cst_51 [1] : vector<64x128xf32> to vector<64xf32>
    %110 = vector.shape_cast %109 : vector<64xf32> to vector<64x1xf32>
    %111 = tpu.reciprocal %110 {approx = true} : vector<64x1xf32> -> vector<64x1xf32>
    %112 = vector.broadcast %111 : vector<64x1xf32> to vector<64x128xf32>
    %113 = arith.mulf %108, %112 : vector<64x128xf32>
    %c0_52 = arith.constant 0 : index
    %c0_53 = arith.constant 0 : index
    %114 = vector.load %arg14[%c0_52, %c0_53] : memref<64x128xf32, #tpu.memory_space<vmem>>, vector<64x128xf32>
    tpu.vector_store %arg14[%c0_52, %c0_53], %113 {strides = array<i32>} : memref<64x128xf32, #tpu.memory_space<vmem>>, vector<64x128xf32>,
    return
  }
  func.func @transform_0(%arg0: i32) -> (i32, i32) {
    %c0_i32 = arith.constant 0 : i32
    %c0_i32_0 = arith.constant 0 : i32
    return %arg0, %c0_i32 : i32, i32
  }
  func.func @transform_1(%arg0: i32) -> (i32, i32) {
    %c0_i32 = arith.constant 0 : i32
    %c0_i32_0 = arith.constant 0 : i32
    %c0_i32_1 = arith.constant 0 : i32
    return %c0_i32, %c0_i32_0 : i32, i32
  }
  func.func @transform_2(%arg0: i32) -> (i32, i32) {
    %c0_i32 = arith.constant 0 : i32
    %c0_i32_0 = arith.constant 0 : i32
    %c0_i32_1 = arith.constant 0 : i32
    return %c0_i32, %c0_i32_0 : i32, i32
  }
  func.func @transform_3(%arg0: i32) -> (i32, i32) {
    %c0_i32 = arith.constant 0 : i32
    %c0_i32_0 = arith.constant 0 : i32
    %c0_i32_1 = arith.constant 0 : i32
    return %c0_i32, %c0_i32_0 : i32, i32
  }
  func.func @transform_4(%arg0: i32) -> (i32, i32) {
    %c0_i32 = arith.constant 0 : i32
    %c0_i32_0 = arith.constant 0 : i32
    %c0_i32_1 = arith.constant 0 : i32
    return %c0_i32, %c0_i32_0 : i32, i32
  }
  func.func @transform_5(%arg0: i32) -> (i32, i32) {
    %c0_i32 = arith.constant 0 : i32
    %c0_i32_0 = arith.constant 0 : i32
    %c0_i32_1 = arith.constant 0 : i32
    return %c0_i32, %c0_i32_0 : i32, i32
  }
  func.func @transform_6(%arg0: i32) -> (i32, i32) {
    %c0_i32 = arith.constant 0 : i32
    %c0_i32_0 = arith.constant 0 : i32
    %c0_i32_1 = arith.constant 0 : i32
    return %c0_i32, %c0_i32_0 : i32, i32
  }
  func.func @transform_7(%arg0: i32) -> (i32, i32) {
    %c0_i32 = arith.constant 0 : i32
    %c0_i32_0 = arith.constant 0 : i32
    %c0_i32_1 = arith.constant 0 : i32
    return %c0_i32, %c0_i32_0 : i32, i32
  }
  func.func @transform_8(%arg0: i32) -> (i32, i32) {
    %c0_i32 = arith.constant 0 : i32
    %c0_i32_0 = arith.constant 0 : i32
    %c0_i32_1 = arith.constant 0 : i32
    return %c0_i32, %c0_i32_0 : i32, i32
  }
  func.func @transform_9(%arg0: i32) -> (i32, i32) {
    %c0_i32 = arith.constant 0 : i32
    %c0_i32_0 = arith.constant 0 : i32
    %c0_i32_1 = arith.constant 0 : i32
    return %c0_i32, %c0_i32_0 : i32, i32
  }
  func.func @transform_10(%arg0: i32) -> (i32, i32) {
    %c0_i32 = arith.constant 0 : i32
    %c0_i32_0 = arith.constant 0 : i32
    %c0_i32_1 = arith.constant 0 : i32
    return %c0_i32, %c0_i32_0 : i32, i32
  }
  func.func @transform_11(%arg0: i32) -> (i32, i32) {
    %c0_i32 = arith.constant 0 : i32
    %c0_i32_0 = arith.constant 0 : i32
    %c0_i32_1 = arith.constant 0 : i32
    return %c0_i32, %c0_i32_0 : i32, i32
  }
  func.func @transform_12(%arg0: i32) -> (i32, i32) {
    %c0_i32 = arith.constant 0 : i32
    %c0_i32_0 = arith.constant 0 : i32
    %c0_i32_1 = arith.constant 0 : i32
    return %c0_i32, %c0_i32_0 : i32, i32
  }
  func.func @transform_13(%arg0: i32) -> (i32, i32) {
    %c0_i32 = arith.constant 0 : i32
    %c0_i32_0 = arith.constant 0 : i32
    return %arg0, %c0_i32 : i32, i32
  }
}

</mosaic_0001>

<bundles_post_ra>
// kernel: tpu_custom_call.1
= control target key start
LH: loop header
LB: loop body
LE: loop exit
PB: predicated region body
PF: predicated region fallthrough
CT: control target
= control target key end

     0   :  { %18 = vsyncpa [#allocation3], 0  ;;  %s9736_s0 = inlined_call_operand.vmem [shape: bf16[64,32], index: 0, kind: input, shape index: {}]   ;;  %s9737_s1 = inlined_call_operand.hbm [shape: bf16[32,1024], index: 1, kind: input, shape index: {}]   ;;  %s9738_s2 = inlined_call_operand.vmem [shape: f32[1,1024], index: 2, kind: input, shape index: {}]   ;;  %s9739_s3 = inlined_call_operand.hbm [shape: bf16[1024,512], index: 3, kind: input, shape index: {}]   ;;  %s9740_s4 = inlined_call_operand.vmem [shape: f32[1,512], index: 4, kind: input, shape index: {}]   ;;  %s9741_s5 = inlined_call_operand.hbm [shape: bf16[512,1024], index: 5, kind: input, shape index: {}]   ;;  %s9742_s6 = inlined_call_operand.vmem [shape: f32[1,1024], index: 6, kind: input, shape index: {}]   ;;  %s9743_s7 = inlined_call_operand.hbm [shape: bf16[512,256], index: 7, kind: input, shape index: {}]   ;;  %s9744_s8 = inlined_call_operand.vmem [shape: f32[1,256], index: 8, kind: input, shape index: {}]   ;;  %s9745_s9 = inlined_call_operand.hbm [shape: bf16[256,128], index: 9, kind: input, shape index: {}]   ;;  %s9746_s10 = inlined_call_operand.vmem [shape: f32[1,128], index: 10, kind: input, shape index: {}]   ;;  %s9747_s11 = inlined_call_operand.vmem [shape: bf16[128,128], index: 11, kind: input, shape index: {}]   ;;  %s9748_s12 = inlined_call_operand.vmem [shape: f32[1,128], index: 12, kind: input, shape index: {}]   ;;  %s9749_s13 = inlined_call_operand.hbm [shape: f32[64,128], index: 13, kind: output, shape index: {}]  }
   0x1   :  { %19 = vsyncpa [#allocation6], 0 }
   0x2   :  { %20 = vsyncpa [#allocation9], 0 }
   0x3   :  { %21 = vsyncpa [#allocation4], 0  ;;  %s8511_s25 = smov [#allocation5]   ;;  %s8371_s29 = scalar_lea.hbm %s9739_s3, 32768 }
   0x4   :  { %s43_s26 = sshll.u32 %s8511_s25, 4  ;;  %p8372_p0 = scmp.ne.s32.totalorder %s9739_s3, %s8371_s29  ;;  %s44_s26 = int_to_ptr.vmem [resolvable:$true] %s43_s26 }
   0x5   :  { %p8375_p1 = scmp.lt.u32.totalorder %s8371_s29, %s9739_s3 }
   0x7   :  { %p8377_p2 = pnand %p8375_p1, %p8372_p0 }
   0x9   :  { %8380 = shalt.err (!%p8377_p2)
}
   0xa   :  { %s8381_s17 = scalar_lea.vmem %s44_s26, 32768  ;;  %p8386_p4 = scmp.lt.s32.totalorder %s44_s26, %s44_s26 }
   0xb   :  { %p8382_p3 = scmp.ne.s32.totalorder %s44_s26, %s8381_s17  ;;  %p8387_p5 = scmp.lt.s32.totalorder %s8381_s17, %s8381_s17 }
   0xd   :  { %p8388_p6 = por %p8387_p5, %p8386_p4 }
   0xf   :  { %p8389_p7 = pnand %p8388_p6, %p8382_p3 }
  0x11   :  { %8392 = shalt.err (!%p8389_p7)
}
  0x12   :  { %s8512_s18 = smov 256   ;;  %s8513_s19 = smov 16  }
  0x13   :  { %49 = dma.hbm_to_vmem [thread:$0]  %s9739_s3, 32768, %s44_s26, [#allocation6], %s8512_s18, %s8512_s18, %s8513_s19  }
  0x14   :  { %s8514_s22 = smov [#allocation8]   ;;  %s8393_s27 = scalar_lea.hbm %s9743_s7, 8192 }
  0x15   :  { %s71_s23 = sshll.u32 %s8514_s22, 4  ;;  %p8394_p8 = scmp.ne.s32.totalorder %s9743_s7, %s8393_s27  ;;  %s72_s23 = int_to_ptr.vmem [resolvable:$true] %s71_s23 }
  0x16   :  { %p8397_p9 = scmp.lt.u32.totalorder %s8393_s27, %s9743_s7 }
  0x18   :  { %p8399_p10 = pnand %p8397_p9, %p8394_p8 }
  0x1a   :  { %8402 = shalt.err (!%p8399_p10)
}
  0x1b   :  { %s8403_s15 = scalar_lea.vmem %s72_s23, 8192  ;;  %p8408_p12 = scmp.lt.s32.totalorder %s72_s23, %s72_s23 }
  0x1c   :  { %p8404_p11 = scmp.ne.s32.totalorder %s72_s23, %s8403_s15  ;;  %p8409_p13 = scmp.lt.s32.totalorder %s8403_s15, %s8403_s15 }
  0x1e   :  { %p8410_p0 = por %p8409_p13, %p8408_p12 }
  0x20   :  { %p8411_p1 = pnand %p8410_p0, %p8404_p11 }
  0x22   :  { %8414 = shalt.err (!%p8411_p1)
}
  0x23   :  { %s8515_s3 = smov 128   ;;  %s8516_s26 = smov 8  }
  0x24   :  { %77 = dma.hbm_to_vmem [thread:$0]  %s9743_s7, 8192, %s72_s23, [#allocation9], %s8515_s3, %s8515_s3, %s8516_s26  }
  0x25   :  { %s8517_s18 = smov [#allocation2]   ;;  %s8415_s22 = scalar_lea.hbm %s9737_s1, 2048 }
  0x26   :  { %s29_s19 = sshll.u32 %s8517_s18, 4  ;;  %p8416_p2 = scmp.ne.s32.totalorder %s9737_s1, %s8415_s22  ;;  %s30_s19 = int_to_ptr.vmem [resolvable:$true] %s29_s19 }
  0x27   :  { %p8419_p3 = scmp.lt.u32.totalorder %s8415_s22, %s9737_s1 }
  0x29   :  { %p8421_p4 = pnand %p8419_p3, %p8416_p2 }
  0x2b   :  { %8424 = shalt.err (!%p8421_p4)
}
  0x2c   :  { %s8425_s29 = scalar_lea.vmem %s30_s19, 2048  ;;  %p8430_p6 = scmp.lt.s32.totalorder %s30_s19, %s30_s19 }
  0x2d   :  { %p8426_p5 = scmp.ne.s32.totalorder %s30_s19, %s8425_s29  ;;  %p8431_p7 = scmp.lt.s32.totalorder %s8425_s29, %s8425_s29 }
  0x2f   :  { %p8432_p8 = por %p8431_p7, %p8430_p6 }
  0x31   :  { %p8433_p9 = pnand %p8432_p8, %p8426_p5 }
  0x33   :  { %8436 = shalt.err (!%p8433_p9)
}
  0x34   :  { %s8518_s7 = smov 512   ;;  %s8519_s23 = smov 32  }
  0x35   :  { %35 = dma.hbm_to_vmem [thread:$0]  %s9737_s1, 2048, %s30_s19, [#allocation3], %s8518_s7, %s8518_s7, %s8519_s23  }
  0x36   :  { %s8520_s15 = smov [#allocation7]   ;;  %s8521_s17 = smov [#allocation10]  }
  0x37   :  { %s57_s16 = sshll.u32 %s8520_s15, 4  ;;  %s85_s18 = sshll.u32 %s8521_s17, 4  ;;  %s58_s16 = int_to_ptr.vmem [resolvable:$true] %s57_s16  ;;  %s86_s18 = int_to_ptr.vmem [resolvable:$true] %s85_s18 }
  0x38   :  { %s8437_s22 = scalar_lea.hbm %s9741_s5, 32768 }
  0x39   :  { %p8438_p10 = scmp.ne.s32.totalorder %s9741_s5, %s8437_s22  ;;  %p8441_p11 = scmp.lt.u32.totalorder %s8437_s22, %s9741_s5 }
  0x3b   :  { %p8443_p12 = pnand %p8441_p11, %p8438_p10 }
  0x3d   :  { %8446 = shalt.err (!%p8443_p12)
}
  0x3e   :  { %s8447_s1 = scalar_lea.vmem %s58_s16, 32768  ;;  %p8452_p0 = scmp.lt.s32.totalorder %s58_s16, %s58_s16 }
  0x3f   :  { %p8448_p13 = scmp.ne.s32.totalorder %s58_s16, %s8447_s1  ;;  %p8453_p1 = scmp.lt.s32.totalorder %s8447_s1, %s8447_s1 }
  0x41   :  { %p8454_p2 = por %p8453_p1, %p8452_p0 }
  0x43   :  { %p8455_p3 = pnand %p8454_p2, %p8448_p13 }
  0x45   :  { %8458 = shalt.err (!%p8455_p3)
}
  0x46   :  { %63 = dma.hbm_to_vmem [thread:$0]  %s9741_s5, 32768, %s58_s16, [#allocation6], %s8518_s7, %s8518_s7, %s8519_s23  }
  0x47   :  { %s8459_s15 = scalar_lea.hbm %s9745_s9, 2048 }
  0x48   :  { %p8460_p4 = scmp.ne.s32.totalorder %s9745_s9, %s8459_s15  ;;  %p8463_p5 = scmp.lt.u32.totalorder %s8459_s15, %s9745_s9 }
  0x4a   :  { %p8465_p6 = pnand %p8463_p5, %p8460_p4 }
  0x4c   :  { %8468 = shalt.err (!%p8465_p6)
}
  0x4d   :  { %s8469_s24 = scalar_lea.vmem %s86_s18, 2048  ;;  %p8474_p8 = scmp.lt.s32.totalorder %s86_s18, %s86_s18 }
  0x4e   :  { %p8470_p7 = scmp.ne.s32.totalorder %s86_s18, %s8469_s24  ;;  %p8475_p9 = scmp.lt.s32.totalorder %s8469_s24, %s8469_s24 }
  0x50   :  { %p8476_p10 = por %p8475_p9, %p8474_p8 }
  0x52   :  { %p8477_p11 = pnand %p8476_p10, %p8470_p7 }
  0x54   :  { %8480 = shalt.err (!%p8477_p11)
}
  0x55   :  { %s8522_s5 = smov 64   ;;  %s8523_s7 = smov 4  }
  0x56   :  { %91 = dma.hbm_to_vmem [thread:$0]  %s9745_s9, 2048, %s86_s18, [#allocation9], %s8522_s5, %s8522_s5, %s8523_s7  }
  0x57   :  { %8503 = dma.done.wait [#allocation3], 2048  }
  0x58   :  { %8504 = vsyncadd [#allocation3], 4294965248 }
  0x59   :  { %8505 = dma.done.wait [#allocation6], 65536  }
  0x5a   :  { %8506 = vsyncadd [#allocation6], 4294901760 }
  0x5b   :  { %8507 = dma.done.wait [#allocation9], 10240  }
  0x5c   :  { %8508 = vsyncadd [#allocation9], 4294957056  ;;  %v8524_v0 = vmov 0   ;;  %v126_v1 = vld [vmem:[#allocation2] sm:$0xff]  ;;  %v127_v10 = vld [vmem:[#allocation2 + $0x8] sm:$0xff]  ;;  %vm284_vm0 = vcmask 261120  }
  0x5d   :  { %329 = vmatprep.mubr.bf16.mxu1 %v8524_v0  ;;  %475 = vmatprep.mubr.bf16.mxu0 %v8524_v0  ;;  %v130_v2 = vld [vmem:[#allocation2 + $0x20] sm:$0xff]  ;;  %v131_v11 = vld [vmem:[#allocation2 + $0x28] sm:$0xff]  ;;  %v128_v15 = vld [vmem:[#allocation2 + $0x10] sm:$0xff] }
  0x5e   :  { %v134_v3 = vld [vmem:[#allocation2 + $0x40] sm:$0xff]  ;;  %v6667_v4 = vcombine.high %v126_v1, %v130_v2  ;;  %v6666_v5 = vcombine.low %v126_v1, %v130_v2  ;;  %v6669_v12 = vcombine.high %v127_v10, %v131_v11  ;;  %v135_v13 = vld [vmem:[#allocation2 + $0x48] sm:$0xff]  ;;  %v132_v16 = vld [vmem:[#allocation2 + $0x30] sm:$0xff]  ;;  %v6668_v19 = vcombine.low %v127_v10, %v131_v11 }
  0x5f   :  { %v138_v6 = vld [vmem:[#allocation2 + $0x60] sm:$0xff]  ;;  %v139_v14 = vld [vmem:[#allocation2 + $0x68] sm:$0xff]  ;;  %v136_v17 = vld [vmem:[#allocation2 + $0x50] sm:$0xff]  ;;  %v6671_v20 = vcombine.high %v128_v15, %v132_v16  ;;  %v6670_v21 = vcombine.low %v128_v15, %v132_v16 }
  0x60   :  { %v6675_v7 = vcombine.high %v134_v3, %v138_v6  ;;  %297 = vmatprep.subr.bf16.mxu1 %v6667_v4  ;;  %v6674_v8 = vcombine.low %v134_v3, %v138_v6  ;;  %v8664_v9 = vld [vmem:[%s9736_s0] sm:$0xff]   ;;  %v140_v18 = vld [vmem:[#allocation2 + $0x70] sm:$0xff]  ;;  %v6677_v22 = vcombine.high %v135_v13, %v139_v14  ;;  %v8666_v24 = vld [vmem:[#allocation2 + $0x18] sm:$0xff]  ;;  %v6676_v27 = vcombine.low %v135_v13, %v139_v14 }
  0x61   :  { %298 = vmatpush1.bf16.msra.mxu1 %v6666_v5  ;;  %v6679_v23 = vcombine.high %v136_v17, %v140_v18  ;;  %443 = vmatprep.subr.bf16.mxu0 %v6671_v20  ;;  %v8668_v25 = vld [vmem:[#allocation2 + $0x38] sm:$0xff]  ;;  %v6678_v26 = vcombine.low %v136_v17, %v140_v18  ;;  %v7685_v28 = vld [vmem:[#allocation5 + $0x4] ss:$16 sps:$4 sm:$0xff]   ;;  %v8678_v30 = vld [vmem:[%s9736_s0 + $0x8] sm:$0xff]  }
  0x62   :  { %299 = vmatprep.subr.bf16.mxu1 %v6675_v7  ;;  %444 = vmatpush1.bf16.msra.mxu0 %v6670_v21  ;;  %v6673_v29 = vcombine.high %v8666_v24, %v8668_v25  ;;  %v7683_v31 = vld [vmem:[#allocation5] ss:$16 sps:$4 sm:$0xff]   ;;  %v7691_v32 = vld [vmem:[#allocation5 + $0x24] ss:$16 sps:$4 sm:$0xff]   ;;  %v8700_v40 = vld [vmem:[%s9736_s0 + $0x18] sm:$0xff]   ;;  %v6672_v48 = vcombine.low %v8666_v24, %v8668_v25 }
  0x63   :  { %445 = vmatprep.subr.bf16.mxu0 %v6679_v23  ;;  %v7689_v33 = vld [vmem:[#allocation5 + $0x20] ss:$16 sps:$4 sm:$0xff]   ;;  %v7697_v34 = vld [vmem:[#allocation5 + $0x44] ss:$16 sps:$4 sm:$0xff]   ;;  %v137_v45 = vld [vmem:[#allocation2 + $0x58] sm:$0xff] }
  0x64   :  { %v8689_v35 = vld [vmem:[%s9736_s0 + $0x10] sm:$0xff]   ;;  %v141_v46 = vld [vmem:[#allocation2 + $0x78] sm:$0xff] }
  0x65   :  { %300 = vmatpush1.bf16.msra.mxu1 %v6674_v8  ;;  %v7695_v36 = vld [vmem:[#allocation5 + $0x40] ss:$16 sps:$4 sm:$0xff]   ;;  %v7703_v37 = vld [vmem:[#allocation5 + $0x64] ss:$16 sps:$4 sm:$0xff]   ;;  %v6681_v49 = vcombine.high %v137_v45, %v141_v46  ;;  %v7688_v50 = vld [vmem:[#allocation5 + $0xc] ss:$16 sps:$4 sm:$0xff]   ;;  %v6680_v51 = vcombine.low %v137_v45, %v141_v46 }
  0x66   :  { %370 = vmatprep.subr.bf16.mxu1 %v6669_v12  ;;  %446 = vmatpush1.bf16.msra.mxu0 %v6678_v26  ;;  %v7701_v38 = vld [vmem:[#allocation5 + $0x60] ss:$16 sps:$4 sm:$0xff]   ;;  %v7709_v39 = vld [vmem:[#allocation5 + $0x84] ss:$16 sps:$4 sm:$0xff]   ;;  %v7686_v52 = vld [vmem:[#allocation5 + $0x8] ss:$16 sps:$4 sm:$0xff]  }
  0x67   :  { %2467 = vmatprep.subr.bf16.mxu0 %v7685_v28  ;;  %v7707_v41 = vld [vmem:[#allocation5 + $0x80] ss:$16 sps:$4 sm:$0xff]   ;;  %v7715_v42 = vld [vmem:[#allocation5 + $0xa4] ss:$16 sps:$4 sm:$0xff]   ;;  %v7694_v53 = vld [vmem:[#allocation5 + $0x2c] ss:$16 sps:$4 sm:$0xff]  }
  0x68   :  { %6682 = vmatmul.mubr.msk.bf16.vlgmr.msra.gmra.mrb[0].mxu1 %vm284_vm0, %v8664_v9  ;;  %v7713_v43 = vld [vmem:[#allocation5 + $0xa0] ss:$16 sps:$4 sm:$0xff]   ;;  %v7721_v44 = vld [vmem:[#allocation5 + $0xc4] ss:$16 sps:$4 sm:$0xff]   ;;  %v7692_v54 = vld [vmem:[#allocation5 + $0x28] ss:$16 sps:$4 sm:$0xff]  }
  0x69   :  { %339 = vmatprep.mubr.bf16.mxu1 %v8524_v0  ;;  %371 = vmatpush1.bf16.msra.mxu1 %v6668_v19  ;;  %v7719_v47 = vld [vmem:[#allocation5 + $0xc0] ss:$16 sps:$4 sm:$0xff]   ;;  %v7700_v55 = vld [vmem:[#allocation5 + $0x4c] ss:$16 sps:$4 sm:$0xff]   ;;  %v7698_v56 = vld [vmem:[#allocation5 + $0x48] ss:$16 sps:$4 sm:$0xff]  }
  0x6a   :  { %372 = vmatprep.subr.bf16.mxu1 %v6677_v22  ;;  %6690 = vmatmul.mubr.msk.bf16.vlgmr.msra.gmra.mrb[0].mxu0 %vm284_vm0, %v8664_v9  ;;  %v7706_v57 = vld [vmem:[#allocation5 + $0x6c] ss:$16 sps:$4 sm:$0xff]   ;;  %v7704_v58 = vld [vmem:[#allocation5 + $0x68] ss:$16 sps:$4 sm:$0xff]   ;;  %v7727_v63 = vld [vmem:[#allocation5 + $0xe4] ss:$16 sps:$4 sm:$0xff]  }
  0x6b   :  { %485 = vmatprep.mubr.bf16.mxu0 %v8524_v0  ;;  %2468 = vmatpush1.bf16.msra.mxu0 %v7683_v31  ;;  %v7712_v59 = vld [vmem:[#allocation5 + $0x8c] ss:$16 sps:$4 sm:$0xff]   ;;  %v7710_v60 = vld [vmem:[#allocation5 + $0x88] ss:$16 sps:$4 sm:$0xff]   ;;  %v7725_v2 = vld [vmem:[#allocation5 + $0xe0] ss:$16 sps:$4 sm:$0xff]  }
  0x6c   :  { %2469 = vmatprep.subr.bf16.mxu0 %v7691_v32  ;;  %v7718_v61 = vld [vmem:[#allocation5 + $0xac] ss:$16 sps:$4 sm:$0xff]   ;;  %v7716_v62 = vld [vmem:[#allocation5 + $0xa8] ss:$16 sps:$4 sm:$0xff]   ;;  %v7733_v4 = vld [vmem:[#allocation5 + $0x104] ss:$16 sps:$4 sm:$0xff]  }
  0x6d   :  { %373 = vmatpush1.bf16.msra.mxu1 %v6676_v27  ;;  %v7724_v1 = vld [vmem:[#allocation5 + $0xcc] ss:$16 sps:$4 sm:$0xff]   ;;  %v7722_v3 = vld [vmem:[#allocation5 + $0xc8] ss:$16 sps:$4 sm:$0xff]   ;;  %v7731_v6 = vld [vmem:[#allocation5 + $0x100] ss:$16 sps:$4 sm:$0xff]  }
  0x6e   :  { %516 = vmatprep.subr.bf16.mxu1 %v6673_v29  ;;  %v7730_v5 = vld [vmem:[#allocation5 + $0xec] ss:$16 sps:$4 sm:$0xff]   ;;  %v7728_v7 = vld [vmem:[#allocation5 + $0xe8] ss:$16 sps:$4 sm:$0xff]   ;;  %v7739_v8 = vld [vmem:[#allocation5 + $0x124] ss:$16 sps:$4 sm:$0xff]  }
  0x6f   :  { %2470 = vmatpush1.bf16.msra.mxu0 %v7689_v33  ;;  %v7734_v10 = vld [vmem:[#allocation5 + $0x108] ss:$16 sps:$4 sm:$0xff]   ;;  %v7745_v11 = vld [vmem:[#allocation5 + $0x144] ss:$16 sps:$4 sm:$0xff]   ;;  %v7742_v12 = vld [vmem:[#allocation5 + $0x12c] ss:$16 sps:$4 sm:$0xff]  }
  0x70   :  { %6683 = vmatmul.mubr.msk.bf16.gmra.mrb[4].mxu1 %vm284_vm0, %v8678_v30  ;;  %2471 = vmatprep.subr.bf16.mxu0 %v7697_v34  ;;  %v7743_v13 = vld [vmem:[#allocation5 + $0x140] ss:$16 sps:$4 sm:$0xff]   ;;  %v7740_v14 = vld [vmem:[#allocation5 + $0x128] ss:$16 sps:$4 sm:$0xff]   ;;  %v7751_v15 = vld [vmem:[#allocation5 + $0x164] ss:$16 sps:$4 sm:$0xff]  }
  0x71   :  { %349 = vmatprep.mubr.bf16.mxu1 %v8524_v0  ;;  %v7748_v16 = vld [vmem:[#allocation5 + $0x14c] ss:$16 sps:$4 sm:$0xff]   ;;  %v7749_v17 = vld [vmem:[#allocation5 + $0x160] ss:$16 sps:$4 sm:$0xff]   ;;  %v7746_v18 = vld [vmem:[#allocation5 + $0x148] ss:$16 sps:$4 sm:$0xff]  }
  0x72   :  { %6691 = vmatmul.mubr.msk.bf16.gmra.mrb[4].mxu0 %vm284_vm0, %v8678_v30  ;;  %v7757_v19 = vld [vmem:[#allocation5 + $0x184] ss:$16 sps:$4 sm:$0xff]   ;;  %v7754_v20 = vld [vmem:[#allocation5 + $0x16c] ss:$16 sps:$4 sm:$0xff]   ;;  %v7755_v21 = vld [vmem:[#allocation5 + $0x180] ss:$16 sps:$4 sm:$0xff]  }
  0x73   :  { %495 = vmatprep.mubr.bf16.mxu0 %v8524_v0  ;;  %2472 = vmatpush1.bf16.msra.mxu0 %v7695_v36  ;;  %v7752_v22 = vld [vmem:[#allocation5 + $0x168] ss:$16 sps:$4 sm:$0xff]   ;;  %v7763_v23 = vld [vmem:[#allocation5 + $0x1a4] ss:$16 sps:$4 sm:$0xff]   ;;  %v7760_v24 = vld [vmem:[#allocation5 + $0x18c] ss:$16 sps:$4 sm:$0xff]  }
  0x74   :  { %2473 = vmatprep.subr.bf16.mxu0 %v7703_v37  ;;  %v7761_v25 = vld [vmem:[#allocation5 + $0x1a0] ss:$16 sps:$4 sm:$0xff]   ;;  %v7758_v26 = vld [vmem:[#allocation5 + $0x188] ss:$16 sps:$4 sm:$0xff]   ;;  %v7769_v27 = vld [vmem:[#allocation5 + $0x1c4] ss:$16 sps:$4 sm:$0xff]  }
  0x75   :  { %v7766_v28 = vld [vmem:[#allocation5 + $0x1ac] ss:$16 sps:$4 sm:$0xff]   ;;  %v7767_v29 = vld [vmem:[#allocation5 + $0x1c0] ss:$16 sps:$4 sm:$0xff]   ;;  %v7775_v31 = vld [vmem:[#allocation5 + $0x1e4] ss:$16 sps:$4 sm:$0xff]  }
  0x76   :  { %v7772_v32 = vld [vmem:[#allocation5 + $0x1cc] ss:$16 sps:$4 sm:$0xff]   ;;  %v7773_v33 = vld [vmem:[#allocation5 + $0x1e0] ss:$16 sps:$4 sm:$0xff]   ;;  %v7770_v34 = vld [vmem:[#allocation5 + $0x1c8] ss:$16 sps:$4 sm:$0xff]  }
  0x77   :  { %2474 = vmatpush1.bf16.msra.mxu0 %v7701_v38  ;;  %v7778_v36 = vld [vmem:[#allocation5 + $0x1ec] ss:$16 sps:$4 sm:$0xff]   ;;  %v7776_v37 = vld [vmem:[#allocation5 + $0x1e8] ss:$16 sps:$4 sm:$0xff]  }
  0x78   :  { %6684 = vmatmul.mubr.msk.bf16.gmra.mrb[8].mxu1 %vm284_vm0, %v8689_v35  ;;  %2475 = vmatprep.subr.bf16.mxu0 %v7709_v39  ;;  %v7784_v38 = vld [vmem:[#allocation5 + $0x20c] ss:$16 sps:$4 sm:$0xff]   ;;  %v144_v39 = vlaneseq }
  0x79   :  { %359 = vmatprep.mubr.bf16.mxu1 %v8524_v0 }
  0x7a   :  { %6692 = vmatmul.mubr.msk.bf16.gmra.mrb[8].mxu0 %vm284_vm0, %v8689_v35 }
  0x7b   :  { %505 = vmatprep.mubr.bf16.mxu0 %v8524_v0  ;;  %2476 = vmatpush1.bf16.msra.mxu0 %v7707_v41 }
  0x7c   :  { %2477 = vmatprep.subr.bf16.mxu0 %v7715_v42  ;;  %v8743_v42 = vld [vmem:[%s9738_s2] sm:$0xff] }
  0x7f   :  { %2478 = vmatpush1.bf16.msra.mxu0 %v7713_v43 }
  0x80   :  { %6685 = vmatmul.mubr.msk.bf16.gmra.mrb[12].mxu1 %vm284_vm0, %v8700_v40  ;;  %2479 = vmatprep.subr.bf16.mxu0 %v7721_v44 }
  0x81   :  { %402 = vmatprep.mubr.bf16.mxu1 %v8524_v0 }
  0x82   :  { %6693 = vmatmul.mubr.msk.bf16.gmra.mrb[12].mxu0 %vm284_vm0, %v8700_v40 }
  0x83   :  { %2480 = vmatpush1.bf16.msra.mxu0 %v7719_v47 }
  0x84   :  { %2481 = vmatprep.subr.bf16.mxu0 %v7727_v63 }
  0x87   :  { %2482 = vmatpush1.bf16.msra.mxu0 %v7725_v2 }
  0x88   :  { %6686 = vmatmul.mubr.msk.bf16.vlgmr.msra.gmra.mrb[16].mxu1 %vm284_vm0, %v8664_v9  ;;  %2483 = vmatprep.subr.bf16.mxu0 %v7733_v4 }
  0x89   :  { %412 = vmatprep.mubr.bf16.mxu1 %v8524_v0  ;;  %517 = vmatpush1.bf16.msra.mxu1 %v6672_v48 }
  0x8a   :  { %518 = vmatprep.subr.bf16.mxu1 %v6681_v49 }
  0x8b   :  { %2484 = vmatpush1.bf16.msra.mxu0 %v7731_v6 }
  0x8c   :  { %2485 = vmatprep.subr.bf16.mxu0 %v7739_v8 }
  0x8d   :  { %519 = vmatpush1.bf16.msra.mxu1 %v6680_v51 }
  0x8e   :  { %2759 = vmatprep.subr.bf16.mxu1 %v7688_v50 }
  0x90   :  { %6687 = vmatmul.mubr.msk.bf16.gmra.mrb[20].mxu1 %vm284_vm0, %v8678_v30 }
  0x91   :  { %422 = vmatprep.mubr.bf16.mxu1 %v8524_v0 }
  0x98   :  { %6688 = vmatmul.mubr.msk.bf16.gmra.mrb[24].mxu1 %vm284_vm0, %v8689_v35 }
  0x99   :  { %432 = vmatprep.mubr.bf16.mxu1 %v8524_v0 }
  0xa0   :  { %6689 = vmatmul.mubr.msk.bf16.gmra.mrb[28].mxu1 %vm284_vm0, %v8700_v40 }
  0xa1   :  { %548 = vmatprep.mubr.bf16.mxu1 %v8524_v0 }
  0xa8   :  { %6694 = vmatmul.mubr.msk.bf16.vlgmr.msra.gmra.mrb[32].mxu1 %vm284_vm0, %v8664_v9  ;;  %v7737_v9 = vld [vmem:[#allocation5 + $0x120] ss:$16 sps:$4 sm:$0xff]  }
  0xa9   :  { %2760 = vmatpush1.bf16.msra.mxu1 %v7686_v52  ;;  %558 = vmatprep.mubr.bf16.mxu1 %v8524_v0 }
  0xaa   :  { %2761 = vmatprep.subr.bf16.mxu1 %v7694_v53  ;;  %2486 = vmatpush1.bf16.msra.mxu0 %v7737_v9 }
  0xab   :  { %2487 = vmatprep.subr.bf16.mxu0 %v7745_v11 }
  0xad   :  { %2762 = vmatpush1.bf16.msra.mxu1 %v7692_v54 }
  0xae   :  { %2763 = vmatprep.subr.bf16.mxu1 %v7700_v55  ;;  %2488 = vmatpush1.bf16.msra.mxu0 %v7743_v13 }
  0xaf   :  { %2489 = vmatprep.subr.bf16.mxu0 %v7751_v15 }
  0xb0   :  { %6695 = vmatmul.mubr.msk.bf16.gmra.mrb[36].mxu1 %vm284_vm0, %v8678_v30  ;;  %v7764_v30 = vld [vmem:[#allocation5 + $0x1a8] ss:$16 sps:$4 sm:$0xff]  }
  0xb1   :  { %2764 = vmatpush1.bf16.msra.mxu1 %v7698_v56  ;;  %568 = vmatprep.mubr.bf16.mxu1 %v8524_v0 }
  0xb2   :  { %2765 = vmatprep.subr.bf16.mxu1 %v7706_v57  ;;  %2490 = vmatpush1.bf16.msra.mxu0 %v7749_v17 }
  0xb3   :  { %2491 = vmatprep.subr.bf16.mxu0 %v7757_v19 }
  0xb5   :  { %2766 = vmatpush1.bf16.msra.mxu1 %v7704_v58 }
  0xb6   :  { %2767 = vmatprep.subr.bf16.mxu1 %v7712_v59  ;;  %2492 = vmatpush1.bf16.msra.mxu0 %v7755_v21 }
  0xb7   :  { %2493 = vmatprep.subr.bf16.mxu0 %v7763_v23 }
  0xb8   :  { %6696 = vmatmul.mubr.msk.bf16.gmra.mrb[40].mxu1 %vm284_vm0, %v8689_v35  ;;  %v7781_v35 = vld [vmem:[#allocation5 + $0x204] ss:$16 sps:$4 sm:$0xff]  }
  0xb9   :  { %2768 = vmatpush1.bf16.msra.mxu1 %v7710_v60  ;;  %578 = vmatprep.mubr.bf16.mxu1 %v8524_v0  ;;  %v7736_v0 = vld [vmem:[#allocation5 + $0x10c] ss:$16 sps:$4 sm:$0xff]  }
  0xba   :  { %2769 = vmatprep.subr.bf16.mxu1 %v7718_v61  ;;  %2494 = vmatpush1.bf16.msra.mxu0 %v7761_v25 }
  0xbb   :  { %2495 = vmatprep.subr.bf16.mxu0 %v7769_v27 }
  0xbd   :  { %2770 = vmatpush1.bf16.msra.mxu1 %v7716_v62 }
  0xbe   :  { %2771 = vmatprep.subr.bf16.mxu1 %v7724_v1  ;;  %2496 = vmatpush1.bf16.msra.mxu0 %v7767_v29 }
  0xbf   :  { %2497 = vmatprep.subr.bf16.mxu0 %v7775_v31 }
  0xc0   :  { %6697 = vmatmul.mubr.msk.bf16.gmra.mrb[44].mxu1 %vm284_vm0, %v8700_v40  ;;  %v8735_v40 = vshrl.u32 %v144_v39, 7 }
  0xc1   :  { %2772 = vmatpush1.bf16.msra.mxu1 %v7722_v3 }
  0xc2   :  { %2773 = vmatprep.subr.bf16.mxu1 %v7730_v5  ;;  %2498 = vmatpush1.bf16.msra.mxu0 %v7773_v33  ;;  %v8738_v41 = vsub.s32 0, %v8735_v40  ;;  %v8746_v43 = vsub.s32 1, %v8735_v40  ;;  %v162_v47 = vsub.s32 4, %v8735_v40  ;;  %v166_v49 = vsub.s32 5, %v8735_v40 }
  0xc3   :  { %2540 = vmatprep.subr.bf16.mxu0 %v7781_v35 }
  0xc4   :  { %v8750_v44 = vrot.slane %v8743_v42, %v8738_v41  ;;  %v8754_v46 = vrot.slane %v8743_v42, %v8746_v43  ;;  %v8765_v56 = vrot.slane %v8743_v42, %v162_v47  ;;  %v8772_v58 = vrot.slane %v8743_v42, %v166_v49 }
  0xc5   :  { %2774 = vmatpush1.bf16.msra.mxu1 %v7728_v7 }
  0xc6   :  { %2775 = vmatprep.subr.bf16.mxu1 %v7736_v0 }
  0xc9   :  { %2776 = vmatpush1.bf16.msra.mxu1 %v7734_v10 }
  0xca   :  { %2777 = vmatprep.subr.bf16.mxu1 %v7742_v12 }
  0xcd   :  { %2778 = vmatpush1.bf16.msra.mxu1 %v7740_v14 }
  0xce   :  { %2779 = vmatprep.subr.bf16.mxu1 %v7748_v16 }
  0xd1   :  { %2780 = vmatpush1.bf16.msra.mxu1 %v7746_v18 }
  0xd2   :  { %2781 = vmatprep.subr.bf16.mxu1 %v7754_v20 }
  0xd5   :  { %2782 = vmatpush1.bf16.msra.mxu1 %v7752_v22 }
  0xd6   :  { %2783 = vmatprep.subr.bf16.mxu1 %v7760_v24 }
  0xd9   :  { %2784 = vmatpush1.bf16.msra.mxu1 %v7758_v26 }
  0xda   :  { %2785 = vmatprep.subr.bf16.mxu1 %v7766_v28 }
  0xdd   :  { %2786 = vmatpush1.bf16.msra.mxu1 %v7764_v30 }
  0xde   :  { %2787 = vmatprep.subr.bf16.mxu1 %v7772_v32 }
  0xe1   :  { %2788 = vmatpush1.bf16.msra.mxu1 %v7770_v34 }
  0xe2   :  { %2789 = vmatprep.subr.bf16.mxu1 %v7778_v36 }
  0xe5   :  { %2790 = vmatpush1.bf16.msra.mxu1 %v7776_v37 }
  0xe6   :  { %2832 = vmatprep.subr.bf16.mxu1 %v7784_v38 }
 0x13b   :  { %v331_v45 = vpop.f32.mrb[0].mxu1 }
 0x13c   :  { %v333_v48 = vpop.f32.mrb[1].mxu1  ;;  %v332_v51 = vadd.f32 %v331_v45, %v8750_v44 }
 0x13d   :  { %v335_v50 = vpop.f32.mrb[2].mxu1  ;;  %v334_v54 = vadd.f32 %v333_v48, %v8754_v46  ;;  %v477_v61 = vpop.f32.mrb[0].mxu0 }
 0x13e   :  { %v336_v52 = vadd.f32 %v335_v50, %v8750_v44  ;;  %v337_v53 = vpop.f32.mrb[3].mxu1  ;;  %v478_v1 = vadd.f32 %v477_v61, %v8765_v56  ;;  %v479_v2 = vpop.f32.mrb[1].mxu0 }
 0x13f   :  { %v338_v55 = vadd.f32 %v337_v53, %v8754_v46  ;;  %v480_v6 = vadd.f32 %v479_v2, %v8772_v58  ;;  %v481_v7 = vpop.f32.mrb[2].mxu0 }
 0x140   :  { %v8767_v57 = vpack.c.bf16 %v336_v52, %v332_v51  ;;  %v482_v10 = vadd.f32 %v481_v7, %v8765_v56  ;;  %v483_v11 = vpop.f32.mrb[3].mxu0 }
 0x141   :  { %v8774_v59 = vpack.c.bf16 %v338_v55, %v334_v54  ;;  %v484_v15 = vadd.f32 %v483_v11, %v8772_v58 }
 0x142   :  { %v621_v60 = vmul.bf16 %v8767_v57, %v8767_v57  ;;  %v8790_v18 = vpack.c.bf16 %v482_v10, %v478_v1 }
 0x143   :  { %v622_v62 = vmul.bf16 %v8774_v59, %v8774_v59  ;;  %v341_v63 = vpop.f32.mrb[4].mxu1  ;;  %v8795_v21 = vpack.c.bf16 %v484_v15, %v480_v6 }
 0x144   :  { %v653_v3 = vmul.bf16 %v621_v60, %v8767_v57  ;;  %v342_v4 = vadd.f32 %v341_v63, %v8750_v44  ;;  %v343_v5 = vpop.f32.mrb[5].mxu1 }
 0x145   :  { %v654_v8 = vmul.bf16 %v622_v62, %v8774_v59  ;;  %v344_v0 = vadd.f32 %v343_v5, %v8754_v46  ;;  %v345_v9 = vpop.f32.mrb[6].mxu1  ;;  %v487_v26 = vpop.f32.mrb[4].mxu0 }
 0x146   :  { %v685_v12 = vmul.bf16 1027030327, %v653_v3  ;;  %v346_v13 = vadd.f32 %v345_v9, %v8750_v44  ;;  %v347_v14 = vpop.f32.mrb[7].mxu1  ;;  %v489_v30 = vpop.f32.mrb[5].mxu0  ;;  %v488_v38 = vadd.f32 %v487_v26, %v8765_v56 }
 0x147   :  { %v686_v16 = vmul.bf16 1027030327, %v654_v8  ;;  %v348_v17 = vadd.f32 %v347_v14, %v8754_v46  ;;  %v491_v34 = vpop.f32.mrb[6].mxu0  ;;  %v490_v51 = vadd.f32 %v489_v30, %v8772_v58  ;;  %v8829_v8 = vsub.s32 2, %v8735_v40 }
 0x148   :  { %v717_v19 = vadd.bf16 %v685_v12, %v8767_v57  ;;  %v8793_v20 = vpack.c.bf16 %v346_v13, %v342_v4  ;;  %v493_v39 = vpop.f32.mrb[7].mxu0  ;;  %v492_v54 = vadd.f32 %v491_v34, %v8765_v56 }
 0x149   :  { %v8797_v22 = vpack.c.bf16 %v348_v17, %v344_v0  ;;  %v718_v23 = vadd.bf16 %v686_v16, %v8774_v59  ;;  %v494_v61 = vadd.f32 %v493_v39, %v8772_v58  ;;  %v8832_v0 = vsub.s32 3, %v8735_v40 }
 0x14a   :  { %v749_v24 = vmul.bf16 1061961548, %v717_v19  ;;  %v629_v25 = vmul.bf16 %v8793_v20, %v8793_v20  ;;  %v8820_v1 = vpack.c.bf16 %v492_v54, %v488_v38 }
 0x14b   :  { %v630_v27 = vmul.bf16 %v8797_v22, %v8797_v22  ;;  %v351_v28 = vpop.f32.mrb[8].mxu1  ;;  %v750_v29 = vmul.bf16 1061961548, %v718_v23  ;;  %v8824_v4 = vpack.c.bf16 %v494_v61, %v490_v51  ;;  %v8846_v30 = vrot.slane %v8743_v42, %v8832_v0 }
 0x14c   :  { %8187 = vtanh.bf16 %v749_v24  ;;  %v661_v31 = vmul.bf16 %v629_v25, %v8793_v20  ;;  %v352_v32 = vadd.f32 %v351_v28, %v8750_v44  ;;  %v353_v33 = vpop.f32.mrb[9].mxu1 }
 0x14d   :  { %v662_v35 = vmul.bf16 %v630_v27, %v8797_v22  ;;  %v354_v36 = vadd.f32 %v353_v33, %v8754_v46  ;;  %v355_v37 = vpop.f32.mrb[10].mxu1  ;;  %8189 = vtanh.bf16 %v750_v29  ;;  %v497_v5 = vpop.f32.mrb[8].mxu0  ;;  %v8842_v29 = vrot.slane %v8743_v42, %v8829_v8 }
 0x14e   :  { %v693_v45 = vmul.bf16 1027030327, %v661_v31  ;;  %v356_v48 = vadd.f32 %v355_v37, %v8750_v44  ;;  %v357_v50 = vpop.f32.mrb[11].mxu1  ;;  %v499_v10 = vpop.f32.mrb[9].mxu0 }
 0x14f   :  { %v694_v52 = vmul.bf16 1027030327, %v662_v35  ;;  %v358_v53 = vadd.f32 %v357_v50, %v8754_v46  ;;  %v501_v14 = vpop.f32.mrb[10].mxu0  ;;  %v500_v37 = vadd.f32 %v499_v10, %v8772_v58 }
 0x150   :  { %v8813_v55 = vpack.c.bf16 %v356_v48, %v352_v32  ;;  %v725_v60 = vadd.bf16 %v693_v45, %v8793_v20  ;;  %v503_v19 = vpop.f32.mrb[11].mxu0  ;;  %v502_v48 = vadd.f32 %v501_v14, %v8765_v56  ;;  %v7787_v14 = vld [vmem:[#allocation5 + $0x224] ss:$16 sps:$4 sm:$0xff]  }
 0x151   :  { %v8817_v62 = vpack.c.bf16 %v358_v53, %v354_v36  ;;  %v726_v63 = vadd.bf16 %v694_v52, %v8797_v22 }
 0x152   :  { %v637_v2 = vmul.bf16 %v8813_v55, %v8813_v55  ;;  %v757_v3 = vmul.bf16 1061961548, %v725_v60  ;;  %v504_v60 = vadd.f32 %v503_v19, %v8772_v58  ;;  %v7790_v19 = vld [vmem:[#allocation5 + $0x22c] ss:$16 sps:$4 sm:$0xff]  }
 0x153   :  { %v638_v6 = vmul.bf16 %v8817_v62, %v8817_v62  ;;  %v361_v7 = vpop.f32.mrb[12].mxu1  ;;  %v758_v9 = vmul.bf16 1061961548, %v726_v63 }
 0x154   :  { %v669_v11 = vmul.bf16 %v637_v2, %v8813_v55  ;;  %v362_v12 = vadd.f32 %v361_v7, %v8750_v44  ;;  %v363_v13 = vpop.f32.mrb[13].mxu1  ;;  %8191 = vtanh.bf16 %v757_v3 }
 0x155   :  { %v670_v15 = vmul.bf16 %v638_v6, %v8817_v62  ;;  %v364_v16 = vadd.f32 %v363_v13, %v8754_v46  ;;  %v365_v17 = vpop.f32.mrb[14].mxu1  ;;  %8193 = vtanh.bf16 %v758_v9  ;;  %v8859_v50 = vpop.f32.mrb[12].mxu0  ;;  %v7779_v6 = vld [vmem:[#allocation5 + $0x200] ss:$16 sps:$4 sm:$0xff]  }
 0x156   :  { %v701_v23 = vmul.bf16 1027030327, %v669_v11  ;;  %v366_v24 = vadd.f32 %v365_v17, %v8750_v44  ;;  %v367_v25 = vpop.f32.mrb[15].mxu1  ;;  %v498_v44 = vadd.f32 %v497_v5, %v8765_v56  ;;  %v8864_v61 = vpop.f32.mrb[13].mxu0 }
 0x157   :  { %v8188_v26 = vpop.eup %8187  ;;  %v702_v27 = vmul.bf16 1027030327, %v670_v15  ;;  %v368_v28 = vadd.f32 %v367_v25, %v8754_v46  ;;  %v8869_v7 = vpop.f32.mrb[14].mxu0 }
 0x158   :  { %v8190_v31 = vpop.eup %8189  ;;  %v813_v32 = vadd.bf16 1065369472, %v8188_v26  ;;  %v8848_v33 = vpack.c.bf16 %v366_v24, %v362_v12  ;;  %v733_v34 = vadd.bf16 %v701_v23, %v8813_v55  ;;  %v7782_v12 = vld [vmem:[#allocation5 + $0x208] ss:$16 sps:$4 sm:$0xff]   ;;  %v8877_v23 = vpack.c.bf16 %v502_v48, %v498_v44 }
 0x159   :  { %v8852_v35 = vpack.c.bf16 %v368_v28, %v364_v16  ;;  %v814_v36 = vadd.bf16 1065369472, %v8190_v31  ;;  %v734_v46 = vadd.bf16 %v702_v27, %v8817_v62  ;;  %v8879_v24 = vpack.c.bf16 %v504_v60, %v500_v37  ;;  %v7785_v31 = vld [vmem:[#allocation5 + $0x220] ss:$16 sps:$4 sm:$0xff]  }
 0x15a   :  { %v845_v38 = vmul.bf16 1056980736, %v813_v32  ;;  %v645_v39 = vmul.bf16 %v8848_v33, %v8848_v33  ;;  %v765_v45 = vmul.bf16 1061961548, %v733_v34 }
 0x15b   :  { %v646_v51 = vmul.bf16 %v8852_v35, %v8852_v35  ;;  %v404_v52 = vpop.f32.mrb[16].mxu1  ;;  %v846_v53 = vmul.bf16 1056980736, %v814_v36  ;;  %v766_v54 = vmul.bf16 1061961548, %v734_v46 }
 0x15c   :  { %v877_v63 = vmul.bf16 %v845_v38, %v8767_v57  ;;  %v677_v2 = vmul.bf16 %v645_v39, %v8848_v33  ;;  %v405_v3 = vadd.f32 %v404_v52, %v8842_v29  ;;  %v406_v5 = vpop.f32.mrb[17].mxu1  ;;  %8195 = vtanh.bf16 %v765_v45  ;;  %v8874_v57 = vpop.f32.mrb[15].mxu0  ;;  %v7788_v36 = vld [vmem:[#allocation5 + $0x228] ss:$16 sps:$4 sm:$0xff]   ;;  %v7793_v46 = vld [vmem:[#allocation5 + $0x244] ss:$16 sps:$4 sm:$0xff]  }
 0x15d   :  { %v678_v9 = vmul.bf16 %v646_v51, %v8852_v35  ;;  %v407_v10 = vadd.f32 %v406_v5, %v8846_v30  ;;  %v878_v11 = vmul.bf16 %v846_v53, %v8774_v59  ;;  %v408_v13 = vpop.f32.mrb[18].mxu1  ;;  %8197 = vtanh.bf16 %v766_v54  ;;  %v7796_v39 = vld [vmem:[#allocation5 + $0x24c] ss:$16 sps:$4 sm:$0xff]   ;;  %v7791_v5 = vld [vmem:[#allocation5 + $0x240] ss:$16 sps:$4 sm:$0xff]  }
 0x15e   :  { %v709_v15 = vmul.bf16 1027030327, %v677_v2  ;;  %v409_v16 = vadd.f32 %v408_v13, %v8842_v29  ;;  %v410_v17 = vpop.f32.mrb[19].mxu1 }
 0x15f   :  { %v8192_v25 = vpop.eup %8191  ;;  %v710_v26 = vmul.bf16 1027030327, %v678_v9  ;;  %2499 = vmatprep.mubr.bf16.mxu0 %v878_v11  ;;  %2791 = vmatprep.mubr.bf16.mxu1 %v878_v11  ;;  %v411_v59 = vadd.f32 %v410_v17, %v8846_v30 }
 0x160   :  { %v8194_v27 = vpop.eup %8193  ;;  %v8882_v28 = vpack.c.bf16 %v409_v16, %v405_v3  ;;  %2500 = vmatmul.mubr.bf16.vlgmr.msra.gmra.mrb[16].mxu0 %v877_v63  ;;  %2792 = vmatmul.mubr.bf16.vlgmr.msra.gmra.mrb[48].mxu1 %v877_v63  ;;  %v821_v32 = vadd.bf16 1065369472, %v8192_v25  ;;  %v741_v34 = vadd.bf16 %v709_v15, %v8848_v33 }
 0x161   :  { %2541 = vmatpush1.bf16.msra.mxu0 %v7779_v6  ;;  %2833 = vmatpush1.bf16.msra.mxu1 %v7782_v12  ;;  %v8885_v44 = vpack.c.bf16 %v411_v59, %v407_v10  ;;  %v822_v37 = vadd.bf16 1065369472, %v8194_v27  ;;  %v742_v38 = vadd.bf16 %v710_v26, %v8852_v35  ;;  %v7794_v6 = vld [vmem:[#allocation5 + $0x248] ss:$16 sps:$4 sm:$0xff]   ;;  %v7799_v12 = vld [vmem:[#allocation5 + $0x264] ss:$16 sps:$4 sm:$0xff]  }
 0x162   :  { %2542 = vmatprep.subr.bf16.mxu0 %v7787_v14  ;;  %2834 = vmatprep.subr.bf16.mxu1 %v7790_v19  ;;  %v853_v45 = vmul.bf16 1056980736, %v821_v32  ;;  %v773_v48 = vmul.bf16 1061961548, %v741_v34  ;;  %v7797_v26 = vld [vmem:[#allocation5 + $0x260] ss:$16 sps:$4 sm:$0xff]  }
 0x163   :  { %v624_v51 = vmul.bf16 %v8885_v44, %v8885_v44  ;;  %v854_v52 = vmul.bf16 1056980736, %v822_v37  ;;  %v774_v53 = vmul.bf16 1061961548, %v742_v38  ;;  %v414_v54 = vpop.f32.mrb[20].mxu1  ;;  %v508_v37 = vadd.f32 %v8859_v50, %v8765_v56 }
 0x164   :  { %v885_v60 = vmul.bf16 %v853_v45, %v8793_v20  ;;  %8199 = vtanh.bf16 %v773_v48  ;;  %v415_v63 = vadd.f32 %v414_v54, %v8842_v29  ;;  %v416_v2 = vpop.f32.mrb[21].mxu1  ;;  %v7802_v20 = vld [vmem:[#allocation5 + $0x26c] ss:$16 sps:$4 sm:$0xff]   ;;  %v7800_v59 = vld [vmem:[#allocation5 + $0x268] ss:$16 sps:$4 sm:$0xff]   ;;  %v512_v48 = vadd.f32 %v8869_v7, %v8765_v56 }
 0x165   :  { %v656_v3 = vmul.bf16 %v624_v51, %v8885_v44  ;;  %2543 = vmatpush1.bf16.msra.mxu0 %v7785_v31  ;;  %2835 = vmatpush1.bf16.msra.mxu1 %v7788_v36  ;;  %v886_v9 = vmul.bf16 %v854_v52, %v8797_v22  ;;  %8201 = vtanh.bf16 %v774_v53  ;;  %v417_v10 = vadd.f32 %v416_v2, %v8846_v30  ;;  %v418_v11 = vpop.f32.mrb[22].mxu1  ;;  %v7805_v34 = vld [vmem:[#allocation5 + $0x284] ss:$16 sps:$4 sm:$0xff]   ;;  %v7808_v36 = vld [vmem:[#allocation5 + $0x28c] ss:$16 sps:$4 sm:$0xff]  }
 0x166   :  { %2544 = vmatprep.subr.bf16.mxu0 %v7793_v46  ;;  %2836 = vmatprep.subr.bf16.mxu1 %v7796_v39  ;;  %v419_v13 = vadd.f32 %v418_v11, %v8842_v29  ;;  %v420_v14 = vpop.f32.mrb[23].mxu1  ;;  %v7803_v54 = vld [vmem:[#allocation5 + $0x280] ss:$16 sps:$4 sm:$0xff]   ;;  %v7811_v56 = vld [vmem:[#allocation5 + $0x2a4] ss:$16 sps:$4 sm:$0xff]  }
 0x167   :  { %v8196_v15 = vpop.eup %8195  ;;  %v688_v16 = vmul.bf16 1027030327, %v656_v3  ;;  %2509 = vmatprep.mubr.bf16.mxu0 %v886_v9  ;;  %2801 = vmatprep.mubr.bf16.mxu1 %v886_v9  ;;  %v421_v17 = vadd.f32 %v420_v14, %v8846_v30  ;;  %v510_v3 = vadd.f32 %v8864_v61, %v8772_v58 }
 0x168   :  { %v8198_v19 = vpop.eup %8197  ;;  %2510 = vmatmul.mubr.bf16.gmra.mrb[20].mxu0 %v885_v60  ;;  %2802 = vmatmul.mubr.bf16.gmra.mrb[52].mxu1 %v885_v60  ;;  %v829_v22 = vadd.bf16 1065369472, %v8196_v15  ;;  %v8897_v25 = vpack.c.bf16 %v419_v13, %v415_v63  ;;  %v7806_v60 = vld [vmem:[#allocation5 + $0x288] ss:$16 sps:$4 sm:$0xff]  }
 0x169   :  { %2545 = vmatpush1.bf16.msra.mxu0 %v7791_v5  ;;  %2837 = vmatpush1.bf16.msra.mxu1 %v7794_v6  ;;  %v830_v27 = vadd.bf16 1065369472, %v8198_v19  ;;  %v720_v31 = vadd.bf16 %v688_v16, %v8885_v44  ;;  %v8900_v32 = vpack.c.bf16 %v421_v17, %v417_v10  ;;  %v8913_v6 = vpack.c.bf16 %v512_v48, %v508_v37  ;;  %v7812_v13 = vld [vmem:[#allocation5 + $0x2a8] ss:$16 sps:$4 sm:$0xff]   ;;  %v7817_v17 = vld [vmem:[#allocation5 + $0x2c4] ss:$16 sps:$4 sm:$0xff]  }
 0x16a   :  { %2546 = vmatprep.subr.bf16.mxu0 %v7799_v12  ;;  %2838 = vmatprep.subr.bf16.mxu1 %v7802_v20  ;;  %v861_v46 = vmul.bf16 1056980736, %v829_v22  ;;  %v514_v10 = vadd.f32 %v8874_v57, %v8772_v58  ;;  %v7809_v20 = vld [vmem:[#allocation5 + $0x2a0] ss:$16 sps:$4 sm:$0xff]   ;;  %v7820_v19 = vld [vmem:[#allocation5 + $0x2cc] ss:$16 sps:$4 sm:$0xff]   ;;  %v623_v57 = vmul.bf16 %v8882_v28, %v8882_v28 }
 0x16b   :  { %v862_v38 = vmul.bf16 1056980736, %v830_v27  ;;  %v752_v39 = vmul.bf16 1061961548, %v720_v31  ;;  %v424_v45 = vpop.f32.mrb[24].mxu1  ;;  %v632_v27 = vmul.bf16 %v8900_v32, %v8900_v32 }
 0x16c   :  { %v893_v51 = vmul.bf16 %v861_v46, %v8813_v55  ;;  %v425_v52 = vadd.f32 %v424_v45, %v8842_v29  ;;  %v426_v53 = vpop.f32.mrb[25].mxu1  ;;  %v7814_v55 = vld [vmem:[#allocation5 + $0x2ac] ss:$16 sps:$4 sm:$0xff]   ;;  %v8922_v16 = vpack.c.bf16 %v514_v10, %v510_v3  ;;  %v7815_v46 = vld [vmem:[#allocation5 + $0x2c0] ss:$16 sps:$4 sm:$0xff]  }
 0x16d   :  { %2547 = vmatpush1.bf16.msra.mxu0 %v7797_v26  ;;  %2839 = vmatpush1.bf16.msra.mxu1 %v7800_v59  ;;  %v894_v63 = vmul.bf16 %v862_v38, %v8817_v62  ;;  %8203 = vtanh.bf16 %v752_v39  ;;  %v427_v50 = vadd.f32 %v426_v53, %v8846_v30  ;;  %v428_v2 = vpop.f32.mrb[26].mxu1  ;;  %v7818_v37 = vld [vmem:[#allocation5 + $0x2c8] ss:$16 sps:$4 sm:$0xff]   ;;  %v7826_v48 = vld [vmem:[#allocation5 + $0x2ec] ss:$16 sps:$4 sm:$0xff]   ;;  %v655_v53 = vmul.bf16 %v623_v57, %v8882_v28 }
 0x16e   :  { %2548 = vmatprep.subr.bf16.mxu0 %v7805_v34  ;;  %2840 = vmatprep.subr.bf16.mxu1 %v7808_v36  ;;  %v429_v7 = vadd.f32 %v428_v2, %v8842_v29  ;;  %v430_v5 = vpop.f32.mrb[27].mxu1  ;;  %v170_v36 = vsub.s32 6, %v8735_v40  ;;  %v7821_v2 = vld [vmem:[#allocation5 + $0x2e0] ss:$16 sps:$4 sm:$0xff]   ;;  %v7824_v3 = vld [vmem:[#allocation5 + $0x2e8] ss:$16 sps:$4 sm:$0xff]  }
 0x16f   :  { %v8200_v9 = vpop.eup %8199  ;;  %2519 = vmatprep.mubr.bf16.mxu0 %v894_v63  ;;  %2811 = vmatprep.mubr.bf16.mxu1 %v894_v63  ;;  %v431_v62 = vadd.f32 %v430_v5, %v8846_v30  ;;  %v7832_v5 = vld [vmem:[#allocation5 + $0x30c] ss:$16 sps:$4 sm:$0xff]  }
 0x170   :  { %v8202_v11 = vpop.eup %8201  ;;  %2520 = vmatmul.mubr.bf16.gmra.mrb[24].mxu0 %v893_v51  ;;  %2812 = vmatmul.mubr.bf16.gmra.mrb[56].mxu1 %v893_v51  ;;  %v837_v61 = vadd.bf16 1065369472, %v8200_v9  ;;  %v8918_v12 = vpack.c.bf16 %v429_v7, %v425_v52  ;;  %v7829_v7 = vld [vmem:[#allocation5 + $0x304] ss:$16 sps:$4 sm:$0xff]   ;;  %v631_v9 = vmul.bf16 %v8897_v25, %v8897_v25 }
 0x171   :  { %2549 = vmatpush1.bf16.msra.mxu0 %v7803_v54  ;;  %2841 = vmatpush1.bf16.msra.mxu1 %v7806_v60  ;;  %v838_v14 = vadd.bf16 1065369472, %v8202_v11  ;;  %v8920_v15 = vpack.c.bf16 %v431_v62, %v427_v50  ;;  %v174_v60 = vsub.s32 7, %v8735_v40  ;;  %v687_v62 = vmul.bf16 1027030327, %v655_v53 }
 0x172   :  { %2550 = vmatprep.subr.bf16.mxu0 %v7811_v56  ;;  %2842 = vmatprep.subr.bf16.mxu1 %v7814_v55  ;;  %v869_v58 = vmul.bf16 1056980736, %v837_v61  ;;  %v7844_v53 = vld [vmem:[#allocation5 + $0x34c] ss:$16 sps:$4 sm:$0xff]  }
 0x173   :  { %v870_v22 = vmul.bf16 1056980736, %v838_v14  ;;  %v434_v26 = vpop.f32.mrb[28].mxu1  ;;  %v8950_v55 = vrot.slane %v8743_v42, %v174_v60  ;;  %v7827_v14 = vld [vmem:[#allocation5 + $0x300] ss:$16 sps:$4 sm:$0xff]  }
 0x174   :  { %v901_v59 = vmul.bf16 %v869_v58, %v8848_v33  ;;  %v435_v31 = vadd.f32 %v434_v26, %v8842_v29  ;;  %v436_v34 = vpop.f32.mrb[29].mxu1  ;;  %v7823_v33 = vld [vmem:[#allocation5 + $0x2e4] ss:$16 sps:$4 sm:$0xff]   ;;  %v7838_v26 = vld [vmem:[#allocation5 + $0x32c] ss:$16 sps:$4 sm:$0xff]  }
 0x175   :  { %2551 = vmatpush1.bf16.msra.mxu0 %v7809_v20  ;;  %2843 = vmatpush1.bf16.msra.mxu1 %v7812_v13  ;;  %v902_v38 = vmul.bf16 %v870_v22, %v8852_v35  ;;  %v437_v39 = vadd.f32 %v436_v34, %v8846_v30  ;;  %v438_v45 = vpop.f32.mrb[30].mxu1  ;;  %v664_v35 = vmul.bf16 %v632_v27, %v8900_v32  ;;  %v7835_v22 = vld [vmem:[#allocation5 + $0x324] ss:$16 sps:$4 sm:$0xff]  }
 0x176   :  { %2552 = vmatprep.subr.bf16.mxu0 %v7817_v17  ;;  %2844 = vmatprep.subr.bf16.mxu1 %v7820_v19  ;;  %v439_v51 = vadd.f32 %v438_v45, %v8842_v29  ;;  %v440_v52 = vpop.f32.mrb[31].mxu1  ;;  %v8943_v29 = vrot.slane %v8743_v42, %v170_v36  ;;  %v7830_v17 = vld [vmem:[#allocation5 + $0x308] ss:$16 sps:$4 sm:$0xff]   ;;  %v640_v19 = vmul.bf16 %v8920_v15, %v8920_v15 }
 0x177   :  { %2529 = vmatprep.mubr.bf16.mxu0 %v902_v38  ;;  %2821 = vmatprep.mubr.bf16.mxu1 %v902_v38  ;;  %v441_v54 = vadd.f32 %v440_v52, %v8846_v30  ;;  %v696_v61 = vmul.bf16 1027030327, %v664_v35  ;;  %v719_v34 = vadd.bf16 %v687_v62, %v8882_v28  ;;  %v7833_v38 = vld [vmem:[#allocation5 + $0x320] ss:$16 sps:$4 sm:$0xff]   ;;  %v639_v45 = vmul.bf16 %v8918_v12, %v8918_v12  ;;  %v7841_v52 = vld [vmem:[#allocation5 + $0x344] ss:$16 sps:$4 sm:$0xff]  }
 0x178   :  { %v8204_v63 = vpop.eup %8203  ;;  %2530 = vmatmul.mubr.bf16.gmra.mrb[28].mxu0 %v901_v59  ;;  %2822 = vmatmul.mubr.bf16.gmra.mrb[60].mxu1 %v901_v59  ;;  %v8938_v50 = vpack.c.bf16 %v439_v51, %v435_v31  ;;  %v663_v59 = vmul.bf16 %v631_v9, %v8897_v25  ;;  %v7847_v62 = vld [vmem:[#allocation5 + $0x364] ss:$16 sps:$4 sm:$0xff]  }
 0x179   :  { %2553 = vmatpush1.bf16.msra.mxu0 %v7815_v46  ;;  %2845 = vmatpush1.bf16.msra.mxu1 %v7818_v37  ;;  %v816_v56 = vadd.bf16 1065369472, %v8204_v63  ;;  %v8945_v30 = vpack.c.bf16 %v441_v54, %v437_v39  ;;  %v728_v46 = vadd.bf16 %v696_v61, %v8900_v32  ;;  %v7836_v39 = vld [vmem:[#allocation5 + $0x328] ss:$16 sps:$4 sm:$0xff]   ;;  %v751_v54 = vmul.bf16 1061961548, %v719_v34 }
 0x17a   :  { %2554 = vmatprep.subr.bf16.mxu0 %v7823_v33  ;;  %2846 = vmatprep.subr.bf16.mxu1 %v7826_v48  ;;  %v672_v33 = vmul.bf16 %v640_v19, %v8920_v15  ;;  %v695_v51 = vmul.bf16 1027030327, %v663_v59  ;;  %v7839_v63 = vld [vmem:[#allocation5 + $0x340] ss:$16 sps:$4 sm:$0xff]   ;;  %v7848_v19 = vld [vmem:[#allocation5 + $0x368] ss:$16 sps:$4 sm:$0xff]  }
 0x17b   :  { %v848_v10 = vmul.bf16 1056980736, %v816_v56  ;;  %v550_v11 = vpop.f32.mrb[32].mxu1  ;;  %v760_v35 = vmul.bf16 1061961548, %v728_v46  ;;  %v671_v56 = vmul.bf16 %v639_v45, %v8918_v12  ;;  %8205 = vtanh.bf16 %v751_v54 }
 0x17c   :  { %v551_v20 = vadd.f32 %v550_v11, %v8943_v29  ;;  %v552_v13 = vpop.f32.mrb[33].mxu1  ;;  %v727_v11 = vadd.bf16 %v695_v51, %v8897_v25  ;;  %v7853_v59 = vld [vmem:[#allocation5 + $0x384] ss:$16 sps:$4 sm:$0xff]   ;;  %v7854_v45 = vld [vmem:[#allocation5 + $0x388] ss:$16 sps:$4 sm:$0xff]  }
 0x17d   :  { %2555 = vmatpush1.bf16.msra.mxu0 %v7821_v2  ;;  %2847 = vmatpush1.bf16.msra.mxu1 %v7824_v3  ;;  %v880_v42 = vmul.bf16 %v848_v10, %v8885_v44  ;;  %v553_v58 = vadd.f32 %v552_v13, %v8950_v55  ;;  %v554_v57 = vpop.f32.mrb[34].mxu1  ;;  %v7842_v3 = vld [vmem:[#allocation5 + $0x348] ss:$16 sps:$4 sm:$0xff]   ;;  %v7850_v10 = vld [vmem:[#allocation5 + $0x36c] ss:$16 sps:$4 sm:$0xff]   ;;  %8207 = vtanh.bf16 %v760_v35 }
 0x17e   :  { %2556 = vmatprep.subr.bf16.mxu0 %v7829_v7  ;;  %2848 = vmatprep.subr.bf16.mxu1 %v7832_v5  ;;  %v555_v27 = vadd.f32 %v554_v57, %v8943_v29  ;;  %v556_v31 = vpop.f32.mrb[35].mxu1  ;;  %v704_v7 = vmul.bf16 1027030327, %v672_v33  ;;  %v648_v5 = vmul.bf16 %v8945_v30, %v8945_v30  ;;  %v759_v34 = vmul.bf16 1061961548, %v727_v11 }
 0x17f   :  { %2572 = vmatprep.mubr.bf16.mxu0 %v880_v42  ;;  %2864 = vmatprep.mubr.bf16.mxu1 %v880_v42  ;;  %v557_v44 = vadd.f32 %v556_v31, %v8950_v55  ;;  %v7845_v42 = vld [vmem:[#allocation5 + $0x360] ss:$16 sps:$4 sm:$0xff]   ;;  %v647_v31 = vmul.bf16 %v8938_v50, %v8938_v50  ;;  %v7859_v35 = vld [vmem:[#allocation5 + $0x3a4] ss:$16 sps:$4 sm:$0xff]   ;;  %v7860_v11 = vld [vmem:[#allocation5 + $0x3a8] ss:$16 sps:$4 sm:$0xff]  }
 0x180   :  { %v8964_v37 = vpack.c.bf16 %v555_v27, %v551_v20  ;;  %v680_v57 = vmul.bf16 %v648_v5, %v8945_v30  ;;  %v7856_v27 = vld [vmem:[#allocation5 + $0x38c] ss:$16 sps:$4 sm:$0xff]   ;;  %8209 = vtanh.bf16 %v759_v34  ;;  %v7871_v34 = vld [vmem:[#allocation5 + $0x3e4] ss:$16 sps:$4 sm:$0xff]  }
 0x181   :  { %2557 = vmatpush1.bf16.msra.mxu0 %v7827_v14  ;;  %2849 = vmatpush1.bf16.msra.mxu1 %v7830_v17  ;;  %v8969_v48 = vpack.c.bf16 %v557_v44, %v553_v58  ;;  %v703_v58 = vmul.bf16 1027030327, %v671_v56 }
 0x182   :  { %2558 = vmatprep.subr.bf16.mxu0 %v7835_v22  ;;  %2850 = vmatprep.subr.bf16.mxu1 %v7838_v26  ;;  %v736_v22 = vadd.bf16 %v704_v7, %v8920_v15  ;;  %v712_v51 = vmul.bf16 1027030327, %v680_v57 }
 0x183   :  { %v560_v2 = vpop.f32.mrb[36].mxu1  ;;  %v735_v54 = vadd.bf16 %v703_v58, %v8918_v12 }
 0x184   :  { %v562_v9 = vpop.f32.mrb[37].mxu1  ;;  %v561_v61 = vadd.f32 %v560_v2, %v8943_v29  ;;  %v7862_v2 = vld [vmem:[#allocation5 + $0x3ac] ss:$16 sps:$4 sm:$0xff]  }
 0x185   :  { %2559 = vmatpush1.bf16.msra.mxu0 %v7833_v38  ;;  %2851 = vmatpush1.bf16.msra.mxu1 %v7836_v39  ;;  %v564_v20 = vpop.f32.mrb[38].mxu1  ;;  %v563_v13 = vadd.f32 %v562_v9, %v8950_v55  ;;  %v7851_v39 = vld [vmem:[#allocation5 + $0x380] ss:$16 sps:$4 sm:$0xff]   ;;  %v767_v58 = vmul.bf16 1061961548, %v735_v54 }
 0x186   :  { %2560 = vmatprep.subr.bf16.mxu0 %v7841_v52  ;;  %2852 = vmatprep.subr.bf16.mxu1 %v7844_v53  ;;  %v566_v14 = vpop.f32.mrb[39].mxu1  ;;  %v565_v17 = vadd.f32 %v564_v20, %v8943_v29  ;;  %v626_v52 = vmul.bf16 %v8795_v21, %v8795_v21  ;;  %v768_v53 = vmul.bf16 1061961548, %v736_v22 }
 0x187   :  { %v567_v26 = vadd.f32 %v566_v14, %v8950_v55 }
 0x188   :  { %v8983_v44 = vpack.c.bf16 %v565_v17, %v561_v61  ;;  %v7865_v61 = vld [vmem:[#allocation5 + $0x3c4] ss:$16 sps:$4 sm:$0xff]   ;;  %v658_v20 = vmul.bf16 %v626_v52, %v8795_v21  ;;  %8211 = vtanh.bf16 %v768_v53  ;;  %v8206_v17 = vpop.eup %8205 }
 0x189   :  { %2561 = vmatpush1.bf16.msra.mxu0 %v7839_v63  ;;  %2853 = vmatpush1.bf16.msra.mxu1 %v7842_v3  ;;  %v8985_v46 = vpack.c.bf16 %v567_v26, %v563_v13  ;;  %v679_v3 = vmul.bf16 %v647_v31, %v8938_v50  ;;  %v744_v13 = vadd.bf16 %v712_v51, %v8945_v30  ;;  %v8208_v22 = vpop.eup %8207  ;;  %8213 = vtanh.bf16 %v767_v58  ;;  %v7878_v58 = vld [vmem:[#allocation5 + $0x408] ss:$16 sps:$4 sm:$0xff]  }
 0x18a   :  { %2562 = vmatprep.subr.bf16.mxu0 %v7847_v62  ;;  %2854 = vmatprep.subr.bf16.mxu1 %v7850_v10  ;;  %v7857_v10 = vld [vmem:[#allocation5 + $0x3a0] ss:$16 sps:$4 sm:$0xff]   ;;  %v824_v54 = vadd.bf16 1065369472, %v8208_v22 }
 0x18b   :  { %v570_v38 = vpop.f32.mrb[40].mxu1 }
 0x18c   :  { %v572_v33 = vpop.f32.mrb[41].mxu1  ;;  %v571_v56 = vadd.f32 %v570_v38, %v8943_v29  ;;  %v690_v38 = vmul.bf16 1027030327, %v658_v20 }
 0x18d   :  { %2563 = vmatpush1.bf16.msra.mxu0 %v7845_v42  ;;  %2855 = vmatpush1.bf16.msra.mxu1 %v7848_v19  ;;  %v574_v63 = vpop.f32.mrb[42].mxu1  ;;  %v573_v7 = vadd.f32 %v572_v33, %v8950_v55  ;;  %v711_v42 = vmul.bf16 1027030327, %v679_v3  ;;  %v7868_v19 = vld [vmem:[#allocation5 + $0x3cc] ss:$16 sps:$4 sm:$0xff]   ;;  %v8210_v3 = vpop.eup %8209 }
 0x18e   :  { %2564 = vmatprep.subr.bf16.mxu0 %v7853_v59  ;;  %2856 = vmatprep.subr.bf16.mxu1 %v7856_v27  ;;  %v576_v5 = vpop.f32.mrb[43].mxu1  ;;  %v575_v9 = vadd.f32 %v574_v63, %v8943_v29  ;;  %v7863_v59 = vld [vmem:[#allocation5 + $0x3c0] ss:$16 sps:$4 sm:$0xff]   ;;  %v7866_v27 = vld [vmem:[#allocation5 + $0x3c8] ss:$16 sps:$4 sm:$0xff]  }
 0x18f   :  { %v577_v62 = vadd.f32 %v576_v5, %v8950_v55  ;;  %v7874_v33 = vld [vmem:[#allocation5 + $0x3ec] ss:$16 sps:$4 sm:$0xff]   ;;  %v743_v51 = vadd.bf16 %v711_v42, %v8938_v50  ;;  %v7877_v5 = vld [vmem:[#allocation5 + $0x404] ss:$16 sps:$4 sm:$0xff]   ;;  %v823_v42 = vadd.bf16 1065369472, %v8210_v3 }
 0x190   :  { %v8997_v14 = vpack.c.bf16 %v575_v9, %v571_v56  ;;  %v7869_v56 = vld [vmem:[#allocation5 + $0x3e0] ss:$16 sps:$4 sm:$0xff]   ;;  %v722_v9 = vadd.bf16 %v690_v38, %v8795_v21 }
 0x191   :  { %2565 = vmatpush1.bf16.msra.mxu0 %v7851_v39  ;;  %2857 = vmatpush1.bf16.msra.mxu1 %v7854_v45  ;;  %v8999_v57 = vpack.c.bf16 %v577_v62, %v573_v7  ;;  %v776_v39 = vmul.bf16 1061961548, %v744_v13  ;;  %v815_v45 = vadd.bf16 1065369472, %v8206_v17  ;;  %v7872_v7 = vld [vmem:[#allocation5 + $0x3e8] ss:$16 sps:$4 sm:$0xff]  }
 0x192   :  { %2566 = vmatprep.subr.bf16.mxu0 %v7859_v35  ;;  %2858 = vmatprep.subr.bf16.mxu1 %v7862_v2  ;;  %v856_v13 = vmul.bf16 1056980736, %v824_v54  ;;  %v754_v22 = vmul.bf16 1061961548, %v722_v9  ;;  %v7887_v54 = vld [vmem:[#allocation5 + $0x440] ss:$16 sps:$4 sm:$0xff]  }
 0x193   :  { %v580_v26 = vpop.f32.mrb[44].mxu1  ;;  %8215 = vtanh.bf16 %v776_v39  ;;  %v8212_v17 = vpop.eup %8211  ;;  %v7881_v39 = vld [vmem:[#allocation5 + $0x420] ss:$16 sps:$4 sm:$0xff]  }
 0x194   :  { %v582_v31 = vpop.f32.mrb[45].mxu1  ;;  %v581_v52 = vadd.f32 %v580_v26, %v8943_v29  ;;  %v8214_v38 = vpop.eup %8213  ;;  %v7893_v9 = vld [vmem:[#allocation5 + $0x460] ss:$16 sps:$4 sm:$0xff]  }
 0x195   :  { %2567 = vmatpush1.bf16.msra.mxu0 %v7857_v10  ;;  %2859 = vmatpush1.bf16.msra.mxu1 %v7860_v11  ;;  %v584_v53 = vpop.f32.mrb[46].mxu1  ;;  %v583_v63 = vadd.f32 %v582_v31, %v8950_v55  ;;  %v847_v10 = vmul.bf16 1056980736, %v815_v45  ;;  %v7880_v11 = vld [vmem:[#allocation5 + $0x40c] ss:$16 sps:$4 sm:$0xff]  }
 0x196   :  { %2568 = vmatprep.subr.bf16.mxu0 %v7865_v61  ;;  %2860 = vmatprep.subr.bf16.mxu1 %v7868_v19  ;;  %v586_v35 = vpop.f32.mrb[47].mxu1  ;;  %v585_v2 = vadd.f32 %v584_v53, %v8943_v29  ;;  %v775_v61 = vmul.bf16 1061961548, %v743_v51  ;;  %v7875_v19 = vld [vmem:[#allocation5 + $0x400] ss:$16 sps:$4 sm:$0xff]  }
 0x197   :  { %v587_v62 = vadd.f32 %v586_v35, %v8950_v55  ;;  %v879_v26 = vmul.bf16 %v847_v10, %v8882_v28  ;;  %v7883_v55 = vld [vmem:[#allocation5 + $0x424] ss:$16 sps:$4 sm:$0xff]   ;;  %v832_v31 = vadd.bf16 1065369472, %v8212_v17  ;;  %v7884_v45 = vld [vmem:[#allocation5 + $0x428] ss:$16 sps:$4 sm:$0xff]  }
 0x198   :  { %v9007_v20 = vpack.c.bf16 %v585_v2, %v581_v52  ;;  %8217 = vtanh.bf16 %v775_v61  ;;  %v7889_v28 = vld [vmem:[#allocation5 + $0x444] ss:$16 sps:$4 sm:$0xff]   ;;  %v831_v53 = vadd.bf16 1065369472, %v8214_v38  ;;  %v7898_v2 = vld [vmem:[#allocation5 + $0x46c] ss:$16 sps:$4 sm:$0xff]   ;;  %v625_v38 = vmul.bf16 %v8790_v18, %v8790_v18 }
 0x199   :  { %2569 = vmatpush1.bf16.msra.mxu0 %v7863_v59  ;;  %2861 = vmatpush1.bf16.msra.mxu1 %v7866_v27  ;;  %v9009_v29 = vpack.c.bf16 %v587_v62, %v583_v63  ;;  %v7886_v59 = vld [vmem:[#allocation5 + $0x42c] ss:$16 sps:$4 sm:$0xff]   ;;  %v888_v27 = vmul.bf16 %v856_v13, %v8900_v32  ;;  %8219 = vtanh.bf16 %v754_v22  ;;  %v864_v51 = vmul.bf16 1056980736, %v832_v31  ;;  %v7890_v63 = vld [vmem:[#allocation5 + $0x448] ss:$16 sps:$4 sm:$0xff]  }
 0x19a   :  { %2570 = vmatprep.subr.bf16.mxu0 %v7871_v34  ;;  %2862 = vmatprep.subr.bf16.mxu1 %v7874_v33  ;;  %v855_v34 = vmul.bf16 1056980736, %v823_v42  ;;  %v7892_v33 = vld [vmem:[#allocation5 + $0x44c] ss:$16 sps:$4 sm:$0xff]   ;;  %v7895_v35 = vld [vmem:[#allocation5 + $0x464] ss:$16 sps:$4 sm:$0xff]  }
 0x19b   :  { %v896_v3 = vmul.bf16 %v864_v51, %v8920_v15  ;;  %v7901_v62 = vld [vmem:[#allocation5 + $0x484] ss:$16 sps:$4 sm:$0xff]   ;;  %v7904_v10 = vld [vmem:[#allocation5 + $0x48c] ss:$16 sps:$4 sm:$0xff]   ;;  %v7899_v17 = vld [vmem:[#allocation5 + $0x480] ss:$16 sps:$4 sm:$0xff]  }
 0x19c   :  { %v887_v32 = vmul.bf16 %v855_v34, %v8897_v25  ;;  %v7896_v25 = vld [vmem:[#allocation5 + $0x468] ss:$16 sps:$4 sm:$0xff]   ;;  %v7916_v31 = vld [vmem:[#allocation5 + $0x4cc] ss:$16 sps:$4 sm:$0xff]  }
 0x19d   :  { %2571 = vmatpush1.bf16.msra.mxu0 %v7869_v56  ;;  %2863 = vmatpush1.bf16.msra.mxu1 %v7872_v7  ;;  %v863_v7 = vmul.bf16 1056980736, %v831_v53  ;;  %v7902_v42 = vld [vmem:[#allocation5 + $0x488] ss:$16 sps:$4 sm:$0xff]   ;;  %v7922_v51 = vld [vmem:[#allocation5 + $0x4ec] ss:$16 sps:$4 sm:$0xff]  }
 0x19e   :  { %2613 = vmatprep.subr.bf16.mxu0 %v7877_v5  ;;  %2905 = vmatprep.subr.bf16.mxu1 %v7880_v11  ;;  %v8216_v52 = vpop.eup %8215  ;;  %v7920_v53 = vld [vmem:[#allocation5 + $0x4e8] ss:$16 sps:$4 sm:$0xff]  }
 0x19f   :  { %v840_v56 = vadd.bf16 1065369472, %v8216_v52  ;;  %v895_v13 = vmul.bf16 %v863_v7, %v8918_v12  ;;  %v7913_v12 = vld [vmem:[#allocation5 + $0x4c4] ss:$16 sps:$4 sm:$0xff]  }
 0x1a0   :  { %2573 = vmatmul.mubr.bf16.vlgmr.msra.gmra.mrb[16].mxu0 %v879_v26  ;;  %2865 = vmatmul.mubr.bf16.vlgmr.msra.gmra.mrb[48].mxu1 %v879_v26 }
 0x1a1   :  { %2614 = vmatpush1.bf16.msra.mxu0 %v7875_v19  ;;  %2906 = vmatpush1.bf16.msra.mxu1 %v7878_v58  ;;  %v872_v11 = vmul.bf16 1056980736, %v840_v56  ;;  %v7907_v19 = vld [vmem:[#allocation5 + $0x4a4] ss:$16 sps:$4 sm:$0xff]   ;;  %v7910_v58 = vld [vmem:[#allocation5 + $0x4ac] ss:$16 sps:$4 sm:$0xff]  }
 0x1a2   :  { %2615 = vmatprep.subr.bf16.mxu0 %v7883_v55  ;;  %2907 = vmatprep.subr.bf16.mxu1 %v7886_v59  ;;  %v7905_v59 = vld [vmem:[#allocation5 + $0x4a0] ss:$16 sps:$4 sm:$0xff]   ;;  %v7926_v56 = vld [vmem:[#allocation5 + $0x508] ss:$16 sps:$4 sm:$0xff]  }
 0x1a3   :  { %2582 = vmatprep.mubr.bf16.mxu0 %v888_v27  ;;  %2874 = vmatprep.mubr.bf16.mxu1 %v888_v27  ;;  %v8218_v5 = vpop.eup %8217  ;;  %v904_v22 = vmul.bf16 %v872_v11, %v8945_v30  ;;  %v7908_v27 = vld [vmem:[#allocation5 + $0x4a8] ss:$16 sps:$4 sm:$0xff]   ;;  %v7929_v11 = vld [vmem:[#allocation5 + $0x520] ss:$16 sps:$4 sm:$0xff]  }
 0x1a4   :  { %v8220_v61 = vpop.eup %8219  ;;  %v839_v15 = vadd.bf16 1065369472, %v8218_v5  ;;  %v642_v5 = vmul.bf16 %v8879_v24, %v8879_v24 }
 0x1a5   :  { %2616 = vmatpush1.bf16.msra.mxu0 %v7881_v39  ;;  %2908 = vmatpush1.bf16.msra.mxu1 %v7884_v45  ;;  %v818_v26 = vadd.bf16 1065369472, %v8220_v61  ;;  %v7911_v39 = vld [vmem:[#allocation5 + $0x4c0] ss:$16 sps:$4 sm:$0xff]   ;;  %v7914_v45 = vld [vmem:[#allocation5 + $0x4c8] ss:$16 sps:$4 sm:$0xff]  }
 0x1a6   :  { %2617 = vmatprep.subr.bf16.mxu0 %v7889_v28  ;;  %2909 = vmatprep.subr.bf16.mxu1 %v7892_v33  ;;  %v871_v55 = vmul.bf16 1056980736, %v839_v15  ;;  %v634_v28 = vmul.bf16 %v8824_v4, %v8824_v4  ;;  %v7919_v33 = vld [vmem:[#allocation5 + $0x4e4] ss:$16 sps:$4 sm:$0xff]   ;;  %v7932_v61 = vld [vmem:[#allocation5 + $0x528] ss:$16 sps:$4 sm:$0xff]  }
 0x1a7   :  { %v850_v34 = vmul.bf16 1056980736, %v818_v26  ;;  %v7935_v26 = vld [vmem:[#allocation5 + $0x540] ss:$16 sps:$4 sm:$0xff]  }
 0x1a8   :  { %2583 = vmatmul.mubr.bf16.gmra.mrb[20].mxu0 %v887_v32  ;;  %2875 = vmatmul.mubr.bf16.gmra.mrb[52].mxu1 %v887_v32  ;;  %v903_v30 = vmul.bf16 %v871_v55, %v8938_v50  ;;  %v657_v32 = vmul.bf16 %v625_v38, %v8790_v18  ;;  %v7917_v50 = vld [vmem:[#allocation5 + $0x4e0] ss:$16 sps:$4 sm:$0xff]   ;;  %v7938_v55 = vld [vmem:[#allocation5 + $0x548] ss:$16 sps:$4 sm:$0xff]  }
 0x1a9   :  { %2618 = vmatpush1.bf16.msra.mxu0 %v7887_v54  ;;  %2910 = vmatpush1.bf16.msra.mxu1 %v7890_v63  ;;  %v882_v52 = vmul.bf16 %v850_v34, %v8795_v21  ;;  %v666_v54 = vmul.bf16 %v634_v28, %v8824_v4  ;;  %v7925_v63 = vld [vmem:[#allocation5 + $0x504] ss:$16 sps:$4 sm:$0xff]   ;;  %v7946_v34 = vld [vmem:[#allocation5 + $0x56c] ss:$16 sps:$4 sm:$0xff]  }
 0x1aa   :  { %2619 = vmatprep.subr.bf16.mxu0 %v7895_v35  ;;  %2911 = vmatprep.subr.bf16.mxu1 %v7898_v2  ;;  %v7928_v35 = vld [vmem:[#allocation5 + $0x50c] ss:$16 sps:$4 sm:$0xff]   ;;  %v633_v2 = vmul.bf16 %v8820_v1, %v8820_v1  ;;  %v689_v21 = vmul.bf16 1027030327, %v657_v32  ;;  %v7949_v28 = vld [vmem:[#allocation5 + $0x584] ss:$16 sps:$4 sm:$0xff]  }
 0x1ab   :  { %2592 = vmatprep.mubr.bf16.mxu0 %v896_v3  ;;  %2884 = vmatprep.mubr.bf16.mxu1 %v896_v3  ;;  %v7923_v3 = vld [vmem:[#allocation5 + $0x500] ss:$16 sps:$4 sm:$0xff]   ;;  %v698_v7 = vmul.bf16 1027030327, %v666_v54  ;;  %v7952_v32 = vld [vmem:[#allocation5 + $0x58c] ss:$16 sps:$4 sm:$0xff]  }
 0x1ac   :  { %v7947_v54 = vld [vmem:[#allocation5 + $0x580] ss:$16 sps:$4 sm:$0xff]  }
 0x1ad   :  { %2620 = vmatpush1.bf16.msra.mxu0 %v7893_v9  ;;  %2912 = vmatpush1.bf16.msra.mxu1 %v7896_v25  ;;  %v7931_v9 = vld [vmem:[#allocation5 + $0x524] ss:$16 sps:$4 sm:$0xff]   ;;  %v7934_v25 = vld [vmem:[#allocation5 + $0x52c] ss:$16 sps:$4 sm:$0xff]   ;;  %v730_v15 = vadd.bf16 %v698_v7, %v8824_v4 }
 0x1ae   :  { %2621 = vmatprep.subr.bf16.mxu0 %v7901_v62  ;;  %2913 = vmatprep.subr.bf16.mxu1 %v7904_v10  ;;  %v665_v62 = vmul.bf16 %v633_v2, %v8820_v1  ;;  %v721_v10 = vadd.bf16 %v689_v21, %v8790_v18  ;;  %v628_v2 = vmul.bf16 %v8969_v48, %v8969_v48 }
 0x1b0   :  { %2593 = vmatmul.mubr.bf16.gmra.mrb[24].mxu0 %v895_v13  ;;  %2885 = vmatmul.mubr.bf16.gmra.mrb[56].mxu1 %v895_v13  ;;  %v674_v13 = vmul.bf16 %v642_v5, %v8879_v24 }
 0x1b1   :  { %2622 = vmatpush1.bf16.msra.mxu0 %v7899_v17  ;;  %2914 = vmatpush1.bf16.msra.mxu1 %v7902_v42  ;;  %v697_v17 = vmul.bf16 1027030327, %v665_v62  ;;  %v7937_v42 = vld [vmem:[#allocation5 + $0x544] ss:$16 sps:$4 sm:$0xff]  }
 0x1b2   :  { %2623 = vmatprep.subr.bf16.mxu0 %v7907_v19  ;;  %2915 = vmatprep.subr.bf16.mxu1 %v7910_v58  ;;  %v7940_v19 = vld [vmem:[#allocation5 + $0x54c] ss:$16 sps:$4 sm:$0xff]   ;;  %v641_v58 = vmul.bf16 %v8877_v23, %v8877_v23  ;;  %v7961_v62 = vld [vmem:[#allocation5 + $0x5c4] ss:$16 sps:$4 sm:$0xff]  }
 0x1b3   :  { %2602 = vmatprep.mubr.bf16.mxu0 %v904_v22  ;;  %2894 = vmatprep.mubr.bf16.mxu1 %v904_v22  ;;  %v753_v22 = vmul.bf16 1061961548, %v721_v10  ;;  %v660_v10 = vmul.bf16 %v628_v2, %v8969_v48  ;;  %v7979_v2 = vld [vmem:[#allocation5 + $0x624] ss:$16 sps:$4 sm:$0xff]  }
 0x1b4   :  { %v673_v38 = vmul.bf16 %v641_v58, %v8877_v23  ;;  %v7962_v58 = vld [vmem:[#allocation5 + $0x5c8] ss:$16 sps:$4 sm:$0xff]  }
 0x1b5   :  { %2624 = vmatpush1.bf16.msra.mxu0 %v7905_v59  ;;  %2916 = vmatpush1.bf16.msra.mxu1 %v7908_v27  ;;  %v706_v59 = vmul.bf16 1027030327, %v674_v13  ;;  %v650_v27 = vmul.bf16 %v8922_v16, %v8922_v16  ;;  %8221 = vtanh.bf16 %v753_v22  ;;  %v7964_v13 = vld [vmem:[#allocation5 + $0x5cc] ss:$16 sps:$4 sm:$0xff]   ;;  %v692_v22 = vmul.bf16 1027030327, %v660_v10 }
 0x1b6   :  { %2625 = vmatprep.subr.bf16.mxu0 %v7913_v12  ;;  %2917 = vmatprep.subr.bf16.mxu1 %v7916_v31  ;;  %v762_v12 = vmul.bf16 1061961548, %v730_v15  ;;  %v7943_v31 = vld [vmem:[#allocation5 + $0x564] ss:$16 sps:$4 sm:$0xff]  }
 0x1b8   :  { %2603 = vmatmul.mubr.bf16.gmra.mrb[28].mxu0 %v903_v30  ;;  %2895 = vmatmul.mubr.bf16.gmra.mrb[60].mxu1 %v903_v30  ;;  %v729_v30 = vadd.bf16 %v697_v17, %v8820_v1  ;;  %8223 = vtanh.bf16 %v762_v12 }
 0x1b9   :  { %2626 = vmatpush1.bf16.msra.mxu0 %v7911_v39  ;;  %2918 = vmatpush1.bf16.msra.mxu1 %v7914_v45  ;;  %v7941_v39 = vld [vmem:[#allocation5 + $0x560] ss:$16 sps:$4 sm:$0xff]   ;;  %v7944_v45 = vld [vmem:[#allocation5 + $0x568] ss:$16 sps:$4 sm:$0xff]  }
 0x1ba   :  { %2627 = vmatprep.subr.bf16.mxu0 %v7919_v33  ;;  %2919 = vmatprep.subr.bf16.mxu1 %v7922_v51  ;;  %v682_v33 = vmul.bf16 %v650_v27, %v8922_v16  ;;  %v738_v51 = vadd.bf16 %v706_v59, %v8879_v24  ;;  %v7967_v59 = vld [vmem:[#allocation5 + $0x5e4] ss:$16 sps:$4 sm:$0xff]   ;;  %v7970_v27 = vld [vmem:[#allocation5 + $0x5ec] ss:$16 sps:$4 sm:$0xff]  }
 0x1bb   :  { %2645 = vmatprep.mubr.bf16.mxu0 %v882_v52  ;;  %2937 = vmatprep.mubr.bf16.mxu1 %v882_v52  ;;  %v705_v52 = vmul.bf16 1027030327, %v673_v38  ;;  %v7965_v38 = vld [vmem:[#allocation5 + $0x5e0] ss:$16 sps:$4 sm:$0xff]  }
 0x1bc   :  { %v770_v21 = vmul.bf16 1061961548, %v738_v51 }
 0x1bd   :  { %2628 = vmatpush1.bf16.msra.mxu0 %v7917_v50  ;;  %2920 = vmatpush1.bf16.msra.mxu1 %v7920_v53  ;;  %v649_v50 = vmul.bf16 %v8913_v6, %v8913_v6  ;;  %v761_v53 = vmul.bf16 1061961548, %v729_v30  ;;  %v737_v5 = vadd.bf16 %v705_v52, %v8877_v23  ;;  %v7968_v30 = vld [vmem:[#allocation5 + $0x5e8] ss:$16 sps:$4 sm:$0xff]  }
 0x1be   :  { %2629 = vmatprep.subr.bf16.mxu0 %v7925_v63  ;;  %2921 = vmatprep.subr.bf16.mxu1 %v7928_v35  ;;  %v7950_v63 = vld [vmem:[#allocation5 + $0x588] ss:$16 sps:$4 sm:$0xff]   ;;  %v714_v35 = vmul.bf16 1027030327, %v682_v33  ;;  %v7976_v33 = vld [vmem:[#allocation5 + $0x60c] ss:$16 sps:$4 sm:$0xff]  }
 0x1bf   :  { %v681_v7 = vmul.bf16 %v649_v50, %v8913_v6  ;;  %8225 = vtanh.bf16 %v761_v53  ;;  %v769_v15 = vmul.bf16 1061961548, %v737_v5  ;;  %v7971_v53 = vld [vmem:[#allocation5 + $0x600] ss:$16 sps:$4 sm:$0xff]  }
 0x1c0   :  { %8227 = vtanh.bf16 %v770_v21  ;;  %v8222_v17 = vpop.eup %8221  ;;  %v7982_v21 = vld [vmem:[#allocation5 + $0x62c] ss:$16 sps:$4 sm:$0xff]  }
 0x1c1   :  { %2630 = vmatpush1.bf16.msra.mxu0 %v7923_v3  ;;  %2922 = vmatpush1.bf16.msra.mxu1 %v7926_v56  ;;  %v7955_v3 = vld [vmem:[#allocation5 + $0x5a4] ss:$16 sps:$4 sm:$0xff]   ;;  %v7958_v56 = vld [vmem:[#allocation5 + $0x5ac] ss:$16 sps:$4 sm:$0xff]   ;;  %8229 = vtanh.bf16 %v769_v15  ;;  %v7986_v15 = vld [vmem:[#allocation5 + $0x648] ss:$16 sps:$4 sm:$0xff]  }
 0x1c2   :  { %2631 = vmatprep.subr.bf16.mxu0 %v7931_v9  ;;  %2923 = vmatprep.subr.bf16.mxu1 %v7934_v25  ;;  %v7953_v9 = vld [vmem:[#allocation5 + $0x5a0] ss:$16 sps:$4 sm:$0xff]   ;;  %v7956_v25 = vld [vmem:[#allocation5 + $0x5a8] ss:$16 sps:$4 sm:$0xff]  }
 0x1c5   :  { %2632 = vmatpush1.bf16.msra.mxu0 %v7929_v11  ;;  %2924 = vmatpush1.bf16.msra.mxu1 %v7932_v61  ;;  %v746_v11 = vadd.bf16 %v714_v35, %v8922_v16  ;;  %v713_v61 = vmul.bf16 1027030327, %v681_v7 }
 0x1c6   :  { %2633 = vmatprep.subr.bf16.mxu0 %v7937_v42  ;;  %2925 = vmatprep.subr.bf16.mxu1 %v7940_v19  ;;  %v8224_v42 = vpop.eup %8223  ;;  %v7959_v19 = vld [vmem:[#allocation5 + $0x5c0] ss:$16 sps:$4 sm:$0xff]  }
 0x1c7   :  { %v745_v12 = vadd.bf16 %v713_v61, %v8913_v6 }
 0x1c9   :  { %2634 = vmatpush1.bf16.msra.mxu0 %v7935_v26  ;;  %2926 = vmatpush1.bf16.msra.mxu1 %v7938_v55  ;;  %v778_v26 = vmul.bf16 1061961548, %v746_v11  ;;  %v817_v55 = vadd.bf16 1065369472, %v8222_v17  ;;  %v777_v51 = vmul.bf16 1061961548, %v745_v12 }
 0x1ca   :  { %2635 = vmatprep.subr.bf16.mxu0 %v7943_v31  ;;  %2927 = vmatprep.subr.bf16.mxu1 %v7946_v34  ;;  %v826_v31 = vadd.bf16 1065369472, %v8224_v42  ;;  %v8226_v34 = vpop.eup %8225  ;;  %v7991_v17 = vld [vmem:[#allocation5 + $0x664] ss:$16 sps:$4 sm:$0xff]   ;;  %v7994_v42 = vld [vmem:[#allocation5 + $0x66c] ss:$16 sps:$4 sm:$0xff]  }
 0x1cb   :  { %8231 = vtanh.bf16 %v778_v26  ;;  %v825_v50 = vadd.bf16 1065369472, %v8226_v34 }
 0x1cc   :  { %v858_v52 = vmul.bf16 1056980736, %v826_v31  ;;  %8233 = vtanh.bf16 %v777_v51 }
 0x1cd   :  { %2636 = vmatpush1.bf16.msra.mxu0 %v7941_v39  ;;  %2928 = vmatpush1.bf16.msra.mxu1 %v7944_v45  ;;  %v7973_v39 = vld [vmem:[#allocation5 + $0x604] ss:$16 sps:$4 sm:$0xff]   ;;  %v724_v45 = vadd.bf16 %v692_v22, %v8969_v48  ;;  %v857_v7 = vmul.bf16 1056980736, %v825_v50 }
 0x1ce   :  { %2637 = vmatprep.subr.bf16.mxu0 %v7949_v28  ;;  %2929 = vmatprep.subr.bf16.mxu1 %v7952_v32  ;;  %v849_v28 = vmul.bf16 1056980736, %v817_v55  ;;  %v8228_v32 = vpop.eup %8227  ;;  %v7989_v55 = vld [vmem:[#allocation5 + $0x660] ss:$16 sps:$4 sm:$0xff]   ;;  %v8009_v50 = vld [vmem:[#allocation5 + $0x6c4] ss:$16 sps:$4 sm:$0xff]  }
 0x1cf   :  { %v8230_v5 = vpop.eup %8229 }
 0x1d0   :  { %v881_v35 = vmul.bf16 %v849_v28, %v8790_v18  ;;  %v7985_v18 = vld [vmem:[#allocation5 + $0x644] ss:$16 sps:$4 sm:$0xff]   ;;  %v833_v61 = vadd.bf16 1065369472, %v8230_v5 }
 0x1d1   :  { %2638 = vmatpush1.bf16.msra.mxu0 %v7947_v54  ;;  %2930 = vmatpush1.bf16.msra.mxu1 %v7950_v63  ;;  %v7974_v54 = vld [vmem:[#allocation5 + $0x608] ss:$16 sps:$4 sm:$0xff]   ;;  %v756_v63 = vmul.bf16 1061961548, %v724_v45  ;;  %v8006_v45 = vld [vmem:[#allocation5 + $0x6ac] ss:$16 sps:$4 sm:$0xff]  }
 0x1d2   :  { %2639 = vmatprep.subr.bf16.mxu0 %v7955_v3  ;;  %2931 = vmatprep.subr.bf16.mxu1 %v7958_v56  ;;  %v890_v3 = vmul.bf16 %v858_v52, %v8824_v4  ;;  %v834_v56 = vadd.bf16 1065369472, %v8228_v32  ;;  %v889_v4 = vmul.bf16 %v857_v7, %v8820_v1  ;;  %v865_v22 = vmul.bf16 1056980736, %v833_v61  ;;  %v7992_v1 = vld [vmem:[#allocation5 + $0x668] ss:$16 sps:$4 sm:$0xff]  }
 0x1d3   :  { %8235 = vtanh.bf16 %v756_v63  ;;  %v8001_v52 = vld [vmem:[#allocation5 + $0x6a0] ss:$16 sps:$4 sm:$0xff]   ;;  %v8004_v32 = vld [vmem:[#allocation5 + $0x6a8] ss:$16 sps:$4 sm:$0xff]  }
 0x1d4   :  { %v866_v10 = vmul.bf16 1056980736, %v834_v56  ;;  %v897_v34 = vmul.bf16 %v865_v22, %v8877_v23  ;;  %v627_v23 = vmul.bf16 %v8964_v37, %v8964_v37  ;;  %v8018_v56 = vld [vmem:[#allocation5 + $0x6ec] ss:$16 sps:$4 sm:$0xff]   ;;  %v8022_v61 = vld [vmem:[#allocation5 + $0x708] ss:$16 sps:$4 sm:$0xff]  }
 0x1d5   :  { %2640 = vmatpush1.bf16.msra.mxu0 %v7953_v9  ;;  %2932 = vmatpush1.bf16.msra.mxu1 %v7956_v25  ;;  %v7977_v9 = vld [vmem:[#allocation5 + $0x620] ss:$16 sps:$4 sm:$0xff]   ;;  %v7980_v25 = vld [vmem:[#allocation5 + $0x628] ss:$16 sps:$4 sm:$0xff]  }
 0x1d6   :  { %2641 = vmatprep.subr.bf16.mxu0 %v7961_v62  ;;  %2933 = vmatprep.subr.bf16.mxu1 %v7964_v13  ;;  %v7988_v62 = vld [vmem:[#allocation5 + $0x64c] ss:$16 sps:$4 sm:$0xff]   ;;  %v8232_v11 = vpop.eup %8231  ;;  %v7983_v13 = vld [vmem:[#allocation5 + $0x640] ss:$16 sps:$4 sm:$0xff]  }
 0x1d7   :  { %v8234_v26 = vpop.eup %8233  ;;  %v8025_v22 = vld [vmem:[#allocation5 + $0x720] ss:$16 sps:$4 sm:$0xff]  }
 0x1d9   :  { %2642 = vmatpush1.bf16.msra.mxu0 %v7959_v19  ;;  %2934 = vmatpush1.bf16.msra.mxu1 %v7962_v58  ;;  %v898_v19 = vmul.bf16 %v866_v10, %v8879_v24  ;;  %v842_v58 = vadd.bf16 1065369472, %v8232_v11  ;;  %v841_v24 = vadd.bf16 1065369472, %v8234_v26  ;;  %v635_v10 = vmul.bf16 %v8983_v44, %v8983_v44  ;;  %v8028_v26 = vld [vmem:[#allocation5 + $0x728] ss:$16 sps:$4 sm:$0xff]  }
 0x1da   :  { %2643 = vmatprep.subr.bf16.mxu0 %v7967_v59  ;;  %2935 = vmatprep.subr.bf16.mxu1 %v7970_v27  ;;  %v7997_v59 = vld [vmem:[#allocation5 + $0x684] ss:$16 sps:$4 sm:$0xff]   ;;  %v8000_v27 = vld [vmem:[#allocation5 + $0x68c] ss:$16 sps:$4 sm:$0xff]  }
 0x1db   :  { %v874_v12 = vmul.bf16 1056980736, %v842_v58  ;;  %v873_v51 = vmul.bf16 1056980736, %v841_v24 }
 0x1dd   :  { %2644 = vmatpush1.bf16.msra.mxu0 %v7965_v38  ;;  %2936 = vmatpush1.bf16.msra.mxu1 %v7968_v30  ;;  %v7995_v38 = vld [vmem:[#allocation5 + $0x680] ss:$16 sps:$4 sm:$0xff]   ;;  %v7998_v30 = vld [vmem:[#allocation5 + $0x688] ss:$16 sps:$4 sm:$0xff]   ;;  %v906_v28 = vmul.bf16 %v874_v12, %v8922_v16  ;;  %v636_v16 = vmul.bf16 %v8985_v46, %v8985_v46  ;;  %v905_v63 = vmul.bf16 %v873_v51, %v8913_v6 }
 0x1de   :  { %2686 = vmatprep.subr.bf16.mxu0 %v7973_v39  ;;  %2978 = vmatprep.subr.bf16.mxu1 %v7976_v33  ;;  %v8236_v31 = vpop.eup %8235  ;;  %v8003_v39 = vld [vmem:[#allocation5 + $0x6a4] ss:$16 sps:$4 sm:$0xff]   ;;  %v8016_v6 = vld [vmem:[#allocation5 + $0x6e8] ss:$16 sps:$4 sm:$0xff]   ;;  %v643_v12 = vmul.bf16 %v8997_v14, %v8997_v14 }
 0x1df   :  { %v820_v33 = vadd.bf16 1065369472, %v8236_v31  ;;  %v668_v5 = vmul.bf16 %v636_v16, %v8985_v46  ;;  %v651_v16 = vmul.bf16 %v9007_v20, %v9007_v20 }
 0x1e0   :  { %2646 = vmatmul.mubr.bf16.vlgmr.msra.gmra.mrb[16].mxu0 %v881_v35  ;;  %2938 = vmatmul.mubr.bf16.vlgmr.msra.gmra.mrb[48].mxu1 %v881_v35  ;;  %v8007_v35 = vld [vmem:[#allocation5 + $0x6c0] ss:$16 sps:$4 sm:$0xff]  }
 0x1e1   :  { %2687 = vmatpush1.bf16.msra.mxu0 %v7971_v53  ;;  %2979 = vmatpush1.bf16.msra.mxu1 %v7974_v54  ;;  %v8012_v53 = vld [vmem:[#allocation5 + $0x6cc] ss:$16 sps:$4 sm:$0xff]   ;;  %v852_v54 = vmul.bf16 1056980736, %v820_v33  ;;  %v700_v11 = vmul.bf16 1027030327, %v668_v5  ;;  %v683_v5 = vmul.bf16 %v651_v16, %v9007_v20 }
 0x1e2   :  { %2688 = vmatprep.subr.bf16.mxu0 %v7979_v2  ;;  %2980 = vmatprep.subr.bf16.mxu1 %v7982_v21  ;;  %v8010_v2 = vld [vmem:[#allocation5 + $0x6c8] ss:$16 sps:$4 sm:$0xff]   ;;  %v659_v21 = vmul.bf16 %v627_v23, %v8964_v37 }
 0x1e3   :  { %2655 = vmatprep.mubr.bf16.mxu0 %v890_v3  ;;  %2947 = vmatprep.mubr.bf16.mxu1 %v890_v3  ;;  %v8015_v3 = vld [vmem:[#allocation5 + $0x6e4] ss:$16 sps:$4 sm:$0xff]   ;;  %v884_v7 = vmul.bf16 %v852_v54, %v8969_v48  ;;  %v644_v48 = vmul.bf16 %v8999_v57, %v8999_v57  ;;  %v732_v58 = vadd.bf16 %v700_v11, %v8985_v46  ;;  %v8040_v23 = vld [vmem:[#allocation5 + $0x768] ss:$16 sps:$4 sm:$0xff]   ;;  %v8048_v54 = vld [vmem:[#allocation5 + $0x78c] ss:$16 sps:$4 sm:$0xff]  }
 0x1e5   :  { %2689 = vmatpush1.bf16.msra.mxu0 %v7977_v9  ;;  %2981 = vmatpush1.bf16.msra.mxu1 %v7980_v25  ;;  %v8013_v9 = vld [vmem:[#allocation5 + $0x6e0] ss:$16 sps:$4 sm:$0xff]   ;;  %v691_v25 = vmul.bf16 1027030327, %v659_v21  ;;  %v764_v24 = vmul.bf16 1061961548, %v732_v58 }
 0x1e6   :  { %2690 = vmatprep.subr.bf16.mxu0 %v7985_v18  ;;  %2982 = vmatprep.subr.bf16.mxu1 %v7988_v62  ;;  %v8021_v18 = vld [vmem:[#allocation5 + $0x704] ss:$16 sps:$4 sm:$0xff]   ;;  %v8024_v62 = vld [vmem:[#allocation5 + $0x70c] ss:$16 sps:$4 sm:$0xff]   ;;  %v8043_v21 = vld [vmem:[#allocation5 + $0x780] ss:$16 sps:$4 sm:$0xff]  }
 0x1e7   :  { %v8063_v58 = vld [vmem:[#allocation5 + $0x7e4] ss:$16 sps:$4 sm:$0xff]  }
 0x1e8   :  { %2656 = vmatmul.mubr.bf16.gmra.mrb[20].mxu0 %v889_v4  ;;  %2948 = vmatmul.mubr.bf16.gmra.mrb[52].mxu1 %v889_v4  ;;  %v8019_v4 = vld [vmem:[#allocation5 + $0x700] ss:$16 sps:$4 sm:$0xff]  }
 0x1e9   :  { %2691 = vmatpush1.bf16.msra.mxu0 %v7983_v13  ;;  %2983 = vmatpush1.bf16.msra.mxu1 %v7986_v15  ;;  %v723_v13 = vadd.bf16 %v691_v25, %v8964_v37  ;;  %v8027_v15 = vld [vmem:[#allocation5 + $0x724] ss:$16 sps:$4 sm:$0xff]  }
 0x1ea   :  { %2692 = vmatprep.subr.bf16.mxu0 %v7991_v17  ;;  %2984 = vmatprep.subr.bf16.mxu1 %v7994_v42  ;;  %v8030_v17 = vld [vmem:[#allocation5 + $0x72c] ss:$16 sps:$4 sm:$0xff]   ;;  %v667_v42 = vmul.bf16 %v635_v10, %v8983_v44  ;;  %v8057_v10 = vld [vmem:[#allocation5 + $0x7c4] ss:$16 sps:$4 sm:$0xff]  }
 0x1eb   :  { %2665 = vmatprep.mubr.bf16.mxu0 %v898_v19  ;;  %2957 = vmatprep.mubr.bf16.mxu1 %v898_v19  ;;  %v676_v19 = vmul.bf16 %v644_v48, %v8999_v57  ;;  %v715_v48 = vmul.bf16 1027030327, %v683_v5  ;;  %v3232_v5 = vld [vmem:[#allocation7 + $0xa8] sm:$0xff] }
 0x1ed   :  { %2693 = vmatpush1.bf16.msra.mxu0 %v7989_v55  ;;  %2985 = vmatpush1.bf16.msra.mxu1 %v7992_v1  ;;  %v8033_v55 = vld [vmem:[#allocation5 + $0x744] ss:$16 sps:$4 sm:$0xff]   ;;  %v755_v1 = vmul.bf16 1061961548, %v723_v13  ;;  %v708_v31 = vmul.bf16 1027030327, %v676_v19 }
 0x1ee   :  { %2694 = vmatprep.subr.bf16.mxu0 %v7997_v59  ;;  %2986 = vmatprep.subr.bf16.mxu1 %v8000_v27  ;;  %v699_v59 = vmul.bf16 1027030327, %v667_v42  ;;  %v8036_v27 = vld [vmem:[#allocation5 + $0x74c] ss:$16 sps:$4 sm:$0xff]   ;;  %v8058_v42 = vld [vmem:[#allocation5 + $0x7c8] ss:$16 sps:$4 sm:$0xff]  }
 0x1ef   :  { %8237 = vtanh.bf16 %v755_v1  ;;  %v3215_v1 = vld [vmem:[#allocation7 + $0x20] sm:$0xff] }
 0x1f0   :  { %2666 = vmatmul.mubr.bf16.gmra.mrb[24].mxu0 %v897_v34  ;;  %2958 = vmatmul.mubr.bf16.gmra.mrb[56].mxu1 %v897_v34  ;;  %v652_v34 = vmul.bf16 %v9009_v29, %v9009_v29  ;;  %v731_v33 = vadd.bf16 %v699_v59, %v8983_v44  ;;  %8239 = vtanh.bf16 %v764_v24  ;;  %v3212_v59 = vld [vmem:[#allocation7 + $0x8] sm:$0xff] }
 0x1f1   :  { %2695 = vmatpush1.bf16.msra.mxu0 %v7995_v38  ;;  %2987 = vmatpush1.bf16.msra.mxu1 %v7998_v30  ;;  %v8031_v38 = vld [vmem:[#allocation5 + $0x740] ss:$16 sps:$4 sm:$0xff]   ;;  %v8034_v30 = vld [vmem:[#allocation5 + $0x748] ss:$16 sps:$4 sm:$0xff]  }
 0x1f2   :  { %2696 = vmatprep.subr.bf16.mxu0 %v8003_v39  ;;  %2988 = vmatprep.subr.bf16.mxu1 %v8006_v45  ;;  %v8039_v39 = vld [vmem:[#allocation5 + $0x764] ss:$16 sps:$4 sm:$0xff]   ;;  %v8042_v45 = vld [vmem:[#allocation5 + $0x76c] ss:$16 sps:$4 sm:$0xff]   ;;  %v684_v51 = vmul.bf16 %v652_v34, %v9009_v29  ;;  %v8064_v34 = vld [vmem:[#allocation5 + $0x7e8] ss:$16 sps:$4 sm:$0xff]  }
 0x1f3   :  { %2675 = vmatprep.mubr.bf16.mxu0 %v906_v28  ;;  %2967 = vmatprep.mubr.bf16.mxu1 %v906_v28  ;;  %v675_v28 = vmul.bf16 %v643_v12, %v8997_v14 }
 0x1f5   :  { %2697 = vmatpush1.bf16.msra.mxu0 %v8001_v52  ;;  %2989 = vmatpush1.bf16.msra.mxu1 %v8004_v32  ;;  %v740_v52 = vadd.bf16 %v708_v31, %v8999_v57  ;;  %v8037_v32 = vld [vmem:[#allocation5 + $0x760] ss:$16 sps:$4 sm:$0xff]  }
 0x1f6   :  { %2698 = vmatprep.subr.bf16.mxu0 %v8009_v50  ;;  %2990 = vmatprep.subr.bf16.mxu1 %v8012_v53  ;;  %v8045_v50 = vld [vmem:[#allocation5 + $0x784] ss:$16 sps:$4 sm:$0xff]   ;;  %v707_v53 = vmul.bf16 1027030327, %v675_v28  ;;  %v8061_v31 = vld [vmem:[#allocation5 + $0x7e0] ss:$16 sps:$4 sm:$0xff]  }
 0x1f8   :  { %2676 = vmatmul.mubr.bf16.gmra.mrb[28].mxu0 %v905_v63  ;;  %2968 = vmatmul.mubr.bf16.gmra.mrb[60].mxu1 %v905_v63  ;;  %v763_v63 = vmul.bf16 1061961548, %v731_v33  ;;  %v3219_v33 = vld [vmem:[#allocation7 + $0x40] sm:$0xff] }
 0x1f9   :  { %2699 = vmatpush1.bf16.msra.mxu0 %v8007_v35  ;;  %2991 = vmatpush1.bf16.msra.mxu1 %v8010_v2  ;;  %v716_v35 = vmul.bf16 1027030327, %v684_v51  ;;  %v772_v2 = vmul.bf16 1061961548, %v740_v52  ;;  %v3223_v52 = vld [vmem:[#allocation7 + $0x60] sm:$0xff] }
 0x1fa   :  { %2700 = vmatprep.subr.bf16.mxu0 %v8015_v3  ;;  %2992 = vmatprep.subr.bf16.mxu1 %v8018_v56  ;;  %v8046_v3 = vld [vmem:[#allocation5 + $0x788] ss:$16 sps:$4 sm:$0xff]   ;;  %v8051_v56 = vld [vmem:[#allocation5 + $0x7a4] ss:$16 sps:$4 sm:$0xff]   ;;  %8241 = vtanh.bf16 %v763_v63  ;;  %v8238_v25 = vpop.eup %8237 }
 0x1fb   :  { %2718 = vmatprep.mubr.bf16.mxu0 %v884_v7  ;;  %3010 = vmatprep.mubr.bf16.mxu1 %v884_v7  ;;  %v8054_v7 = vld [vmem:[#allocation5 + $0x7ac] ss:$16 sps:$4 sm:$0xff]   ;;  %8243 = vtanh.bf16 %v772_v2  ;;  %v8240_v11 = vpop.eup %8239 }
 0x1fc   :  { %v828_v19 = vadd.bf16 1065369472, %v8240_v11 }
 0x1fd   :  { %2701 = vmatpush1.bf16.msra.mxu0 %v8013_v9  ;;  %2993 = vmatpush1.bf16.msra.mxu1 %v8016_v6  ;;  %v739_v9 = vadd.bf16 %v707_v53, %v8997_v14  ;;  %v748_v6 = vadd.bf16 %v716_v35, %v9009_v29  ;;  %v6963_v35 = vcombine.high %v3219_v33, %v3223_v52 }
 0x1fe   :  { %2702 = vmatprep.subr.bf16.mxu0 %v8021_v18  ;;  %2994 = vmatprep.subr.bf16.mxu1 %v8024_v62  ;;  %v8049_v18 = vld [vmem:[#allocation5 + $0x7a0] ss:$16 sps:$4 sm:$0xff]   ;;  %v8052_v62 = vld [vmem:[#allocation5 + $0x7a8] ss:$16 sps:$4 sm:$0xff]   ;;  %v860_v24 = vmul.bf16 1056980736, %v828_v19 }
 0x1ff   :  { %v780_v13 = vmul.bf16 1061961548, %v748_v6 }
 0x201   :  { %2703 = vmatpush1.bf16.msra.mxu0 %v8019_v4  ;;  %2995 = vmatpush1.bf16.msra.mxu1 %v8022_v61  ;;  %v8060_v4 = vld [vmem:[#allocation5 + $0x7cc] ss:$16 sps:$4 sm:$0xff]   ;;  %v771_v61 = vmul.bf16 1061961548, %v739_v9 }
 0x202   :  { %2704 = vmatprep.subr.bf16.mxu0 %v8027_v15  ;;  %2996 = vmatprep.subr.bf16.mxu1 %v8030_v17  ;;  %v819_v15 = vadd.bf16 1065369472, %v8238_v25  ;;  %v8055_v17 = vld [vmem:[#allocation5 + $0x7c0] ss:$16 sps:$4 sm:$0xff]  }
 0x203   :  { %8245 = vtanh.bf16 %v771_v61  ;;  %v3236_v61 = vld [vmem:[#allocation7 + $0xc8] sm:$0xff] }
 0x204   :  { %8247 = vtanh.bf16 %v780_v13  ;;  %v3240_v13 = vld [vmem:[#allocation7 + $0xe8] sm:$0xff] }
 0x205   :  { %2705 = vmatpush1.bf16.msra.mxu0 %v8025_v22  ;;  %2997 = vmatpush1.bf16.msra.mxu1 %v8028_v26  ;;  %v8066_v22 = vld [vmem:[#allocation5 + $0x7ec] ss:$16 sps:$4 sm:$0xff]   ;;  %v747_v26 = vadd.bf16 %v715_v48, %v9007_v20  ;;  %v8242_v12 = vpop.eup %8241 }
 0x206   :  { %2706 = vmatprep.subr.bf16.mxu0 %v8033_v55  ;;  %2998 = vmatprep.subr.bf16.mxu1 %v8036_v27  ;;  %v3211_v55 = vld [vmem:[#allocation7] sm:$0xff]  ;;  %v3216_v27 = vld [vmem:[#allocation7 + $0x28] sm:$0xff]  ;;  %v827_v51 = vadd.bf16 1065369472, %v8242_v12 }
 0x207   :  { %v6957_v28 = vcombine.high %v3212_v59, %v3216_v27  ;;  %v6954_v16 = vcombine.low %v3211_v55, %v3215_v1  ;;  %v6956_v63 = vcombine.low %v3212_v59, %v3216_v27  ;;  %v3248_v59 = vld [vmem:[#allocation7 + $0x128] sm:$0xff] }
 0x209   :  { %2707 = vmatpush1.bf16.msra.mxu0 %v8031_v38  ;;  %2999 = vmatpush1.bf16.msra.mxu1 %v8034_v30  ;;  %v8244_v38 = vpop.eup %8243  ;;  %v851_v30 = vmul.bf16 1056980736, %v819_v15 }
 0x20a   :  { %2708 = vmatprep.subr.bf16.mxu0 %v8039_v39  ;;  %3000 = vmatprep.subr.bf16.mxu1 %v8042_v45  ;;  %v779_v39 = vmul.bf16 1061961548, %v747_v26  ;;  %v6955_v45 = vcombine.high %v3211_v55, %v3215_v1  ;;  %v836_v53 = vadd.bf16 1065369472, %v8244_v38  ;;  %v3243_v26 = vld [vmem:[#allocation7 + $0x100] sm:$0xff]  ;;  %v3244_v1 = vld [vmem:[#allocation7 + $0x108] sm:$0xff] }
 0x20b   :  { %v3251_v38 = vld [vmem:[#allocation7 + $0x140] sm:$0xff] }
 0x20c   :  { %8249 = vtanh.bf16 %v779_v39 }
 0x20d   :  { %2709 = vmatpush1.bf16.msra.mxu0 %v8037_v32  ;;  %3001 = vmatpush1.bf16.msra.mxu1 %v8040_v23  ;;  %v3220_v32 = vld [vmem:[#allocation7 + $0x48] sm:$0xff] }
 0x20e   :  { %2710 = vmatprep.subr.bf16.mxu0 %v8045_v50  ;;  %3002 = vmatprep.subr.bf16.mxu1 %v8048_v54  ;;  %v3224_v23 = vld [vmem:[#allocation7 + $0x68] sm:$0xff]  ;;  %v892_v50 = vmul.bf16 %v860_v24, %v8985_v46  ;;  %v883_v54 = vmul.bf16 %v851_v30, %v8964_v37  ;;  %v8246_v9 = vpop.eup %8245  ;;  %v868_v46 = vmul.bf16 1056980736, %v836_v53  ;;  %v6962_v37 = vcombine.low %v3219_v33, %v3223_v52  ;;  %v3259_v53 = vld [vmem:[#allocation7 + $0x180] sm:$0xff] }
 0x20f   :  { %v6965_v2 = vcombine.high %v3220_v32, %v3224_v23  ;;  %v8248_v6 = vpop.eup %8247  ;;  %v6964_v25 = vcombine.low %v3220_v32, %v3224_v23  ;;  %v835_v48 = vadd.bf16 1065369472, %v8246_v9  ;;  %v6989_v24 = vcombine.high %v3244_v1, %v3248_v59  ;;  %v3256_v33 = vld [vmem:[#allocation7 + $0x168] sm:$0xff]  ;;  %v3271_v9 = vld [vmem:[#allocation7 + $0x1e0] sm:$0xff] }
 0x210   :  { %v900_v15 = vmul.bf16 %v868_v46, %v8999_v57  ;;  %v6988_v32 = vcombine.low %v3244_v1, %v3248_v59  ;;  %v3268_v46 = vld [vmem:[#allocation7 + $0x1c8] sm:$0xff]  ;;  %v3291_v1 = vld [vmem:[#allocation7 + $0x280] sm:$0xff] }
 0x211   :  { %2711 = vmatpush1.bf16.msra.mxu0 %v8043_v21  ;;  %3003 = vmatpush1.bf16.msra.mxu1 %v8046_v3  ;;  %v3227_v21 = vld [vmem:[#allocation7 + $0x80] sm:$0xff]  ;;  %v859_v3 = vmul.bf16 1056980736, %v827_v51  ;;  %v867_v55 = vmul.bf16 1056980736, %v835_v48 }
 0x212   :  { %2712 = vmatprep.subr.bf16.mxu0 %v8051_v56  ;;  %3004 = vmatprep.subr.bf16.mxu1 %v8054_v7  ;;  %v3231_v56 = vld [vmem:[#allocation7 + $0xa0] sm:$0xff]  ;;  %v3228_v7 = vld [vmem:[#allocation7 + $0x88] sm:$0xff] }
 0x213   :  { %v891_v11 = vmul.bf16 %v859_v3, %v8983_v44  ;;  %v6972_v19 = vcombine.low %v3228_v7, %v3232_v5  ;;  %v3247_v44 = vld [vmem:[#allocation7 + $0x120] sm:$0xff]  ;;  %v899_v30 = vmul.bf16 %v867_v55, %v8997_v14  ;;  %v3260_v14 = vld [vmem:[#allocation7 + $0x188] sm:$0xff] }
 0x214   :  { %v6986_v52 = vcombine.low %v3243_v26, %v3247_v44  ;;  %v3295_v59 = vld [vmem:[#allocation7 + $0x2a0] sm:$0xff] }
 0x215   :  { %2713 = vmatpush1.bf16.msra.mxu0 %v8049_v18  ;;  %3005 = vmatpush1.bf16.msra.mxu1 %v8052_v62  ;;  %v6971_v18 = vcombine.high %v3227_v21, %v3231_v56  ;;  %v6973_v62 = vcombine.high %v3228_v7, %v3232_v5  ;;  %v3267_v5 = vld [vmem:[#allocation7 + $0x1c0] sm:$0xff] }
 0x216   :  { %2714 = vmatprep.subr.bf16.mxu0 %v8057_v10  ;;  %3006 = vmatprep.subr.bf16.mxu1 %v8060_v4  ;;  %v3235_v10 = vld [vmem:[#allocation7 + $0xc0] sm:$0xff] }
 0x217   :  { %v3239_v4 = vld [vmem:[#allocation7 + $0xe0] sm:$0xff]  ;;  %v8250_v27 = vpop.eup %8249 }
 0x218   :  { %v6978_v12 = vcombine.low %v3235_v10, %v3239_v4  ;;  %v843_v39 = vadd.bf16 1065369472, %v8250_v27  ;;  %v3292_v27 = vld [vmem:[#allocation7 + $0x288] sm:$0xff] }
 0x219   :  { %2715 = vmatpush1.bf16.msra.mxu0 %v8055_v17  ;;  %3007 = vmatpush1.bf16.msra.mxu1 %v8058_v42  ;;  %v844_v17 = vadd.bf16 1065369472, %v8248_v6  ;;  %v6970_v42 = vcombine.low %v3227_v21, %v3231_v56  ;;  %v7011_v6 = vcombine.high %v3267_v5, %v3271_v9 }
 0x21a   :  { %2716 = vmatprep.subr.bf16.mxu0 %v8063_v58  ;;  %3008 = vmatprep.subr.bf16.mxu1 %v8066_v22  ;;  %v6979_v58 = vcombine.high %v3235_v10, %v3239_v4  ;;  %v6981_v22 = vcombine.high %v3236_v61, %v3240_v13  ;;  %v3279_v10 = vld [vmem:[#allocation7 + $0x220] sm:$0xff]  ;;  %v3280_v4 = vld [vmem:[#allocation7 + $0x228] sm:$0xff] }
 0x21b   :  { %v876_v57 = vmul.bf16 1056980736, %v844_v17  ;;  %v3283_v17 = vld [vmem:[#allocation7 + $0x240] sm:$0xff] }
 0x21d   :  { %2717 = vmatpush1.bf16.msra.mxu0 %v8061_v31  ;;  %3009 = vmatpush1.bf16.msra.mxu1 %v8064_v34  ;;  %v6980_v31 = vcombine.low %v3236_v61, %v3240_v13  ;;  %v6987_v34 = vcombine.high %v3243_v26, %v3247_v44  ;;  %v908_v51 = vmul.bf16 %v876_v57, %v9009_v29 }
 0x21e   :  { %4789 = vmatprep.subr.bf16.mxu0 %v6955_v45  ;;  %4935 = vmatprep.subr.bf16.mxu1 %v6957_v28  ;;  %v3255_v45 = vld [vmem:[#allocation7 + $0x160] sm:$0xff]  ;;  %v3252_v28 = vld [vmem:[#allocation7 + $0x148] sm:$0xff]  ;;  %v7035_v57 = vcombine.high %v3291_v1, %v3295_v59 }
 0x21f   :  { %v6995_v23 = vcombine.high %v3251_v38, %v3255_v45  ;;  %v6994_v29 = vcombine.low %v3251_v38, %v3255_v45  ;;  %v3299_v38 = vld [vmem:[#allocation7 + $0x2c0] sm:$0xff] }
 0x220   :  { %2719 = vmatmul.mubr.bf16.vlgmr.msra.gmra.mrb[16].mxu0 %v883_v54  ;;  %3011 = vmatmul.mubr.bf16.vlgmr.msra.gmra.mrb[48].mxu1 %v883_v54  ;;  %v875_v54 = vmul.bf16 1056980736, %v843_v39  ;;  %v3300_v39 = vld [vmem:[#allocation7 + $0x2c8] sm:$0xff] }
 0x221   :  { %2728 = vmatprep.mubr.bf16.mxu0 %v892_v50  ;;  %3020 = vmatprep.mubr.bf16.mxu1 %v892_v50  ;;  %v6997_v50 = vcombine.high %v3252_v28, %v3256_v33 }
 0x222   :  { %4790 = vmatpush1.bf16.msra.mxu0 %v6954_v16  ;;  %4936 = vmatpush1.bf16.msra.mxu1 %v6956_v63  ;;  %v3263_v16 = vld [vmem:[#allocation7 + $0x1a0] sm:$0xff]  ;;  %v3264_v63 = vld [vmem:[#allocation7 + $0x1a8] sm:$0xff]  ;;  %v907_v3 = vmul.bf16 %v875_v54, %v9007_v20 }
 0x223   :  { %4791 = vmatprep.subr.bf16.mxu0 %v6963_v35  ;;  %4937 = vmatprep.subr.bf16.mxu1 %v6965_v2  ;;  %v6996_v35 = vcombine.low %v3252_v28, %v3256_v33  ;;  %v7003_v2 = vcombine.high %v3259_v53, %v3263_v16  ;;  %v7005_v21 = vcombine.high %v3260_v14, %v3264_v63  ;;  %v3275_v20 = vld [vmem:[#allocation7 + $0x200] sm:$0xff]  ;;  %v3304_v28 = vld [vmem:[#allocation7 + $0x2e8] sm:$0xff] }
 0x224   :  { %v7002_v56 = vcombine.low %v3259_v53, %v3263_v16  ;;  %v7004_v7 = vcombine.low %v3260_v14, %v3264_v63  ;;  %v7019_v48 = vcombine.high %v3275_v20, %v3279_v10  ;;  %v7018_v61 = vcombine.low %v3275_v20, %v3279_v10  ;;  %v3312_v54 = vld [vmem:[#allocation7 + $0x328] sm:$0xff]  ;;  %v3331_v10 = vld [vmem:[#allocation7 + $0x3c0] sm:$0xff] }
 0x226   :  { %4792 = vmatpush1.bf16.msra.mxu0 %v6962_v37  ;;  %4938 = vmatpush1.bf16.msra.mxu1 %v6964_v25  ;;  %v3272_v37 = vld [vmem:[#allocation7 + $0x1e8] sm:$0xff]  ;;  %v7010_v25 = vcombine.low %v3267_v5, %v3271_v9  ;;  %v3323_v9 = vld [vmem:[#allocation7 + $0x380] sm:$0xff] }
 0x227   :  { %4793 = vmatprep.subr.bf16.mxu0 %v6971_v18  ;;  %4939 = vmatprep.subr.bf16.mxu1 %v6973_v62  ;;  %v7012_v18 = vcombine.low %v3268_v46, %v3272_v37  ;;  %v7013_v62 = vcombine.high %v3268_v46, %v3272_v37  ;;  %v3327_v46 = vld [vmem:[#allocation7 + $0x3a0] sm:$0xff] }
 0x228   :  { %2729 = vmatmul.mubr.bf16.gmra.mrb[20].mxu0 %v891_v11  ;;  %3021 = vmatmul.mubr.bf16.gmra.mrb[52].mxu1 %v891_v11  ;;  %v3276_v11 = vld [vmem:[#allocation7 + $0x208] sm:$0xff]  ;;  %v7067_v37 = vcombine.high %v3323_v9, %v3327_v46 }
 0x229   :  { %2738 = vmatprep.mubr.bf16.mxu0 %v900_v15  ;;  %3030 = vmatprep.mubr.bf16.mxu1 %v900_v15  ;;  %v7020_v13 = vcombine.low %v3276_v11, %v3280_v4  ;;  %v7021_v15 = vcombine.high %v3276_v11, %v3280_v4  ;;  %v3335_v11 = vld [vmem:[#allocation7 + $0x3e0] sm:$0xff] }
 0x22a   :  { %4794 = vmatpush1.bf16.msra.mxu0 %v6970_v42  ;;  %4940 = vmatpush1.bf16.msra.mxu1 %v6972_v19  ;;  %v3287_v42 = vld [vmem:[#allocation7 + $0x260] sm:$0xff]  ;;  %v3284_v19 = vld [vmem:[#allocation7 + $0x248] sm:$0xff]  ;;  %v7075_v4 = vcombine.high %v3331_v10, %v3335_v11 }
 0x22b   :  { %4795 = vmatprep.subr.bf16.mxu0 %v6979_v58  ;;  %4941 = vmatprep.subr.bf16.mxu1 %v6981_v22  ;;  %v7027_v58 = vcombine.high %v3283_v17, %v3287_v42  ;;  %v3288_v22 = vld [vmem:[#allocation7 + $0x268] sm:$0xff]  ;;  %v7026_v26 = vcombine.low %v3283_v17, %v3287_v42  ;;  %v9094_v42 = vld [vmem:[#allocation7 + $0x400] sm:$0xff] }
 0x22c   :  { %v7028_v55 = vcombine.low %v3284_v19, %v3288_v22  ;;  %v7029_v44 = vcombine.high %v3284_v19, %v3288_v22  ;;  %v9096_v19 = vld [vmem:[#allocation7 + $0x420] sm:$0xff] }
 0x22d   :  { %v7083_v22 = vcombine.high %v9094_v42, %v9096_v19 }
 0x22e   :  { %4796 = vmatpush1.bf16.msra.mxu0 %v6978_v12  ;;  %4942 = vmatpush1.bf16.msra.mxu1 %v6980_v31  ;;  %v3296_v12 = vld [vmem:[#allocation7 + $0x2a8] sm:$0xff]  ;;  %v7034_v31 = vcombine.low %v3291_v1, %v3295_v59  ;;  %v1165_v59 = vld [vmem:[%s9740_s4] sm:$0xf] }
 0x22f   :  { %4797 = vmatprep.subr.bf16.mxu0 %v6987_v34  ;;  %4943 = vmatprep.subr.bf16.mxu1 %v6989_v24  ;;  %v7036_v34 = vcombine.low %v3292_v27, %v3296_v12  ;;  %v7037_v24 = vcombine.high %v3292_v27, %v3296_v12  ;;  %v9114_v27 = vrot.slane %v1165_v59, %v8738_v41 }
 0x230   :  { %2739 = vmatmul.mubr.bf16.gmra.mrb[24].mxu0 %v899_v30  ;;  %3031 = vmatmul.mubr.bf16.gmra.mrb[56].mxu1 %v899_v30  ;;  %v3303_v30 = vld [vmem:[#allocation7 + $0x2e0] sm:$0xff] }
 0x231   :  { %2748 = vmatprep.mubr.bf16.mxu0 %v908_v51  ;;  %3040 = vmatprep.mubr.bf16.mxu1 %v908_v51  ;;  %v7043_v45 = vcombine.high %v3299_v38, %v3303_v30  ;;  %v7042_v33 = vcombine.low %v3299_v38, %v3303_v30  ;;  %v7044_v51 = vcombine.low %v3300_v39, %v3304_v28 }
 0x232   :  { %4798 = vmatpush1.bf16.msra.mxu0 %v6986_v52  ;;  %4944 = vmatpush1.bf16.msra.mxu1 %v6988_v32  ;;  %v7045_v52 = vcombine.high %v3300_v39, %v3304_v28  ;;  %v3307_v32 = vld [vmem:[#allocation7 + $0x300] sm:$0xff] }
 0x233   :  { %4799 = vmatprep.subr.bf16.mxu0 %v6995_v23  ;;  %4945 = vmatprep.subr.bf16.mxu1 %v6997_v50  ;;  %v3311_v23 = vld [vmem:[#allocation7 + $0x320] sm:$0xff]  ;;  %v3308_v50 = vld [vmem:[#allocation7 + $0x308] sm:$0xff] }
 0x234   :  { %v7051_v53 = vcombine.high %v3307_v32, %v3311_v23  ;;  %v7050_v16 = vcombine.low %v3307_v32, %v3311_v23  ;;  %v7052_v14 = vcombine.low %v3308_v50, %v3312_v54  ;;  %v7053_v63 = vcombine.high %v3308_v50, %v3312_v54 }
 0x236   :  { %4800 = vmatpush1.bf16.msra.mxu0 %v6994_v29  ;;  %4946 = vmatpush1.bf16.msra.mxu1 %v6996_v35  ;;  %v3315_v29 = vld [vmem:[#allocation7 + $0x340] sm:$0xff] }
 0x237   :  { %4801 = vmatprep.subr.bf16.mxu0 %v7003_v2  ;;  %4947 = vmatprep.subr.bf16.mxu1 %v7005_v21  ;;  %v3319_v35 = vld [vmem:[#allocation7 + $0x360] sm:$0xff]  ;;  %v3316_v2 = vld [vmem:[#allocation7 + $0x348] sm:$0xff] }
 0x238   :  { %2749 = vmatmul.mubr.bf16.gmra.mrb[28].mxu0 %v907_v3  ;;  %3041 = vmatmul.mubr.bf16.gmra.mrb[60].mxu1 %v907_v3  ;;  %v7059_v21 = vcombine.high %v3315_v29, %v3319_v35  ;;  %v3320_v3 = vld [vmem:[#allocation7 + $0x368] sm:$0xff] }
 0x239   :  { %v7061_v5 = vcombine.high %v3316_v2, %v3320_v3 }
 0x23a   :  { %4802 = vmatpush1.bf16.msra.mxu0 %v7002_v56  ;;  %4948 = vmatpush1.bf16.msra.mxu1 %v7004_v7  ;;  %v7058_v56 = vcombine.low %v3315_v29, %v3319_v35  ;;  %v7060_v7 = vcombine.low %v3316_v2, %v3320_v3 }
 0x23b   :  { %4803 = vmatprep.subr.bf16.mxu0 %v7011_v6  ;;  %4949 = vmatprep.subr.bf16.mxu1 %v7013_v62  ;;  %v3324_v6 = vld [vmem:[#allocation7 + $0x388] sm:$0xff] }
 0x23e   :  { %4804 = vmatpush1.bf16.msra.mxu0 %v7010_v25  ;;  %4950 = vmatpush1.bf16.msra.mxu1 %v7012_v18  ;;  %v3328_v25 = vld [vmem:[#allocation7 + $0x3a8] sm:$0xff]  ;;  %v7066_v18 = vcombine.low %v3323_v9, %v3327_v46 }
 0x23f   :  { %4805 = vmatprep.subr.bf16.mxu0 %v7019_v48  ;;  %4951 = vmatprep.subr.bf16.mxu1 %v7021_v15  ;;  %v7068_v62 = vcombine.low %v3324_v6, %v3328_v25  ;;  %v7069_v20 = vcombine.high %v3324_v6, %v3328_v25  ;;  %v3332_v48 = vld [vmem:[#allocation7 + $0x3c8] sm:$0xff] }
 0x242   :  { %4806 = vmatpush1.bf16.msra.mxu0 %v7018_v61  ;;  %4952 = vmatpush1.bf16.msra.mxu1 %v7020_v13  ;;  %v3336_v61 = vld [vmem:[#allocation7 + $0x3e8] sm:$0xff]  ;;  %v7074_v13 = vcombine.low %v3331_v10, %v3335_v11 }
 0x243   :  { %4807 = vmatprep.subr.bf16.mxu0 %v7027_v58  ;;  %4953 = vmatprep.subr.bf16.mxu1 %v7029_v44  ;;  %v7076_v15 = vcombine.low %v3332_v48, %v3336_v61  ;;  %v7077_v17 = vcombine.high %v3332_v48, %v3336_v61  ;;  %v9098_v58 = vld [vmem:[#allocation7 + $0x408] sm:$0xff] }
 0x246   :  { %4808 = vmatpush1.bf16.msra.mxu0 %v7026_v26  ;;  %4954 = vmatpush1.bf16.msra.mxu1 %v7028_v55  ;;  %v9102_v26 = vld [vmem:[#allocation7 + $0x428] sm:$0xff]  ;;  %v7082_v55 = vcombine.low %v9094_v42, %v9096_v19 }
 0x247   :  { %4809 = vmatprep.subr.bf16.mxu0 %v7035_v57  ;;  %4955 = vmatprep.subr.bf16.mxu1 %v7037_v24  ;;  %v7084_v44 = vcombine.low %v9098_v58, %v9102_v26  ;;  %v7085_v1 = vcombine.high %v9098_v58, %v9102_v26  ;;  %v9117_v57 = vrot.slane %v1165_v59, %v8829_v8 }
 0x248   :  { %v9123_v24 = vrot.slane %v1165_v59, %v8832_v0 }
 0x24a   :  { %4810 = vmatpush1.bf16.msra.mxu0 %v7034_v31  ;;  %4956 = vmatpush1.bf16.msra.mxu1 %v7036_v34  ;;  %v9120_v34 = vrot.slane %v1165_v59, %v8746_v43 }
 0x24b   :  { %4811 = vmatprep.subr.bf16.mxu0 %v7043_v45  ;;  %4957 = vmatprep.subr.bf16.mxu1 %v7045_v52 }
 0x24e   :  { %4812 = vmatpush1.bf16.msra.mxu0 %v7042_v33  ;;  %4958 = vmatpush1.bf16.msra.mxu1 %v7044_v51 }
 0x24f   :  { %4813 = vmatprep.subr.bf16.mxu0 %v7051_v53  ;;  %4959 = vmatprep.subr.bf16.mxu1 %v7053_v63 }
 0x252   :  { %4814 = vmatpush1.bf16.msra.mxu0 %v7050_v16  ;;  %4960 = vmatpush1.bf16.msra.mxu1 %v7052_v14 }
 0x253   :  { %4815 = vmatprep.subr.bf16.mxu0 %v7059_v21  ;;  %4961 = vmatprep.subr.bf16.mxu1 %v7061_v5 }
 0x256   :  { %4816 = vmatpush1.bf16.msra.mxu0 %v7058_v56  ;;  %4962 = vmatpush1.bf16.msra.mxu1 %v7060_v7 }
 0x257   :  { %4817 = vmatprep.subr.bf16.mxu0 %v7067_v37  ;;  %4963 = vmatprep.subr.bf16.mxu1 %v7069_v20 }
 0x25a   :  { %4818 = vmatpush1.bf16.msra.mxu0 %v7066_v18  ;;  %4964 = vmatpush1.bf16.msra.mxu1 %v7068_v62 }
 0x25b   :  { %4819 = vmatprep.subr.bf16.mxu0 %v7075_v4  ;;  %4965 = vmatprep.subr.bf16.mxu1 %v7077_v17 }
 0x25e   :  { %4820 = vmatpush1.bf16.msra.mxu0 %v7074_v13  ;;  %4966 = vmatpush1.bf16.msra.mxu1 %v7076_v15 }
 0x25f   :  { %4862 = vmatprep.subr.bf16.mxu0 %v7083_v22  ;;  %5008 = vmatprep.subr.bf16.mxu1 %v7085_v1 }
 0x2f3   :  { %v2720_v12 = vpop.f32.mrb[16].mxu0  ;;  %v3012_v31 = vpop.f32.mrb[48].mxu1 }
 0x2f4   :  { %v2722_v38 = vpop.f32.mrb[17].mxu0  ;;  %v3014_v30 = vpop.f32.mrb[49].mxu1  ;;  %v7376_v28 = vadd.f32 %v2720_v12, %v9114_v27  ;;  %v7392_v33 = vadd.f32 %v3012_v31, %v9117_v57 }
 0x2f5   :  { %v2724_v39 = vpop.f32.mrb[18].mxu0  ;;  %v3016_v45 = vpop.f32.mrb[50].mxu1  ;;  %v7377_v50 = vadd.f32 %v2722_v38, %v9120_v34  ;;  %v7393_v53 = vadd.f32 %v3014_v30, %v9123_v24 }
 0x2f6   :  { %v7378_v51 = vadd.f32 %v2724_v39, %v9114_v27  ;;  %v7394_v52 = vadd.f32 %v3016_v45, %v9117_v57  ;;  %v2726_v32 = vpop.f32.mrb[19].mxu0  ;;  %v3018_v23 = vpop.f32.mrb[51].mxu1 }
 0x2f7   :  { %v7379_v54 = vadd.f32 %v2726_v32, %v9120_v34  ;;  %v7395_v16 = vadd.f32 %v3018_v23, %v9123_v24 }
 0x2f8   :  { %v9133_v14 = vpack.c.bf16 %v7378_v51, %v7376_v28  ;;  %v9135_v63 = vpack.c.bf16 %v7394_v52, %v7392_v33 }
 0x2f9   :  { %v9137_v29 = vpack.c.bf16 %v7379_v54, %v7377_v50  ;;  %v9139_v35 = vpack.c.bf16 %v7395_v16, %v7393_v53 }
 0x2fa   :  { %v3067_v2 = vmul.bf16 %v9133_v14, %v9133_v14 }
 0x2fb   :  { %v3068_v21 = vmul.bf16 %v9137_v29, %v9137_v29  ;;  %v2730_v3 = vpop.f32.mrb[20].mxu0  ;;  %v3022_v56 = vpop.f32.mrb[52].mxu1 }
 0x2fc   :  { %v3083_v7 = vmul.bf16 %v3067_v2, %v9133_v14  ;;  %v2732_v5 = vpop.f32.mrb[21].mxu0  ;;  %v3024_v9 = vpop.f32.mrb[53].mxu1  ;;  %v7380_v6 = vadd.f32 %v2730_v3, %v9114_v27  ;;  %v7396_v37 = vadd.f32 %v3022_v56, %v9117_v57 }
 0x2fd   :  { %v3084_v46 = vmul.bf16 %v3068_v21, %v9137_v29  ;;  %v2734_v25 = vpop.f32.mrb[22].mxu0  ;;  %v3026_v18 = vpop.f32.mrb[54].mxu1  ;;  %v7381_v20 = vadd.f32 %v2732_v5, %v9120_v34  ;;  %v7397_v13 = vadd.f32 %v3024_v9, %v9123_v24 }
 0x2fe   :  { %v3099_v62 = vmul.bf16 1027030327, %v3083_v7  ;;  %v7382_v10 = vadd.f32 %v2734_v25, %v9114_v27  ;;  %v7398_v11 = vadd.f32 %v3026_v18, %v9117_v57  ;;  %v2736_v48 = vpop.f32.mrb[23].mxu0  ;;  %v3028_v4 = vpop.f32.mrb[55].mxu1 }
 0x2ff   :  { %v3100_v61 = vmul.bf16 1027030327, %v3084_v46  ;;  %v7383_v15 = vadd.f32 %v2736_v48, %v9120_v34  ;;  %v7399_v17 = vadd.f32 %v3028_v4, %v9123_v24 }
 0x300   :  { %v3115_v22 = vadd.bf16 %v3099_v62, %v9133_v14  ;;  %v9156_v1 = vpack.c.bf16 %v7382_v10, %v7380_v6  ;;  %v9158_v59 = vpack.c.bf16 %v7398_v11, %v7396_v37 }
 0x301   :  { %v3116_v12 = vadd.bf16 %v3100_v61, %v9137_v29  ;;  %v9161_v31 = vpack.c.bf16 %v7383_v15, %v7381_v20  ;;  %v9163_v38 = vpack.c.bf16 %v7399_v17, %v7397_v13 }
 0x302   :  { %v3131_v30 = vmul.bf16 1061961548, %v3115_v22  ;;  %v3071_v39 = vmul.bf16 %v9156_v1, %v9156_v1 }
 0x303   :  { %v3132_v45 = vmul.bf16 1061961548, %v3116_v12  ;;  %v3072_v28 = vmul.bf16 %v9161_v31, %v9161_v31  ;;  %v2740_v33 = vpop.f32.mrb[24].mxu0  ;;  %v3032_v51 = vpop.f32.mrb[56].mxu1 }
 0x304   :  { %v3087_v52 = vmul.bf16 %v3071_v39, %v9156_v1  ;;  %v2742_v32 = vpop.f32.mrb[25].mxu0  ;;  %v3034_v23 = vpop.f32.mrb[57].mxu1  ;;  %8251 = vtanh.bf16 %v3131_v30  ;;  %v7384_v56 = vadd.f32 %v2740_v33, %v9114_v27  ;;  %v7400_v7 = vadd.f32 %v3032_v51, %v9117_v57 }
 0x305   :  { %v3088_v50 = vmul.bf16 %v3072_v28, %v9161_v31  ;;  %v2744_v53 = vpop.f32.mrb[26].mxu0  ;;  %v3036_v54 = vpop.f32.mrb[58].mxu1  ;;  %8253 = vtanh.bf16 %v3132_v45  ;;  %v7385_v9 = vadd.f32 %v2742_v32, %v9120_v34  ;;  %v7401_v25 = vadd.f32 %v3034_v23, %v9123_v24 }
 0x306   :  { %v3103_v16 = vmul.bf16 1027030327, %v3087_v52  ;;  %v2746_v2 = vpop.f32.mrb[27].mxu0  ;;  %v3038_v21 = vpop.f32.mrb[59].mxu1  ;;  %v7386_v46 = vadd.f32 %v2744_v53, %v9114_v27  ;;  %v7402_v6 = vadd.f32 %v3036_v54, %v9117_v57  ;;  %v3070_v30 = vmul.bf16 %v9139_v35, %v9139_v35 }
 0x307   :  { %v3104_v3 = vmul.bf16 1027030327, %v3088_v50  ;;  %v7387_v18 = vadd.f32 %v2746_v2, %v9120_v34  ;;  %v7403_v62 = vadd.f32 %v3038_v21, %v9123_v24 }
 0x308   :  { %v3119_v5 = vadd.bf16 %v3103_v16, %v9156_v1  ;;  %v9181_v10 = vpack.c.bf16 %v7386_v46, %v7384_v56  ;;  %v9183_v11 = vpack.c.bf16 %v7402_v6, %v7400_v7  ;;  %v3086_v16 = vmul.bf16 %v3070_v30, %v9139_v35  ;;  %v3347_v30 = vld [vmem:[#allocation7 + $0x440] sm:$0xff] }
 0x309   :  { %v3120_v37 = vadd.bf16 %v3104_v3, %v9161_v31  ;;  %v9185_v4 = vpack.c.bf16 %v7387_v18, %v7385_v9  ;;  %v9187_v61 = vpack.c.bf16 %v7403_v62, %v7401_v25 }
 0x30a   :  { %v3135_v20 = vmul.bf16 1061961548, %v3119_v5  ;;  %v3075_v17 = vmul.bf16 %v9181_v10, %v9181_v10  ;;  %v3102_v25 = vmul.bf16 1027030327, %v3086_v16 }
 0x30b   :  { %v3136_v48 = vmul.bf16 1061961548, %v3120_v37  ;;  %v2750_v13 = vpop.f32.mrb[28].mxu0  ;;  %v3042_v15 = vpop.f32.mrb[60].mxu1  ;;  %v3076_v39 = vmul.bf16 %v9185_v4, %v9185_v4 }
 0x30c   :  { %v2752_v22 = vpop.f32.mrb[29].mxu0  ;;  %v3044_v12 = vpop.f32.mrb[61].mxu1  ;;  %8255 = vtanh.bf16 %v3135_v20  ;;  %v3091_v33 = vmul.bf16 %v3075_v17, %v9181_v10  ;;  %v7388_v53 = vadd.f32 %v2750_v13, %v9114_v27  ;;  %v7404_v21 = vadd.f32 %v3042_v15, %v9117_v57 }
 0x30d   :  { %v2754_v45 = vpop.f32.mrb[30].mxu0  ;;  %v3046_v28 = vpop.f32.mrb[62].mxu1  ;;  %8257 = vtanh.bf16 %v3136_v48  ;;  %v3092_v32 = vmul.bf16 %v3076_v39, %v9185_v4  ;;  %v7389_v62 = vadd.f32 %v2752_v22, %v9120_v34  ;;  %v3351_v22 = vld [vmem:[#allocation7 + $0x460] sm:$0xff] }
 0x30e   :  { %v2756_v51 = vpop.f32.mrb[31].mxu0  ;;  %v3048_v52 = vpop.f32.mrb[63].mxu1  ;;  %v3107_v50 = vmul.bf16 1027030327, %v3091_v33  ;;  %v7390_v54 = vadd.f32 %v2754_v45, %v9114_v27  ;;  %v7406_v3 = vadd.f32 %v3046_v28, %v9117_v57  ;;  %v7405_v57 = vadd.f32 %v3044_v12, %v9123_v24  ;;  %v3352_v12 = vld [vmem:[#allocation7 + $0x468] sm:$0xff] }
 0x30f   :  { %v8252_v23 = vpop.eup %8251  ;;  %v3108_v2 = vmul.bf16 1027030327, %v3092_v32  ;;  %v7391_v48 = vadd.f32 %v2756_v51, %v9120_v34  ;;  %v7407_v13 = vadd.f32 %v3048_v52, %v9123_v24  ;;  %v3348_v32 = vld [vmem:[#allocation7 + $0x448] sm:$0xff]  ;;  %v7091_v16 = vcombine.high %v3347_v30, %v3351_v22 }
 0x310   :  { %v8254_v56 = vpop.eup %8253  ;;  %v3123_v7 = vadd.bf16 %v3107_v50, %v9181_v10  ;;  %v9203_v5 = vpack.c.bf16 %v7390_v54, %v7388_v53  ;;  %v3163_v9 = vadd.bf16 1065369472, %v8252_v23  ;;  %v9206_v6 = vpack.c.bf16 %v7406_v3, %v7404_v21  ;;  %v3355_v21 = vld [vmem:[#allocation7 + $0x480] sm:$0xff] }
 0x311   :  { %v3124_v46 = vadd.bf16 %v3108_v2, %v9185_v4  ;;  %v3164_v17 = vadd.bf16 1065369472, %v8254_v56  ;;  %v9215_v28 = vpack.c.bf16 %v7391_v48, %v7389_v62  ;;  %v9217_v33 = vpack.c.bf16 %v7407_v13, %v7405_v57  ;;  %v3363_v57 = vld [vmem:[#allocation7 + $0x4c0] sm:$0xff] }
 0x312   :  { %v3139_v37 = vmul.bf16 1061961548, %v3123_v7  ;;  %v3079_v27 = vmul.bf16 %v9203_v5, %v9203_v5  ;;  %v3179_v15 = vmul.bf16 1056980736, %v3163_v9  ;;  %v3118_v50 = vadd.bf16 %v3102_v25, %v9139_v35 }
 0x313   :  { %v3140_v18 = vmul.bf16 1061961548, %v3124_v46  ;;  %v3180_v53 = vmul.bf16 1056980736, %v3164_v17  ;;  %v3080_v24 = vmul.bf16 %v9215_v28, %v9215_v28  ;;  %v7093_v2 = vcombine.high %v3348_v32, %v3352_v12  ;;  %v3364_v17 = vld [vmem:[#allocation7 + $0x4c8] sm:$0xff] }
 0x314   :  { %8259 = vtanh.bf16 %v3139_v37  ;;  %v3095_v20 = vmul.bf16 %v3079_v27, %v9203_v5  ;;  %v9224_v52 = vmul.bf16 %v3179_v15, %v9133_v14  ;;  %v3134_v46 = vmul.bf16 1061961548, %v3118_v50  ;;  %v3359_v37 = vld [vmem:[#allocation7 + $0x4a0] sm:$0xff]  ;;  %v3356_v27 = vld [vmem:[#allocation7 + $0x488] sm:$0xff] }
 0x315   :  { %8261 = vtanh.bf16 %v3140_v18  ;;  %v9227_v54 = vmul.bf16 %v3180_v53, %v9137_v29  ;;  %v3096_v56 = vmul.bf16 %v3080_v24, %v9215_v28  ;;  %v3360_v14 = vld [vmem:[#allocation7 + $0x4a8] sm:$0xff]  ;;  %v7090_v18 = vcombine.low %v3347_v30, %v3351_v22  ;;  %v3367_v15 = vld [vmem:[#allocation7 + $0x4e0] sm:$0xff] }
 0x316   :  { %v3111_v45 = vmul.bf16 1027030327, %v3095_v20  ;;  %v7092_v62 = vcombine.low %v3348_v32, %v3352_v12  ;;  %v7099_v48 = vcombine.high %v3355_v21, %v3359_v37  ;;  %v7101_v13 = vcombine.high %v3356_v27, %v3360_v14  ;;  %v3371_v32 = vld [vmem:[#allocation7 + $0x500] sm:$0xff]  ;;  %v3372_v50 = vld [vmem:[#allocation7 + $0x508] sm:$0xff] }
 0x317   :  { %v8256_v39 = vpop.eup %8255  ;;  %4821 = vmatprep.mubr.bf16.mxu0 %v9227_v54  ;;  %4967 = vmatprep.mubr.bf16.mxu1 %v9227_v54  ;;  %v3112_v25 = vmul.bf16 1027030327, %v3096_v56  ;;  %v7098_v19 = vcombine.low %v3355_v21, %v3359_v37  ;;  %v7100_v26 = vcombine.low %v3356_v27, %v3360_v14  ;;  %v3376_v53 = vld [vmem:[#allocation7 + $0x528] sm:$0xff]  ;;  %v7106_v24 = vcombine.low %v3363_v57, %v3367_v15  ;;  %v3383_v56 = vld [vmem:[#allocation7 + $0x560] sm:$0xff] }
 0x318   :  { %v8258_v23 = vpop.eup %8257  ;;  %v3127_v34 = vadd.bf16 %v3111_v45, %v9203_v5  ;;  %v3167_v9 = vadd.bf16 1065369472, %v8256_v39  ;;  %4822 = vmatmul.mubr.bf16.vlgmr.msra.gmra.mrb[32].mxu0 %v9224_v52  ;;  %4968 = vmatmul.mubr.bf16.vlgmr.msra.gmra.mrb[64].mxu1 %v9224_v52  ;;  %v3368_v39 = vld [vmem:[#allocation7 + $0x4e8] sm:$0xff]  ;;  %v7116_v27 = vcombine.low %v3372_v50, %v3376_v53 }
 0x319   :  { %v3168_v51 = vadd.bf16 1065369472, %v8258_v23  ;;  %4863 = vmatpush1.bf16.msra.mxu0 %v7082_v55  ;;  %5009 = vmatpush1.bf16.msra.mxu1 %v7084_v44  ;;  %v3128_v20 = vadd.bf16 %v3112_v25, %v9215_v28  ;;  %v7107_v55 = vcombine.high %v3363_v57, %v3367_v15  ;;  %v7109_v44 = vcombine.high %v3364_v17, %v3368_v39  ;;  %v3375_v23 = vld [vmem:[#allocation7 + $0x520] sm:$0xff] }
 0x31a   :  { %v3143_v3 = vmul.bf16 1061961548, %v3127_v34  ;;  %4864 = vmatprep.subr.bf16.mxu0 %v7091_v16  ;;  %5010 = vmatprep.subr.bf16.mxu1 %v7093_v2  ;;  %v7115_v16 = vcombine.high %v3371_v32, %v3375_v23  ;;  %v7117_v2 = vcombine.high %v3372_v50, %v3376_v53  ;;  %v7114_v37 = vcombine.low %v3371_v32, %v3375_v23  ;;  %v3391_v57 = vld [vmem:[#allocation7 + $0x5a0] sm:$0xff]  ;;  %v3400_v23 = vld [vmem:[#allocation7 + $0x5e8] sm:$0xff] }
 0x31b   :  { %v3184_v7 = vmul.bf16 1056980736, %v3168_v51  ;;  %v3144_v42 = vmul.bf16 1061961548, %v3128_v20  ;;  %v7108_v51 = vcombine.low %v3364_v17, %v3368_v39  ;;  %v3388_v20 = vld [vmem:[#allocation7 + $0x588] sm:$0xff]  ;;  %v3399_v32 = vld [vmem:[#allocation7 + $0x5e0] sm:$0xff]  ;;  %v3074_v50 = vmul.bf16 %v9163_v38, %v9163_v38 }
 0x31c   :  { %8263 = vtanh.bf16 %v3143_v3  ;;  %v3379_v3 = vld [vmem:[#allocation7 + $0x540] sm:$0xff] }
 0x31d   :  { %v9235_v29 = vmul.bf16 %v3184_v7, %v9161_v31  ;;  %v3183_v31 = vmul.bf16 1056980736, %v3167_v9  ;;  %8265 = vtanh.bf16 %v3134_v46  ;;  %4865 = vmatpush1.bf16.msra.mxu0 %v7090_v18  ;;  %5011 = vmatpush1.bf16.msra.mxu1 %v7092_v62  ;;  %v3380_v7 = vld [vmem:[#allocation7 + $0x548] sm:$0xff]  ;;  %v7123_v25 = vcombine.high %v3379_v3, %v3383_v56  ;;  %v3387_v62 = vld [vmem:[#allocation7 + $0x580] sm:$0xff] }
 0x31e   :  { %8267 = vtanh.bf16 %v3144_v42  ;;  %4866 = vmatprep.subr.bf16.mxu0 %v7099_v48  ;;  %5012 = vmatprep.subr.bf16.mxu1 %v7101_v13  ;;  %v3384_v9 = vld [vmem:[#allocation7 + $0x568] sm:$0xff]  ;;  %v7122_v15 = vcombine.low %v3379_v3, %v3383_v56 }
 0x31f   :  { %v8260_v45 = vpop.eup %8259  ;;  %4831 = vmatprep.mubr.bf16.mxu0 %v9235_v29  ;;  %4977 = vmatprep.mubr.bf16.mxu1 %v9235_v29  ;;  %v9247_v30 = vmul.bf16 %v3183_v31, %v9156_v1  ;;  %v7125_v18 = vcombine.high %v3380_v7, %v3384_v9  ;;  %v3392_v48 = vld [vmem:[#allocation7 + $0x5a8] sm:$0xff]  ;;  %v7124_v17 = vcombine.low %v3380_v7, %v3384_v9 }
 0x320   :  { %v8262_v58 = vpop.eup %8261  ;;  %v3171_v12 = vadd.bf16 1065369472, %v8260_v45  ;;  %v7131_v45 = vcombine.high %v3387_v62, %v3391_v57  ;;  %v7133_v42 = vcombine.high %v3388_v20, %v3392_v48  ;;  %v3404_v3 = vld [vmem:[#allocation7 + $0x608] sm:$0xff] }
 0x321   :  { %v3172_v22 = vadd.bf16 1065369472, %v8262_v58  ;;  %4832 = vmatmul.mubr.bf16.gmra.mrb[36].mxu0 %v9247_v30  ;;  %4978 = vmatmul.mubr.bf16.gmra.mrb[68].mxu1 %v9247_v30  ;;  %v3408_v56 = vld [vmem:[#allocation7 + $0x628] sm:$0xff] }
 0x322   :  { %4867 = vmatpush1.bf16.msra.mxu0 %v7098_v19  ;;  %5013 = vmatpush1.bf16.msra.mxu1 %v7100_v26  ;;  %v3187_v21 = vmul.bf16 1056980736, %v3171_v12  ;;  %v3395_v26 = vld [vmem:[#allocation7 + $0x5c0] sm:$0xff]  ;;  %v3396_v12 = vld [vmem:[#allocation7 + $0x5c8] sm:$0xff] }
 0x323   :  { %v3188_v34 = vmul.bf16 1056980736, %v3172_v22  ;;  %4868 = vmatprep.subr.bf16.mxu0 %v7107_v55  ;;  %5014 = vmatprep.subr.bf16.mxu1 %v7109_v44  ;;  %v3069_v55 = vmul.bf16 %v9135_v63, %v9135_v63  ;;  %v7130_v44 = vcombine.low %v3387_v62, %v3391_v57  ;;  %v7138_v9 = vcombine.low %v3395_v26, %v3399_v32  ;;  %v3416_v62 = vld [vmem:[#allocation7 + $0x668] sm:$0xff] }
 0x324   :  { %v3073_v57 = vmul.bf16 %v9158_v59, %v9158_v59 }
 0x325   :  { %v9252_v1 = vmul.bf16 %v3188_v34, %v9185_v4  ;;  %v9257_v4 = vmul.bf16 %v3187_v21, %v9181_v10  ;;  %v7132_v34 = vcombine.low %v3388_v20, %v3392_v48  ;;  %v3407_v21 = vld [vmem:[#allocation7 + $0x620] sm:$0xff]  ;;  %v3085_v7 = vmul.bf16 %v3069_v55, %v9135_v63 }
 0x326   :  { %4869 = vmatpush1.bf16.msra.mxu0 %v7106_v24  ;;  %5015 = vmatpush1.bf16.msra.mxu1 %v7108_v51  ;;  %v3403_v51 = vld [vmem:[#allocation7 + $0x600] sm:$0xff]  ;;  %v3078_v48 = vmul.bf16 %v9187_v61, %v9187_v61 }
 0x327   :  { %v8264_v46 = vpop.eup %8263  ;;  %4841 = vmatprep.mubr.bf16.mxu0 %v9252_v1  ;;  %4987 = vmatprep.mubr.bf16.mxu1 %v9252_v1 }
 0x328   :  { %v8266_v14 = vpop.eup %8265  ;;  %4870 = vmatprep.subr.bf16.mxu0 %v7115_v16  ;;  %5016 = vmatprep.subr.bf16.mxu1 %v7117_v2  ;;  %v3175_v13 = vadd.bf16 1065369472, %v8264_v46  ;;  %v7139_v16 = vcombine.high %v3395_v26, %v3399_v32  ;;  %v7141_v2 = vcombine.high %v3396_v12, %v3400_v23  ;;  %v7140_v46 = vcombine.low %v3396_v12, %v3400_v23  ;;  %v3427_v23 = vld [vmem:[#allocation7 + $0x6c0] sm:$0xff] }
 0x329   :  { %4842 = vmatmul.mubr.bf16.gmra.mrb[40].mxu0 %v9257_v4  ;;  %4988 = vmatmul.mubr.bf16.gmra.mrb[72].mxu1 %v9257_v4  ;;  %v8268_v31 = vpop.eup %8267  ;;  %v3166_v39 = vadd.bf16 1065369472, %v8266_v14  ;;  %v3411_v14 = vld [vmem:[#allocation7 + $0x640] sm:$0xff] }
 0x32a   :  { %4871 = vmatpush1.bf16.msra.mxu0 %v7114_v37  ;;  %5017 = vmatpush1.bf16.msra.mxu1 %v7116_v27  ;;  %v3176_v10 = vadd.bf16 1065369472, %v8268_v31  ;;  %v3191_v19 = vmul.bf16 1056980736, %v3175_v13  ;;  %v7147_v37 = vcombine.high %v3403_v51, %v3407_v21  ;;  %v7149_v27 = vcombine.high %v3404_v3, %v3408_v56 }
 0x32b   :  { %4872 = vmatprep.subr.bf16.mxu0 %v7123_v25  ;;  %5018 = vmatprep.subr.bf16.mxu1 %v7125_v18  ;;  %v3182_v22 = vmul.bf16 1056980736, %v3166_v39  ;;  %v3415_v25 = vld [vmem:[#allocation7 + $0x660] sm:$0xff]  ;;  %v3412_v18 = vld [vmem:[#allocation7 + $0x648] sm:$0xff]  ;;  %v7146_v13 = vcombine.low %v3403_v51, %v3407_v21  ;;  %v7148_v31 = vcombine.low %v3404_v3, %v3408_v56  ;;  %v3077_v21 = vmul.bf16 %v9183_v11, %v9183_v11 }
 0x32c   :  { %v3192_v58 = vmul.bf16 1056980736, %v3176_v10  ;;  %v9269_v24 = vmul.bf16 %v3191_v19, %v9203_v5  ;;  %v3090_v5 = vmul.bf16 %v3074_v50, %v9163_v38  ;;  %v3419_v39 = vld [vmem:[#allocation7 + $0x680] sm:$0xff]  ;;  %v7154_v26 = vcombine.low %v3411_v14, %v3415_v25  ;;  %v3432_v51 = vld [vmem:[#allocation7 + $0x6e8] sm:$0xff] }
 0x32d   :  { %v3423_v10 = vld [vmem:[#allocation7 + $0x6a0] sm:$0xff] }
 0x32e   :  { %4873 = vmatpush1.bf16.msra.mxu0 %v7122_v15  ;;  %5019 = vmatpush1.bf16.msra.mxu1 %v7124_v17  ;;  %v9266_v53 = vmul.bf16 %v3192_v58, %v9215_v28  ;;  %v9277_v28 = vmul.bf16 %v3182_v22, %v9139_v35  ;;  %v3101_v35 = vmul.bf16 1027030327, %v3085_v7  ;;  %v3106_v20 = vmul.bf16 1027030327, %v3090_v5  ;;  %v3431_v50 = vld [vmem:[#allocation7 + $0x6e0] sm:$0xff] }
 0x32f   :  { %4874 = vmatprep.subr.bf16.mxu0 %v7131_v45  ;;  %5020 = vmatprep.subr.bf16.mxu1 %v7133_v42  ;;  %v7155_v15 = vcombine.high %v3411_v14, %v3415_v25  ;;  %v7157_v17 = vcombine.high %v3412_v18, %v3416_v62  ;;  %v3420_v45 = vld [vmem:[#allocation7 + $0x688] sm:$0xff]  ;;  %v3089_v58 = vmul.bf16 %v3073_v57, %v9158_v59  ;;  %v3439_v14 = vld [vmem:[#allocation7 + $0x720] sm:$0xff] }
 0x330   :  { %4851 = vmatprep.mubr.bf16.mxu0 %v9266_v53  ;;  %4997 = vmatprep.mubr.bf16.mxu1 %v9266_v53  ;;  %v3424_v42 = vld [vmem:[#allocation7 + $0x6a8] sm:$0xff]  ;;  %v3117_v19 = vadd.bf16 %v3101_v35, %v9135_v63  ;;  %v3122_v55 = vadd.bf16 %v3106_v20, %v9163_v38  ;;  %v7156_v22 = vcombine.low %v3412_v18, %v3416_v62 }
 0x331   :  { %4852 = vmatmul.mubr.bf16.gmra.mrb[44].mxu0 %v9269_v24  ;;  %4998 = vmatmul.mubr.bf16.gmra.mrb[76].mxu1 %v9269_v24  ;;  %v7163_v32 = vcombine.high %v3419_v39, %v3423_v10  ;;  %v7165_v12 = vcombine.high %v3420_v45, %v3424_v42  ;;  %v7162_v3 = vcombine.low %v3419_v39, %v3423_v10  ;;  %v3436_v25 = vld [vmem:[#allocation7 + $0x708] sm:$0xff]  ;;  %v3447_v39 = vld [vmem:[#allocation7 + $0x760] sm:$0xff] }
 0x332   :  { %4875 = vmatpush1.bf16.msra.mxu0 %v7130_v44  ;;  %5021 = vmatpush1.bf16.msra.mxu1 %v7132_v34  ;;  %v3094_v44 = vmul.bf16 %v3078_v48, %v9187_v61  ;;  %v3428_v34 = vld [vmem:[#allocation7 + $0x6c8] sm:$0xff]  ;;  %v3138_v56 = vmul.bf16 1061961548, %v3122_v55  ;;  %v3082_v5 = vmul.bf16 %v9217_v33, %v9217_v33  ;;  %v3093_v35 = vmul.bf16 %v3077_v21, %v9183_v11 }
 0x333   :  { %4894 = vmatprep.mubr.bf16.mxu0 %v9277_v28  ;;  %5040 = vmatprep.mubr.bf16.mxu1 %v9277_v28  ;;  %v3440_v18 = vld [vmem:[#allocation7 + $0x728] sm:$0xff]  ;;  %v7170_v57 = vcombine.low %v3427_v23, %v3431_v50 }
 0x334   :  { %4876 = vmatprep.subr.bf16.mxu0 %v7139_v16  ;;  %5022 = vmatprep.subr.bf16.mxu1 %v7141_v2  ;;  %v3133_v16 = vmul.bf16 1061961548, %v3117_v19  ;;  %v3105_v2 = vmul.bf16 1027030327, %v3089_v58  ;;  %v3110_v7 = vmul.bf16 1027030327, %v3094_v44  ;;  %v3098_v48 = vmul.bf16 %v3082_v5, %v9217_v33 }
 0x335   :  { %v3444_v10 = vld [vmem:[#allocation7 + $0x748] sm:$0xff]  ;;  %v3109_v19 = vmul.bf16 1027030327, %v3093_v35  ;;  %v3081_v58 = vmul.bf16 %v9206_v6, %v9206_v6 }
 0x336   :  { %4877 = vmatpush1.bf16.msra.mxu0 %v7138_v9  ;;  %5023 = vmatpush1.bf16.msra.mxu1 %v7140_v46  ;;  %v7164_v9 = vcombine.low %v3420_v45, %v3424_v42  ;;  %v7171_v46 = vcombine.high %v3427_v23, %v3431_v50  ;;  %8269 = vtanh.bf16 %v3133_v16  ;;  %v3121_v62 = vadd.bf16 %v3105_v2, %v9158_v59  ;;  %v3448_v45 = vld [vmem:[#allocation7 + $0x768] sm:$0xff]  ;;  %v3451_v23 = vld [vmem:[#allocation7 + $0x780] sm:$0xff] }
 0x337   :  { %4878 = vmatprep.subr.bf16.mxu0 %v7147_v37  ;;  %5024 = vmatprep.subr.bf16.mxu1 %v7149_v27  ;;  %v7173_v37 = vcombine.high %v3428_v34, %v3432_v51  ;;  %v3435_v27 = vld [vmem:[#allocation7 + $0x700] sm:$0xff]  ;;  %8271 = vtanh.bf16 %v3138_v56  ;;  %v3126_v20 = vadd.bf16 %v3110_v7, %v9187_v61  ;;  %v3114_v55 = vmul.bf16 1027030327, %v3098_v48 }
 0x338   :  { %v3137_v42 = vmul.bf16 1061961548, %v3121_v62  ;;  %v7178_v44 = vcombine.low %v3435_v27, %v3439_v14  ;;  %v3455_v50 = vld [vmem:[#allocation7 + $0x7a0] sm:$0xff]  ;;  %v3125_v16 = vadd.bf16 %v3109_v19, %v9183_v11  ;;  %v3097_v2 = vmul.bf16 %v3081_v58, %v9206_v6 }
 0x339   :  { %v3130_v21 = vadd.bf16 %v3114_v55, %v9217_v33  ;;  %v7188_v56 = vcombine.low %v3444_v10, %v3448_v45  ;;  %v7195_v7 = vcombine.high %v3451_v23, %v3455_v50 }
 0x33a   :  { %4879 = vmatpush1.bf16.msra.mxu0 %v7146_v13  ;;  %5025 = vmatpush1.bf16.msra.mxu1 %v7148_v31  ;;  %v7172_v13 = vcombine.low %v3428_v34, %v3432_v51  ;;  %v7179_v31 = vcombine.high %v3435_v27, %v3439_v14  ;;  %v3452_v34 = vld [vmem:[#allocation7 + $0x788] sm:$0xff]  ;;  %8273 = vtanh.bf16 %v3137_v42  ;;  %v3113_v62 = vmul.bf16 1027030327, %v3097_v2 }
 0x33b   :  { %4880 = vmatprep.subr.bf16.mxu0 %v7155_v15  ;;  %5026 = vmatprep.subr.bf16.mxu1 %v7157_v17  ;;  %v7181_v15 = vcombine.high %v3436_v25, %v3440_v18  ;;  %v3443_v17 = vld [vmem:[#allocation7 + $0x740] sm:$0xff]  ;;  %v3456_v51 = vld [vmem:[#allocation7 + $0x7a8] sm:$0xff]  ;;  %v3146_v35 = vmul.bf16 1061961548, %v3130_v21 }
 0x33c   :  { %v7197_v5 = vcombine.high %v3452_v34, %v3456_v51  ;;  %v3460_v27 = vld [vmem:[#allocation7 + $0x7c8] sm:$0xff]  ;;  %v3129_v42 = vadd.bf16 %v3113_v62, %v9206_v6 }
 0x33d   :  { %v3464_v14 = vld [vmem:[#allocation7 + $0x7e8] sm:$0xff] }
 0x33e   :  { %4881 = vmatpush1.bf16.msra.mxu0 %v7154_v26  ;;  %5027 = vmatpush1.bf16.msra.mxu1 %v7156_v22  ;;  %v3142_v26 = vmul.bf16 1061961548, %v3126_v20  ;;  %v7180_v22 = vcombine.low %v3436_v25, %v3440_v18  ;;  %v3141_v18 = vmul.bf16 1061961548, %v3125_v16  ;;  %v7196_v20 = vcombine.low %v3452_v34, %v3456_v51  ;;  %v3225_v34 = vld [vmem:[#allocation7 + $0x70] sm:$0xff]  ;;  %v3222_v51 = vld [vmem:[#allocation7 + $0x58] sm:$0xff] }
 0x33f   :  { %4882 = vmatprep.subr.bf16.mxu0 %v7163_v32  ;;  %5028 = vmatprep.subr.bf16.mxu1 %v7165_v12  ;;  %v7187_v32 = vcombine.high %v3443_v17, %v3447_v39  ;;  %v7189_v12 = vcombine.high %v3444_v10, %v3448_v45  ;;  %v3218_v10 = vld [vmem:[#allocation7 + $0x38] sm:$0xff]  ;;  %v7204_v58 = vcombine.low %v3460_v27, %v3464_v14 }
 0x340   :  { %8275 = vtanh.bf16 %v3142_v26  ;;  %v3226_v16 = vld [vmem:[#allocation7 + $0x78] sm:$0xff] }
 0x341   :  { %8277 = vtanh.bf16 %v3141_v18 }
 0x342   :  { %4883 = vmatpush1.bf16.msra.mxu0 %v7162_v3  ;;  %5029 = vmatpush1.bf16.msra.mxu1 %v7164_v9  ;;  %v7186_v3 = vcombine.low %v3443_v17, %v3447_v39  ;;  %v3459_v9 = vld [vmem:[#allocation7 + $0x7c0] sm:$0xff]  ;;  %v3217_v17 = vld [vmem:[#allocation7 + $0x30] sm:$0xff]  ;;  %v3214_v39 = vld [vmem:[#allocation7 + $0x18] sm:$0xff]  ;;  %8279 = vtanh.bf16 %v3146_v35 }
 0x343   :  { %4884 = vmatprep.subr.bf16.mxu0 %v7171_v46  ;;  %5030 = vmatprep.subr.bf16.mxu1 %v7173_v37  ;;  %v8270_v46 = vpop.eup %8269  ;;  %v3463_v37 = vld [vmem:[#allocation7 + $0x7e0] sm:$0xff] }
 0x344   :  { %v8272_v25 = vpop.eup %8271  ;;  %v3165_v48 = vadd.bf16 1065369472, %v8270_v46  ;;  %v7202_v19 = vcombine.low %v3459_v9, %v3463_v37  ;;  %v3229_v46 = vld [vmem:[#allocation7 + $0x90] sm:$0xff] }
 0x345   :  { %v3170_v45 = vadd.bf16 1065369472, %v8272_v25  ;;  %v6968_v25 = vcombine.low %v3222_v51, %v3226_v16 }
 0x346   :  { %4885 = vmatpush1.bf16.msra.mxu0 %v7170_v57  ;;  %5031 = vmatpush1.bf16.msra.mxu1 %v7172_v13  ;;  %v7194_v57 = vcombine.low %v3451_v23, %v3455_v50  ;;  %v7203_v13 = vcombine.high %v3459_v9, %v3463_v37  ;;  %v3181_v26 = vmul.bf16 1056980736, %v3165_v48  ;;  %v3145_v50 = vmul.bf16 1061961548, %v3129_v42  ;;  %v3237_v48 = vld [vmem:[#allocation7 + $0xd0] sm:$0xff] }
 0x347   :  { %4886 = vmatprep.subr.bf16.mxu0 %v7179_v31  ;;  %5032 = vmatprep.subr.bf16.mxu1 %v7181_v15  ;;  %v7205_v31 = vcombine.high %v3460_v27, %v3464_v14  ;;  %v3213_v15 = vld [vmem:[#allocation7 + $0x10] sm:$0xff]  ;;  %v6969_v9 = vcombine.high %v3222_v51, %v3226_v16  ;;  %v3234_v14 = vld [vmem:[#allocation7 + $0xb8] sm:$0xff] }
 0x348   :  { %v6959_v55 = vcombine.high %v3213_v15, %v3217_v17  ;;  %v9305_v2 = vmul.bf16 %v3181_v26, %v9135_v63  ;;  %v6958_v21 = vcombine.low %v3213_v15, %v3217_v17  ;;  %8281 = vtanh.bf16 %v3145_v50  ;;  %v3233_v27 = vld [vmem:[#allocation7 + $0xb0] sm:$0xff]  ;;  %v3230_v63 = vld [vmem:[#allocation7 + $0x98] sm:$0xff] }
 0x349   :  { %v6975_v35 = vcombine.high %v3229_v46, %v3233_v27  ;;  %v3238_v15 = vld [vmem:[#allocation7 + $0xd8] sm:$0xff] }
 0x34a   :  { %4887 = vmatpush1.bf16.msra.mxu0 %v7178_v44  ;;  %5033 = vmatpush1.bf16.msra.mxu1 %v7180_v22  ;;  %v6961_v44 = vcombine.high %v3214_v39, %v3218_v10  ;;  %v8274_v22 = vpop.eup %8273  ;;  %v3242_v17 = vld [vmem:[#allocation7 + $0xf8] sm:$0xff] }
 0x34b   :  { %4888 = vmatprep.subr.bf16.mxu0 %v7187_v32  ;;  %5034 = vmatprep.subr.bf16.mxu1 %v7189_v12  ;;  %v3186_v32 = vmul.bf16 1056980736, %v3170_v45  ;;  %v3221_v12 = vld [vmem:[#allocation7 + $0x50] sm:$0xff]  ;;  %v8276_v23 = vpop.eup %8275  ;;  %v6976_v45 = vcombine.low %v3230_v63, %v3234_v14  ;;  %v6985_v26 = vcombine.high %v3238_v15, %v3242_v17 }
 0x34c   :  { %v3174_v37 = vadd.bf16 1065369472, %v8276_v23  ;;  %v8278_v62 = vpop.eup %8277 }
 0x34d   :  { %v3173_v42 = vadd.bf16 1065369472, %v8278_v62  ;;  %v3262_v62 = vld [vmem:[#allocation7 + $0x198] sm:$0xff] }
 0x34e   :  { %4889 = vmatpush1.bf16.msra.mxu0 %v7186_v3  ;;  %5035 = vmatpush1.bf16.msra.mxu1 %v7188_v56  ;;  %v6960_v3 = vcombine.low %v3214_v39, %v3218_v10  ;;  %v3169_v56 = vadd.bf16 1065369472, %v8274_v22  ;;  %v6974_v10 = vcombine.low %v3229_v46, %v3233_v27  ;;  %v3249_v22 = vld [vmem:[#allocation7 + $0x130] sm:$0xff] }
 0x34f   :  { %4890 = vmatprep.subr.bf16.mxu0 %v7195_v7  ;;  %5036 = vmatprep.subr.bf16.mxu1 %v7197_v5  ;;  %v9308_v7 = vmul.bf16 %v3186_v32, %v9163_v38  ;;  %v6967_v5 = vcombine.high %v3221_v12, %v3225_v34  ;;  %v6966_v38 = vcombine.low %v3221_v12, %v3225_v34  ;;  %v3246_v32 = vld [vmem:[#allocation7 + $0x118] sm:$0xff]  ;;  %v3189_v23 = vmul.bf16 1056980736, %v3173_v42 }
 0x350   :  { %v3185_v18 = vmul.bf16 1056980736, %v3169_v56  ;;  %v3254_v56 = vld [vmem:[#allocation7 + $0x158] sm:$0xff] }
 0x352   :  { %4891 = vmatpush1.bf16.msra.mxu0 %v7194_v57  ;;  %5037 = vmatpush1.bf16.msra.mxu1 %v7196_v20  ;;  %v6977_v57 = vcombine.high %v3230_v63, %v3234_v14  ;;  %v3190_v20 = vmul.bf16 1056980736, %v3174_v37  ;;  %v9315_v39 = vmul.bf16 %v3185_v18, %v9158_v59  ;;  %v3250_v59 = vld [vmem:[#allocation7 + $0x138] sm:$0xff]  ;;  %v3265_v18 = vld [vmem:[#allocation7 + $0x1b0] sm:$0xff] }
 0x353   :  { %4892 = vmatprep.subr.bf16.mxu0 %v7203_v13  ;;  %5038 = vmatprep.subr.bf16.mxu1 %v7205_v31  ;;  %v8280_v13 = vpop.eup %8279  ;;  %v3241_v31 = vld [vmem:[#allocation7 + $0xf0] sm:$0xff]  ;;  %v6993_v51 = vcombine.high %v3246_v32, %v3250_v59  ;;  %v6992_v37 = vcombine.low %v3246_v32, %v3250_v59  ;;  %v3282_v32 = vld [vmem:[#allocation7 + $0x238] sm:$0xff] }
 0x354   :  { %v6982_v12 = vcombine.low %v3237_v48, %v3241_v31  ;;  %v8282_v50 = vpop.eup %8281 }
 0x355   :  { %v3177_v27 = vadd.bf16 1065369472, %v8282_v50  ;;  %v3289_v50 = vld [vmem:[#allocation7 + $0x270] sm:$0xff] }
 0x356   :  { %4893 = vmatpush1.bf16.msra.mxu0 %v7202_v19  ;;  %5039 = vmatpush1.bf16.msra.mxu1 %v7204_v58  ;;  %v9318_v19 = vmul.bf16 %v3190_v20, %v9187_v61  ;;  %v6983_v58 = vcombine.high %v3237_v48, %v3241_v31  ;;  %v6984_v61 = vcombine.low %v3238_v15, %v3242_v17  ;;  %v3273_v31 = vld [vmem:[#allocation7 + $0x1f0] sm:$0xff]  ;;  %v3270_v15 = vld [vmem:[#allocation7 + $0x1d8] sm:$0xff] }
 0x357   :  { %5081 = vmatprep.subr.bf16.mxu0 %v6959_v55  ;;  %5227 = vmatprep.subr.bf16.mxu1 %v6961_v44  ;;  %v3245_v55 = vld [vmem:[#allocation7 + $0x110] sm:$0xff]  ;;  %v3178_v44 = vadd.bf16 1065369472, %v8280_v13  ;;  %v3274_v17 = vld [vmem:[#allocation7 + $0x1f8] sm:$0xff] }
 0x358   :  { %v6991_v34 = vcombine.high %v3245_v55, %v3249_v22  ;;  %v6990_v46 = vcombine.low %v3245_v55, %v3249_v22  ;;  %v3269_v13 = vld [vmem:[#allocation7 + $0x1d0] sm:$0xff]  ;;  %v3278_v22 = vld [vmem:[#allocation7 + $0x218] sm:$0xff]  ;;  %v7016_v59 = vcombine.low %v3270_v15, %v3274_v17 }
 0x359   :  { %4895 = vmatmul.mubr.bf16.vlgmr.msra.gmra.mrb[32].mxu0 %v9305_v2  ;;  %5041 = vmatmul.mubr.bf16.vlgmr.msra.gmra.mrb[64].mxu1 %v9305_v2  ;;  %v3194_v16 = vmul.bf16 1056980736, %v3178_v44  ;;  %v3277_v55 = vld [vmem:[#allocation7 + $0x210] sm:$0xff] }
 0x35a   :  { %4904 = vmatprep.mubr.bf16.mxu0 %v9308_v7  ;;  %5050 = vmatprep.mubr.bf16.mxu1 %v9308_v7  ;;  %v3281_v44 = vld [vmem:[#allocation7 + $0x230] sm:$0xff] }
 0x35b   :  { %5082 = vmatpush1.bf16.msra.mxu0 %v6958_v21  ;;  %5228 = vmatpush1.bf16.msra.mxu1 %v6960_v3  ;;  %v3253_v21 = vld [vmem:[#allocation7 + $0x150] sm:$0xff]  ;;  %v9328_v63 = vmul.bf16 %v3194_v16, %v9217_v33  ;;  %v3193_v33 = vmul.bf16 1056980736, %v3177_v27  ;;  %v7022_v16 = vcombine.low %v3277_v55, %v3281_v44 }
 0x35c   :  { %5083 = vmatprep.subr.bf16.mxu0 %v6967_v5  ;;  %5229 = vmatprep.subr.bf16.mxu1 %v6969_v9  ;;  %v3257_v3 = vld [vmem:[#allocation7 + $0x170] sm:$0xff]  ;;  %v3258_v5 = vld [vmem:[#allocation7 + $0x178] sm:$0xff]  ;;  %v9325_v9 = vmul.bf16 %v3189_v23, %v9183_v11 }
 0x35d   :  { %v6999_v14 = vcombine.high %v3253_v21, %v3257_v3  ;;  %v6998_v11 = vcombine.low %v3253_v21, %v3257_v3  ;;  %v3285_v23 = vld [vmem:[#allocation7 + $0x250] sm:$0xff]  ;;  %v7024_v21 = vcombine.low %v3278_v22, %v3282_v32 }
 0x35e   :  { %v7031_v3 = vcombine.high %v3285_v23, %v3289_v50  ;;  %v7030_v27 = vcombine.low %v3285_v23, %v3289_v50  ;;  %v3325_v23 = vld [vmem:[#allocation7 + $0x390] sm:$0xff] }
 0x35f   :  { %5084 = vmatpush1.bf16.msra.mxu0 %v6966_v38  ;;  %5230 = vmatpush1.bf16.msra.mxu1 %v6968_v25  ;;  %v7001_v38 = vcombine.high %v3254_v56, %v3258_v5  ;;  %v3261_v25 = vld [vmem:[#allocation7 + $0x190] sm:$0xff] }
 0x360   :  { %5085 = vmatprep.subr.bf16.mxu0 %v6975_v35  ;;  %5231 = vmatprep.subr.bf16.mxu1 %v6977_v57  ;;  %v3266_v35 = vld [vmem:[#allocation7 + $0x1b8] sm:$0xff]  ;;  %v7000_v57 = vcombine.low %v3254_v56, %v3258_v5  ;;  %v7007_v20 = vcombine.high %v3261_v25, %v3265_v18  ;;  %v3293_v56 = vld [vmem:[#allocation7 + $0x290] sm:$0xff] }
 0x361   :  { %4905 = vmatmul.mubr.bf16.gmra.mrb[36].mxu0 %v9315_v39  ;;  %5051 = vmatmul.mubr.bf16.gmra.mrb[68].mxu1 %v9315_v39  ;;  %v7009_v48 = vcombine.high %v3262_v62, %v3266_v35  ;;  %v7008_v42 = vcombine.low %v3262_v62, %v3266_v35  ;;  %v3297_v5 = vld [vmem:[#allocation7 + $0x2b0] sm:$0xff]  ;;  %v3302_v35 = vld [vmem:[#allocation7 + $0x2d8] sm:$0xff] }
 0x362   :  { %4914 = vmatprep.mubr.bf16.mxu0 %v9318_v19  ;;  %5060 = vmatprep.mubr.bf16.mxu1 %v9318_v19  ;;  %v3305_v62 = vld [vmem:[#allocation7 + $0x2f0] sm:$0xff] }
 0x363   :  { %5086 = vmatpush1.bf16.msra.mxu0 %v6974_v10  ;;  %5232 = vmatpush1.bf16.msra.mxu1 %v6976_v45  ;;  %v9335_v10 = vmul.bf16 %v3193_v33, %v9206_v6  ;;  %v7006_v45 = vcombine.low %v3261_v25, %v3265_v18  ;;  %v7014_v6 = vcombine.low %v3269_v13, %v3273_v31  ;;  %v3301_v18 = vld [vmem:[#allocation7 + $0x2d0] sm:$0xff] }
 0x364   :  { %5087 = vmatprep.subr.bf16.mxu0 %v6983_v58  ;;  %5233 = vmatprep.subr.bf16.mxu1 %v6985_v26  ;;  %v7015_v58 = vcombine.high %v3269_v13, %v3273_v31  ;;  %v7017_v26 = vcombine.high %v3270_v15, %v3274_v17  ;;  %v3309_v13 = vld [vmem:[#allocation7 + $0x310] sm:$0xff]  ;;  %v3310_v15 = vld [vmem:[#allocation7 + $0x318] sm:$0xff] }
 0x365   :  { %v3313_v31 = vld [vmem:[#allocation7 + $0x330] sm:$0xff]  ;;  %v3314_v17 = vld [vmem:[#allocation7 + $0x338] sm:$0xff] }
 0x366   :  { %v3329_v50 = vld [vmem:[#allocation7 + $0x3b0] sm:$0xff] }
 0x367   :  { %5088 = vmatpush1.bf16.msra.mxu0 %v6982_v12  ;;  %5234 = vmatpush1.bf16.msra.mxu1 %v6984_v61  ;;  %v7023_v12 = vcombine.high %v3277_v55, %v3281_v44  ;;  %v7025_v61 = vcombine.high %v3278_v22, %v3282_v32  ;;  %v3317_v55 = vld [vmem:[#allocation7 + $0x350] sm:$0xff]  ;;  %v3318_v22 = vld [vmem:[#allocation7 + $0x358] sm:$0xff] }
 0x368   :  { %5089 = vmatprep.subr.bf16.mxu0 %v6991_v34  ;;  %5235 = vmatprep.subr.bf16.mxu1 %v6993_v51  ;;  %v3286_v34 = vld [vmem:[#allocation7 + $0x258] sm:$0xff]  ;;  %v3321_v44 = vld [vmem:[#allocation7 + $0x370] sm:$0xff] }
 0x369   :  { %4915 = vmatmul.mubr.bf16.gmra.mrb[40].mxu0 %v9325_v9  ;;  %5061 = vmatmul.mubr.bf16.gmra.mrb[72].mxu1 %v9325_v9  ;;  %v3290_v51 = vld [vmem:[#allocation7 + $0x278] sm:$0xff] }
 0x36a   :  { %4924 = vmatprep.mubr.bf16.mxu0 %v9328_v63  ;;  %5070 = vmatprep.mubr.bf16.mxu1 %v9328_v63  ;;  %v3322_v32 = vld [vmem:[#allocation7 + $0x378] sm:$0xff] }
 0x36b   :  { %5090 = vmatpush1.bf16.msra.mxu0 %v6990_v46  ;;  %5236 = vmatpush1.bf16.msra.mxu1 %v6992_v37  ;;  %v3294_v46 = vld [vmem:[#allocation7 + $0x298] sm:$0xff] }
 0x36c   :  { %5091 = vmatprep.subr.bf16.mxu0 %v6999_v14  ;;  %5237 = vmatprep.subr.bf16.mxu1 %v7001_v38  ;;  %v3298_v37 = vld [vmem:[#allocation7 + $0x2b8] sm:$0xff]  ;;  %v7032_v14 = vcombine.low %v3286_v34, %v3290_v51  ;;  %v7039_v38 = vcombine.high %v3293_v56, %v3297_v5 }
 0x36d   :  { %v7041_v25 = vcombine.high %v3294_v46, %v3298_v37  ;;  %v7040_v33 = vcombine.low %v3294_v46, %v3298_v37  ;;  %v3334_v46 = vld [vmem:[#allocation7 + $0x3d8] sm:$0xff] }
 0x36e   :  { %v3338_v37 = vld [vmem:[#allocation7 + $0x3f8] sm:$0xff] }
 0x36f   :  { %5092 = vmatpush1.bf16.msra.mxu0 %v6998_v11  ;;  %5238 = vmatpush1.bf16.msra.mxu1 %v7000_v57  ;;  %v3306_v11 = vld [vmem:[#allocation7 + $0x2f8] sm:$0xff]  ;;  %v7038_v57 = vcombine.low %v3293_v56, %v3297_v5  ;;  %v3333_v56 = vld [vmem:[#allocation7 + $0x3d0] sm:$0xff] }
 0x370   :  { %5093 = vmatprep.subr.bf16.mxu0 %v7007_v20  ;;  %5239 = vmatprep.subr.bf16.mxu1 %v7009_v48  ;;  %v7047_v20 = vcombine.high %v3301_v18, %v3305_v62  ;;  %v7049_v48 = vcombine.high %v3302_v35, %v3306_v11  ;;  %v3337_v5 = vld [vmem:[#allocation7 + $0x3f0] sm:$0xff] }
 0x371   :  { %4925 = vmatmul.mubr.bf16.gmra.mrb[44].mxu0 %v9335_v10  ;;  %5071 = vmatmul.mubr.bf16.gmra.mrb[76].mxu1 %v9335_v10 }
 0x372   :  { %5113 = vmatprep.mubr.bf16.mxu0 %v9227_v54  ;;  %5259 = vmatprep.mubr.bf16.mxu1 %v9227_v54  ;;  %v7033_v54 = vcombine.high %v3286_v34, %v3290_v51  ;;  %v3326_v34 = vld [vmem:[#allocation7 + $0x398] sm:$0xff] }
 0x373   :  { %5094 = vmatpush1.bf16.msra.mxu0 %v7006_v45  ;;  %5240 = vmatpush1.bf16.msra.mxu1 %v7008_v42  ;;  %v7046_v45 = vcombine.low %v3301_v18, %v3305_v62  ;;  %v7048_v42 = vcombine.low %v3302_v35, %v3306_v11  ;;  %v3330_v51 = vld [vmem:[#allocation7 + $0x3b8] sm:$0xff]  ;;  %v3341_v18 = vld [vmem:[#allocation7 + $0x410] sm:$0xff] }
 0x374   :  { %5095 = vmatprep.subr.bf16.mxu0 %v7015_v58  ;;  %5241 = vmatprep.subr.bf16.mxu1 %v7017_v26  ;;  %v7055_v58 = vcombine.high %v3309_v13, %v3313_v31  ;;  %v7057_v26 = vcombine.high %v3310_v15, %v3314_v17  ;;  %v3345_v62 = vld [vmem:[#allocation7 + $0x430] sm:$0xff]  ;;  %v3342_v35 = vld [vmem:[#allocation7 + $0x418] sm:$0xff] }
 0x375   :  { %v3346_v11 = vld [vmem:[#allocation7 + $0x438] sm:$0xff] }
 0x377   :  { %5096 = vmatpush1.bf16.msra.mxu0 %v7014_v6  ;;  %5242 = vmatpush1.bf16.msra.mxu1 %v7016_v59  ;;  %v7054_v6 = vcombine.low %v3309_v13, %v3313_v31  ;;  %v7056_v59 = vcombine.low %v3310_v15, %v3314_v17  ;;  %v3349_v13 = vld [vmem:[#allocation7 + $0x450] sm:$0xff]  ;;  %v3350_v15 = vld [vmem:[#allocation7 + $0x458] sm:$0xff] }
 0x378   :  { %5097 = vmatprep.subr.bf16.mxu0 %v7023_v12  ;;  %5243 = vmatprep.subr.bf16.mxu1 %v7025_v61  ;;  %v7063_v12 = vcombine.high %v3317_v55, %v3321_v44  ;;  %v7065_v61 = vcombine.high %v3318_v22, %v3322_v32  ;;  %v3353_v31 = vld [vmem:[#allocation7 + $0x470] sm:$0xff]  ;;  %v3354_v17 = vld [vmem:[#allocation7 + $0x478] sm:$0xff] }
 0x37b   :  { %5098 = vmatpush1.bf16.msra.mxu0 %v7022_v16  ;;  %5244 = vmatpush1.bf16.msra.mxu1 %v7024_v21  ;;  %v7062_v16 = vcombine.low %v3317_v55, %v3321_v44  ;;  %v7064_v21 = vcombine.low %v3318_v22, %v3322_v32  ;;  %v3357_v55 = vld [vmem:[#allocation7 + $0x490] sm:$0xff]  ;;  %v3358_v22 = vld [vmem:[#allocation7 + $0x498] sm:$0xff] }
 0x37c   :  { %5099 = vmatprep.subr.bf16.mxu0 %v7031_v3  ;;  %5245 = vmatprep.subr.bf16.mxu1 %v7033_v54  ;;  %v7071_v3 = vcombine.high %v3325_v23, %v3329_v50  ;;  %v7073_v54 = vcombine.high %v3326_v34, %v3330_v51  ;;  %v3361_v44 = vld [vmem:[#allocation7 + $0x4b0] sm:$0xff]  ;;  %v3362_v32 = vld [vmem:[#allocation7 + $0x4b8] sm:$0xff] }
 0x37f   :  { %5100 = vmatpush1.bf16.msra.mxu0 %v7030_v27  ;;  %5246 = vmatpush1.bf16.msra.mxu1 %v7032_v14  ;;  %v7070_v27 = vcombine.low %v3325_v23, %v3329_v50  ;;  %v7072_v14 = vcombine.low %v3326_v34, %v3330_v51  ;;  %v3365_v23 = vld [vmem:[#allocation7 + $0x4d0] sm:$0xff]  ;;  %v3366_v34 = vld [vmem:[#allocation7 + $0x4d8] sm:$0xff] }
 0x380   :  { %5101 = vmatprep.subr.bf16.mxu0 %v7039_v38  ;;  %5247 = vmatprep.subr.bf16.mxu1 %v7041_v25  ;;  %v7079_v38 = vcombine.high %v3333_v56, %v3337_v5  ;;  %v7081_v25 = vcombine.high %v3334_v46, %v3338_v37  ;;  %v3369_v50 = vld [vmem:[#allocation7 + $0x4f0] sm:$0xff]  ;;  %v3370_v51 = vld [vmem:[#allocation7 + $0x4f8] sm:$0xff] }
 0x383   :  { %5102 = vmatpush1.bf16.msra.mxu0 %v7038_v57  ;;  %5248 = vmatpush1.bf16.msra.mxu1 %v7040_v33  ;;  %v7078_v57 = vcombine.low %v3333_v56, %v3337_v5  ;;  %v7080_v33 = vcombine.low %v3334_v46, %v3338_v37  ;;  %v3374_v56 = vld [vmem:[#allocation7 + $0x518] sm:$0xff]  ;;  %v7110_v46 = vcombine.low %v3365_v23, %v3369_v50 }
 0x384   :  { %5103 = vmatprep.subr.bf16.mxu0 %v7047_v20  ;;  %5249 = vmatprep.subr.bf16.mxu1 %v7049_v48  ;;  %v7087_v20 = vcombine.high %v3341_v18, %v3345_v62  ;;  %v7089_v48 = vcombine.high %v3342_v35, %v3346_v11  ;;  %v3378_v5 = vld [vmem:[#allocation7 + $0x538] sm:$0xff]  ;;  %v7112_v37 = vcombine.low %v3366_v34, %v3370_v51 }
 0x387   :  { %5104 = vmatpush1.bf16.msra.mxu0 %v7046_v45  ;;  %5250 = vmatpush1.bf16.msra.mxu1 %v7048_v42  ;;  %v7086_v45 = vcombine.low %v3341_v18, %v3345_v62  ;;  %v7088_v42 = vcombine.low %v3342_v35, %v3346_v11  ;;  %v3382_v18 = vld [vmem:[#allocation7 + $0x558] sm:$0xff]  ;;  %v7120_v35 = vcombine.low %v3374_v56, %v3378_v5 }
 0x388   :  { %5105 = vmatprep.subr.bf16.mxu0 %v7055_v58  ;;  %5251 = vmatprep.subr.bf16.mxu1 %v7057_v26  ;;  %v7095_v58 = vcombine.high %v3349_v13, %v3353_v31  ;;  %v7097_v26 = vcombine.high %v3350_v15, %v3354_v17  ;;  %v3386_v62 = vld [vmem:[#allocation7 + $0x578] sm:$0xff] }
 0x38b   :  { %5106 = vmatpush1.bf16.msra.mxu0 %v7054_v6  ;;  %5252 = vmatpush1.bf16.msra.mxu1 %v7056_v59  ;;  %v7094_v6 = vcombine.low %v3349_v13, %v3353_v31  ;;  %v7096_v59 = vcombine.low %v3350_v15, %v3354_v17  ;;  %v7128_v31 = vcombine.low %v3382_v18, %v3386_v62 }
 0x38c   :  { %5107 = vmatprep.subr.bf16.mxu0 %v7063_v12  ;;  %5253 = vmatprep.subr.bf16.mxu1 %v7065_v61  ;;  %v7103_v12 = vcombine.high %v3357_v55, %v3361_v44  ;;  %v7105_v61 = vcombine.high %v3358_v22, %v3362_v32 }
 0x38f   :  { %5108 = vmatpush1.bf16.msra.mxu0 %v7062_v16  ;;  %5254 = vmatpush1.bf16.msra.mxu1 %v7064_v21  ;;  %v7104_v16 = vcombine.low %v3358_v22, %v3362_v32  ;;  %v7111_v21 = vcombine.high %v3365_v23, %v3369_v50  ;;  %v3405_v32 = vld [vmem:[#allocation7 + $0x610] sm:$0xff] }
 0x390   :  { %5109 = vmatprep.subr.bf16.mxu0 %v7071_v3  ;;  %5255 = vmatprep.subr.bf16.mxu1 %v7073_v54  ;;  %v7113_v3 = vcombine.high %v3366_v34, %v3370_v51  ;;  %v3373_v54 = vld [vmem:[#allocation7 + $0x510] sm:$0xff] }
 0x391   :  { %v3413_v34 = vld [vmem:[#allocation7 + $0x650] sm:$0xff] }
 0x392   :  { %v3417_v51 = vld [vmem:[#allocation7 + $0x670] sm:$0xff] }
 0x393   :  { %5110 = vmatpush1.bf16.msra.mxu0 %v7070_v27  ;;  %5256 = vmatpush1.bf16.msra.mxu1 %v7072_v14  ;;  %v7121_v14 = vcombine.high %v3374_v56, %v3378_v5  ;;  %v3425_v56 = vld [vmem:[#allocation7 + $0x6b0] sm:$0xff]  ;;  %v3426_v5 = vld [vmem:[#allocation7 + $0x6b8] sm:$0xff] }
 0x394   :  { %5111 = vmatprep.subr.bf16.mxu0 %v7079_v38  ;;  %5257 = vmatprep.subr.bf16.mxu1 %v7081_v25  ;;  %v3381_v38 = vld [vmem:[#allocation7 + $0x550] sm:$0xff] }
 0x395   :  { %v3385_v25 = vld [vmem:[#allocation7 + $0x570] sm:$0xff] }
 0x396   :  { %v7127_v11 = vcombine.high %v3381_v38, %v3385_v25  ;;  %v7126_v13 = vcombine.low %v3381_v38, %v3385_v25  ;;  %v3429_v38 = vld [vmem:[#allocation7 + $0x6d0] sm:$0xff] }
 0x397   :  { %5112 = vmatpush1.bf16.msra.mxu0 %v7078_v57  ;;  %5258 = vmatpush1.bf16.msra.mxu1 %v7080_v33  ;;  %v7129_v57 = vcombine.high %v3382_v18, %v3386_v62  ;;  %v3389_v33 = vld [vmem:[#allocation7 + $0x590] sm:$0xff]  ;;  %v3430_v18 = vld [vmem:[#allocation7 + $0x6d8] sm:$0xff] }
 0x398   :  { %5154 = vmatprep.subr.bf16.mxu0 %v7087_v20  ;;  %5300 = vmatprep.subr.bf16.mxu1 %v7089_v48  ;;  %v3390_v20 = vld [vmem:[#allocation7 + $0x598] sm:$0xff]  ;;  %v3433_v25 = vld [vmem:[#allocation7 + $0x6f0] sm:$0xff] }
 0x399   :  { %v3394_v48 = vld [vmem:[#allocation7 + $0x5b8] sm:$0xff] }
 0x39a   :  { %5114 = vmatmul.mubr.bf16.vlgmr.msra.gmra.mrb[48].mxu0 %v9224_v52  ;;  %5260 = vmatmul.mubr.bf16.vlgmr.msra.gmra.mrb[80].mxu1 %v9224_v52  ;;  %v7102_v52 = vcombine.low %v3357_v55, %v3361_v44  ;;  %v7137_v17 = vcombine.high %v3390_v20, %v3394_v48  ;;  %v7136_v55 = vcombine.low %v3390_v20, %v3394_v48  ;;  %v3434_v62 = vld [vmem:[#allocation7 + $0x6f8] sm:$0xff] }
 0x39b   :  { %5123 = vmatprep.mubr.bf16.mxu0 %v9235_v29  ;;  %5155 = vmatpush1.bf16.msra.mxu0 %v7086_v45  ;;  %v3397_v45 = vld [vmem:[#allocation7 + $0x5d0] sm:$0xff]  ;;  %v3438_v20 = vld [vmem:[#allocation7 + $0x718] sm:$0xff] }
 0x39c   :  { %5269 = vmatprep.mubr.bf16.mxu1 %v9235_v29  ;;  %5301 = vmatpush1.bf16.msra.mxu1 %v7088_v42  ;;  %v3377_v29 = vld [vmem:[#allocation7 + $0x530] sm:$0xff]  ;;  %v3442_v48 = vld [vmem:[#allocation7 + $0x738] sm:$0xff] }
 0x39d   :  { %5156 = vmatprep.subr.bf16.mxu0 %v7095_v58  ;;  %5302 = vmatprep.subr.bf16.mxu1 %v7097_v26  ;;  %v7119_v27 = vcombine.high %v3373_v54, %v3377_v29  ;;  %v3401_v42 = vld [vmem:[#allocation7 + $0x5f0] sm:$0xff]  ;;  %v3398_v58 = vld [vmem:[#allocation7 + $0x5d8] sm:$0xff] }
 0x39e   :  { %v3402_v26 = vld [vmem:[#allocation7 + $0x5f8] sm:$0xff]  ;;  %v7143_v44 = vcombine.high %v3397_v45, %v3401_v42 }
 0x39f   :  { %5157 = vmatpush1.bf16.msra.mxu0 %v7094_v6  ;;  %v7145_v22 = vcombine.high %v3398_v58, %v3402_v26  ;;  %v3406_v6 = vld [vmem:[#allocation7 + $0x618] sm:$0xff] }
 0x3a0   :  { %5303 = vmatpush1.bf16.msra.mxu1 %v7096_v59  ;;  %5158 = vmatprep.subr.bf16.mxu0 %v7103_v12  ;;  %v3410_v59 = vld [vmem:[#allocation7 + $0x638] sm:$0xff]  ;;  %v7142_v12 = vcombine.low %v3397_v45, %v3401_v42  ;;  %v3445_v45 = vld [vmem:[#allocation7 + $0x750] sm:$0xff] }
 0x3a1   :  { %5304 = vmatprep.subr.bf16.mxu1 %v7105_v61  ;;  %v7144_v61 = vcombine.low %v3398_v58, %v3402_v26  ;;  %v7153_v50 = vcombine.high %v3406_v6, %v3410_v59  ;;  %v3449_v42 = vld [vmem:[#allocation7 + $0x770] sm:$0xff]  ;;  %v3446_v58 = vld [vmem:[#allocation7 + $0x758] sm:$0xff] }
 0x3a2   :  { %5124 = vmatmul.mubr.bf16.gmra.mrb[52].mxu0 %v9247_v30  ;;  %5270 = vmatmul.mubr.bf16.gmra.mrb[84].mxu1 %v9247_v30  ;;  %v7118_v30 = vcombine.low %v3373_v54, %v3377_v29  ;;  %v3421_v29 = vld [vmem:[#allocation7 + $0x690] sm:$0xff]  ;;  %v3450_v26 = vld [vmem:[#allocation7 + $0x778] sm:$0xff] }
 0x3a3   :  { %5133 = vmatprep.mubr.bf16.mxu0 %v9252_v1  ;;  %5159 = vmatpush1.bf16.msra.mxu0 %v7102_v52  ;;  %v3414_v52 = vld [vmem:[#allocation7 + $0x658] sm:$0xff] }
 0x3a4   :  { %5279 = vmatprep.mubr.bf16.mxu1 %v9252_v1  ;;  %5305 = vmatpush1.bf16.msra.mxu1 %v7104_v16  ;;  %v3393_v1 = vld [vmem:[#allocation7 + $0x5b0] sm:$0xff]  ;;  %v3418_v16 = vld [vmem:[#allocation7 + $0x678] sm:$0xff] }
 0x3a5   :  { %5160 = vmatprep.subr.bf16.mxu0 %v7111_v21  ;;  %5306 = vmatprep.subr.bf16.mxu1 %v7113_v3  ;;  %v7135_v15 = vcombine.high %v3389_v33, %v3393_v1  ;;  %v7152_v21 = vcombine.low %v3406_v6, %v3410_v59  ;;  %v7159_v3 = vcombine.high %v3413_v34, %v3417_v51  ;;  %v3454_v6 = vld [vmem:[#allocation7 + $0x798] sm:$0xff] }
 0x3a6   :  { %v7161_v54 = vcombine.high %v3414_v52, %v3418_v16  ;;  %v3458_v59 = vld [vmem:[#allocation7 + $0x7b8] sm:$0xff] }
 0x3a7   :  { %5161 = vmatpush1.bf16.msra.mxu0 %v7110_v46  ;;  %v7158_v46 = vcombine.low %v3413_v34, %v3417_v51  ;;  %v3461_v34 = vld [vmem:[#allocation7 + $0x7d0] sm:$0xff] }
 0x3a8   :  { %5307 = vmatpush1.bf16.msra.mxu1 %v7112_v37  ;;  %5162 = vmatprep.subr.bf16.mxu0 %v7119_v27  ;;  %v7160_v37 = vcombine.low %v3414_v52, %v3418_v16  ;;  %v7167_v27 = vcombine.high %v3421_v29, %v3425_v56  ;;  %v3465_v51 = vld [vmem:[#allocation7 + $0x7f0] sm:$0xff]  ;;  %v3462_v52 = vld [vmem:[#allocation7 + $0x7d8] sm:$0xff] }
 0x3a9   :  { %5308 = vmatprep.subr.bf16.mxu1 %v7121_v14  ;;  %v3466_v16 = vld [vmem:[#allocation7 + $0x7f8] sm:$0xff] }
 0x3aa   :  { %5134 = vmatmul.mubr.bf16.gmra.mrb[56].mxu0 %v9257_v4  ;;  %5280 = vmatmul.mubr.bf16.gmra.mrb[88].mxu1 %v9257_v4  ;;  %v7134_v4 = vcombine.low %v3389_v33, %v3393_v1  ;;  %v3437_v33 = vld [vmem:[#allocation7 + $0x710] sm:$0xff] }
 0x3ab   :  { %5143 = vmatprep.mubr.bf16.mxu0 %v9266_v53  ;;  %5163 = vmatpush1.bf16.msra.mxu0 %v7118_v30  ;;  %v7166_v30 = vcombine.low %v3421_v29, %v3425_v56  ;;  %v3441_v1 = vld [vmem:[#allocation7 + $0x730] sm:$0xff]  ;;  %v7206_v29 = vcombine.low %v3461_v34, %v3465_v51  ;;  %v7208_v56 = vcombine.low %v3462_v52, %v3466_v16 }
 0x3ac   :  { %5289 = vmatprep.mubr.bf16.mxu1 %v9266_v53  ;;  %5309 = vmatpush1.bf16.msra.mxu1 %v7120_v35  ;;  %v3409_v53 = vld [vmem:[#allocation7 + $0x630] sm:$0xff] }
 0x3ad   :  { %5164 = vmatprep.subr.bf16.mxu0 %v7127_v11  ;;  %5310 = vmatprep.subr.bf16.mxu1 %v7129_v57  ;;  %v7151_v23 = vcombine.high %v3405_v32, %v3409_v53  ;;  %v7175_v11 = vcombine.high %v3429_v38, %v3433_v25  ;;  %v7177_v57 = vcombine.high %v3430_v18, %v3434_v62 }
 0x3af   :  { %5165 = vmatpush1.bf16.msra.mxu0 %v7126_v13  ;;  %v7174_v13 = vcombine.low %v3429_v38, %v3433_v25  ;;  %v8078_v38 = vld [vmem:[#allocation8 + $0x34] ss:$8 sps:$4 sm:$0xff]   ;;  %v8079_v25 = vld [vmem:[#allocation8 + $0x40] ss:$8 sps:$4 sm:$0xff]  }
 0x3b0   :  { %5311 = vmatpush1.bf16.msra.mxu1 %v7128_v31  ;;  %5166 = vmatprep.subr.bf16.mxu0 %v7135_v15  ;;  %v7176_v31 = vcombine.low %v3430_v18, %v3434_v62  ;;  %v7183_v15 = vcombine.high %v3437_v33, %v3441_v1  ;;  %v8084_v18 = vld [vmem:[#allocation8 + $0x54] ss:$8 sps:$4 sm:$0xff]   ;;  %v8085_v62 = vld [vmem:[#allocation8 + $0x60] ss:$8 sps:$4 sm:$0xff]  }
 0x3b1   :  { %5312 = vmatprep.subr.bf16.mxu1 %v7137_v17  ;;  %v7185_v17 = vcombine.high %v3438_v20, %v3442_v48 }
 0x3b2   :  { %5144 = vmatmul.mubr.bf16.gmra.mrb[60].mxu0 %v9269_v24  ;;  %5290 = vmatmul.mubr.bf16.gmra.mrb[92].mxu1 %v9269_v24  ;;  %v7150_v24 = vcombine.low %v3405_v32, %v3409_v53  ;;  %v3453_v32 = vld [vmem:[#allocation7 + $0x790] sm:$0xff] }
 0x3b3   :  { %5167 = vmatpush1.bf16.msra.mxu0 %v7134_v4  ;;  %5186 = vmatprep.mubr.bf16.mxu0 %v9277_v28  ;;  %v7182_v4 = vcombine.low %v3437_v33, %v3441_v1  ;;  %v3457_v53 = vld [vmem:[#allocation7 + $0x7b0] sm:$0xff]  ;;  %v8099_v33 = vld [vmem:[#allocation8 + $0xa4] ss:$8 sps:$4 sm:$0xff]   ;;  %v8097_v1 = vld [vmem:[#allocation8 + $0xa0] ss:$8 sps:$4 sm:$0xff]  }
 0x3b4   :  { %5313 = vmatpush1.bf16.msra.mxu1 %v7136_v55  ;;  %5332 = vmatprep.mubr.bf16.mxu1 %v9277_v28  ;;  %v3422_v28 = vld [vmem:[#allocation7 + $0x698] sm:$0xff]  ;;  %v7184_v55 = vcombine.low %v3438_v20, %v3442_v48 }
 0x3b5   :  { %5168 = vmatprep.subr.bf16.mxu0 %v7143_v44  ;;  %5314 = vmatprep.subr.bf16.mxu1 %v7145_v22  ;;  %v7169_v14 = vcombine.high %v3422_v28, %v3426_v5  ;;  %v7168_v35 = vcombine.low %v3422_v28, %v3426_v5  ;;  %v7191_v44 = vcombine.high %v3445_v45, %v3449_v42  ;;  %v8069_v28 = vld [vmem:[#allocation8 + $0x4] ss:$8 sps:$4 sm:$0xff]   ;;  %v8067_v5 = vld [vmem:[#allocation8] ss:$8 sps:$4 sm:$0xff]   ;;  %v8102_v20 = vld [vmem:[#allocation8 + $0xb4] ss:$8 sps:$4 sm:$0xff]  }
 0x3b6   :  { %v7193_v22 = vcombine.high %v3446_v58, %v3450_v26  ;;  %v8100_v48 = vld [vmem:[#allocation8 + $0xb0] ss:$8 sps:$4 sm:$0xff]  }
 0x3b7   :  { %5169 = vmatpush1.bf16.msra.mxu0 %v7142_v12  ;;  %v7190_v12 = vcombine.low %v3445_v45, %v3449_v42 }
 0x3b8   :  { %5315 = vmatpush1.bf16.msra.mxu1 %v7144_v61  ;;  %5170 = vmatprep.subr.bf16.mxu0 %v7151_v23  ;;  %v7192_v61 = vcombine.low %v3446_v58, %v3450_v26  ;;  %v7199_v23 = vcombine.high %v3453_v32, %v3457_v53 }
 0x3b9   :  { %5316 = vmatprep.subr.bf16.mxu1 %v7153_v50  ;;  %v7201_v50 = vcombine.high %v3454_v6, %v3458_v59 }
 0x3bb   :  { %5171 = vmatpush1.bf16.msra.mxu0 %v7150_v24  ;;  %v7198_v24 = vcombine.low %v3453_v32, %v3457_v53 }
 0x3bc   :  { %5317 = vmatpush1.bf16.msra.mxu1 %v7152_v21  ;;  %5172 = vmatprep.subr.bf16.mxu0 %v7159_v3  ;;  %v7200_v21 = vcombine.low %v3454_v6, %v3458_v59  ;;  %v7207_v3 = vcombine.high %v3461_v34, %v3465_v51 }
 0x3bd   :  { %5318 = vmatprep.subr.bf16.mxu1 %v7161_v54  ;;  %v7209_v54 = vcombine.high %v3462_v52, %v3466_v16 }
 0x3bf   :  { %5173 = vmatpush1.bf16.msra.mxu0 %v7158_v46  ;;  %v8072_v46 = vld [vmem:[#allocation8 + $0x14] ss:$8 sps:$4 sm:$0xff]  }
 0x3c0   :  { %5319 = vmatpush1.bf16.msra.mxu1 %v7160_v37  ;;  %5174 = vmatprep.subr.bf16.mxu0 %v7167_v27  ;;  %v8070_v37 = vld [vmem:[#allocation8 + $0x10] ss:$8 sps:$4 sm:$0xff]   ;;  %v8075_v27 = vld [vmem:[#allocation8 + $0x24] ss:$8 sps:$4 sm:$0xff]  }
 0x3c1   :  { %5320 = vmatprep.subr.bf16.mxu1 %v7169_v14  ;;  %v8073_v14 = vld [vmem:[#allocation8 + $0x20] ss:$8 sps:$4 sm:$0xff]  }
 0x3c3   :  { %5175 = vmatpush1.bf16.msra.mxu0 %v7166_v30  ;;  %v8090_v30 = vld [vmem:[#allocation8 + $0x74] ss:$8 sps:$4 sm:$0xff]  }
 0x3c4   :  { %5321 = vmatpush1.bf16.msra.mxu1 %v7168_v35  ;;  %5176 = vmatprep.subr.bf16.mxu0 %v7175_v11  ;;  %v8088_v35 = vld [vmem:[#allocation8 + $0x70] ss:$8 sps:$4 sm:$0xff]   ;;  %v8091_v11 = vld [vmem:[#allocation8 + $0x80] ss:$8 sps:$4 sm:$0xff]  }
 0x3c5   :  { %5322 = vmatprep.subr.bf16.mxu1 %v7177_v57  ;;  %v8094_v57 = vld [vmem:[#allocation8 + $0x90] ss:$8 sps:$4 sm:$0xff]  }
 0x3c7   :  { %5177 = vmatpush1.bf16.msra.mxu0 %v7174_v13  ;;  %v8103_v13 = vld [vmem:[#allocation8 + $0xc0] ss:$8 sps:$4 sm:$0xff]  }
 0x3c8   :  { %5323 = vmatpush1.bf16.msra.mxu1 %v7176_v31  ;;  %5178 = vmatprep.subr.bf16.mxu0 %v7183_v15  ;;  %v8108_v31 = vld [vmem:[#allocation8 + $0xd4] ss:$8 sps:$4 sm:$0xff]   ;;  %v8106_v15 = vld [vmem:[#allocation8 + $0xd0] ss:$8 sps:$4 sm:$0xff]  }
 0x3c9   :  { %5324 = vmatprep.subr.bf16.mxu1 %v7185_v17  ;;  %v9374_v17 = vld [vmem:[%s9742_s6] sm:$0xff] }
 0x3ca   :  { %v9378_v45 = vrot.slane %v9374_v17, %v8738_v41  ;;  %v9382_v42 = vrot.slane %v9374_v17, %v8829_v8 }
 0x3cb   :  { %5179 = vmatpush1.bf16.msra.mxu0 %v7182_v4  ;;  %v9386_v4 = vrot.slane %v9374_v17, %v8746_v43 }
 0x3cc   :  { %5325 = vmatpush1.bf16.msra.mxu1 %v7184_v55  ;;  %5180 = vmatprep.subr.bf16.mxu0 %v7191_v44  ;;  %v9390_v55 = vrot.slane %v9374_v17, %v8832_v0 }
 0x3cd   :  { %5326 = vmatprep.subr.bf16.mxu1 %v7193_v22 }
 0x3cf   :  { %5181 = vmatpush1.bf16.msra.mxu0 %v7190_v12 }
 0x3d0   :  { %5327 = vmatpush1.bf16.msra.mxu1 %v7192_v61  ;;  %5182 = vmatprep.subr.bf16.mxu0 %v7199_v23 }
 0x3d1   :  { %5328 = vmatprep.subr.bf16.mxu1 %v7201_v50 }
 0x3d3   :  { %5183 = vmatpush1.bf16.msra.mxu0 %v7198_v24 }
 0x3d4   :  { %5329 = vmatpush1.bf16.msra.mxu1 %v7200_v21  ;;  %5184 = vmatprep.subr.bf16.mxu0 %v7207_v3  ;;  %v8111_v3 = vld [vmem:[#allocation8 + $0xe4] ss:$8 sps:$4 sm:$0xff]  }
 0x3d5   :  { %5330 = vmatprep.subr.bf16.mxu1 %v7209_v54  ;;  %v8109_v54 = vld [vmem:[#allocation8 + $0xe0] ss:$8 sps:$4 sm:$0xff]  }
 0x3d7   :  { %5185 = vmatpush1.bf16.msra.mxu0 %v7206_v29 }
 0x3d8   :  { %5331 = vmatpush1.bf16.msra.mxu1 %v7208_v56  ;;  %5961 = vmatprep.subr.bf16.mxu0 %v8069_v28 }
 0x3da   :  { %5187 = vmatmul.mubr.bf16.vlgmr.msra.gmra.mrb[48].mxu0 %v9305_v2 }
 0x3db   :  { %5333 = vmatmul.mubr.bf16.vlgmr.msra.gmra.mrb[80].mxu1 %v9305_v2  ;;  %5196 = vmatprep.mubr.bf16.mxu0 %v9308_v7  ;;  %v8076_v2 = vld [vmem:[#allocation8 + $0x30] ss:$8 sps:$4 sm:$0xff]  }
 0x3dc   :  { %5342 = vmatprep.mubr.bf16.mxu1 %v9308_v7  ;;  %5962 = vmatpush1.bf16.msra.mxu0 %v8067_v5  ;;  %v8081_v7 = vld [vmem:[#allocation8 + $0x44] ss:$8 sps:$4 sm:$0xff]  }
 0x3dd   :  { %5963 = vmatprep.subr.bf16.mxu0 %v8072_v46  ;;  %v8112_v46 = vld [vmem:[#allocation8 + $0xf0] ss:$8 sps:$4 sm:$0xff]  }
 0x3e0   :  { %5964 = vmatpush1.bf16.msra.mxu0 %v8070_v37  ;;  %v8114_v37 = vld [vmem:[#allocation8 + $0xf4] ss:$8 sps:$4 sm:$0xff]  }
 0x3e1   :  { %5965 = vmatprep.subr.bf16.mxu0 %v8075_v27 }
 0x3e2   :  { %5197 = vmatmul.mubr.bf16.gmra.mrb[52].mxu0 %v9315_v39 }
 0x3e3   :  { %5343 = vmatmul.mubr.bf16.gmra.mrb[84].mxu1 %v9315_v39  ;;  %5206 = vmatprep.mubr.bf16.mxu0 %v9318_v19  ;;  %v8082_v39 = vld [vmem:[#allocation8 + $0x50] ss:$8 sps:$4 sm:$0xff]  }
 0x3e4   :  { %5352 = vmatprep.mubr.bf16.mxu1 %v9318_v19  ;;  %5966 = vmatpush1.bf16.msra.mxu0 %v8073_v14  ;;  %v8087_v19 = vld [vmem:[#allocation8 + $0x64] ss:$8 sps:$4 sm:$0xff]  }
 0x3e5   :  { %5967 = vmatprep.subr.bf16.mxu0 %v8078_v38 }
 0x3e8   :  { %5968 = vmatpush1.bf16.msra.mxu0 %v8076_v2 }
 0x3e9   :  { %5969 = vmatprep.subr.bf16.mxu0 %v8081_v7 }
 0x3ea   :  { %5207 = vmatmul.mubr.bf16.gmra.mrb[56].mxu0 %v9325_v9 }
 0x3eb   :  { %5353 = vmatmul.mubr.bf16.gmra.mrb[88].mxu1 %v9325_v9  ;;  %5216 = vmatprep.mubr.bf16.mxu0 %v9328_v63  ;;  %v8093_v9 = vld [vmem:[#allocation8 + $0x84] ss:$8 sps:$4 sm:$0xff]  }
 0x3ec   :  { %5362 = vmatprep.mubr.bf16.mxu1 %v9328_v63  ;;  %5970 = vmatpush1.bf16.msra.mxu0 %v8079_v25  ;;  %v8096_v63 = vld [vmem:[#allocation8 + $0x94] ss:$8 sps:$4 sm:$0xff]  }
 0x3ed   :  { %5971 = vmatprep.subr.bf16.mxu0 %v8084_v18 }
 0x3f0   :  { %5972 = vmatpush1.bf16.msra.mxu0 %v8082_v39 }
 0x3f1   :  { %5973 = vmatprep.subr.bf16.mxu0 %v8087_v19 }
 0x3f2   :  { %5217 = vmatmul.mubr.bf16.gmra.mrb[60].mxu0 %v9335_v10 }
 0x3f3   :  { %5363 = vmatmul.mubr.bf16.gmra.mrb[92].mxu1 %v9335_v10  ;;  %v8105_v10 = vld [vmem:[#allocation8 + $0xc4] ss:$8 sps:$4 sm:$0xff]  }
 0x3f4   :  { %5974 = vmatpush1.bf16.msra.mxu0 %v8085_v62 }
 0x3f5   :  { %5975 = vmatprep.subr.bf16.mxu0 %v8090_v30 }
 0x3f8   :  { %5976 = vmatpush1.bf16.msra.mxu0 %v8088_v35 }
 0x3f9   :  { %5977 = vmatprep.subr.bf16.mxu0 %v8093_v9 }
 0x3fc   :  { %5978 = vmatpush1.bf16.msra.mxu0 %v8091_v11 }
 0x3fd   :  { %5979 = vmatprep.subr.bf16.mxu0 %v8096_v63 }
 0x400   :  { %5980 = vmatpush1.bf16.msra.mxu0 %v8094_v57 }
 0x401   :  { %5981 = vmatprep.subr.bf16.mxu0 %v8099_v33 }
 0x404   :  { %5982 = vmatpush1.bf16.msra.mxu0 %v8097_v1 }
 0x405   :  { %5983 = vmatprep.subr.bf16.mxu0 %v8102_v20 }
 0x408   :  { %5984 = vmatpush1.bf16.msra.mxu0 %v8100_v48 }
 0x409   :  { %5985 = vmatprep.subr.bf16.mxu0 %v8105_v10  ;;  %v8117_v10 = vld [vmem:[#allocation8 + $0x104] ss:$8 sps:$4 sm:$0xff]  }
 0x40c   :  { %5986 = vmatpush1.bf16.msra.mxu0 %v8103_v13 }
 0x40d   :  { %5987 = vmatprep.subr.bf16.mxu0 %v8108_v31 }
 0x410   :  { %5988 = vmatpush1.bf16.msra.mxu0 %v8106_v15 }
 0x411   :  { %5989 = vmatprep.subr.bf16.mxu0 %v8111_v3 }
 0x414   :  { %5990 = vmatpush1.bf16.msra.mxu0 %v8109_v54 }
 0x415   :  { %5991 = vmatprep.subr.bf16.mxu0 %v8114_v37 }
 0x418   :  { %5992 = vmatpush1.bf16.msra.mxu0 %v8112_v46 }
 0x419   :  { %6034 = vmatprep.subr.bf16.mxu0 %v8117_v10 }
 0x42c   :  { %v4896_v58 = vpop.f32.mrb[32].mxu0  ;;  %v5042_v26 = vpop.f32.mrb[64].mxu1 }
 0x42d   :  { %v4898_v44 = vpop.f32.mrb[33].mxu0  ;;  %v5044_v22 = vpop.f32.mrb[65].mxu1  ;;  %v7408_v6 = vadd.f32 %v4896_v58, %v9378_v45  ;;  %v7424_v59 = vadd.f32 %v5042_v26, %v9382_v42 }
 0x42e   :  { %v4900_v32 = vpop.f32.mrb[34].mxu0  ;;  %v5046_v53 = vpop.f32.mrb[66].mxu1  ;;  %v7409_v50 = vadd.f32 %v4898_v44, %v9386_v4  ;;  %v7425_v34 = vadd.f32 %v5044_v22, %v9390_v55 }
 0x42f   :  { %v7410_v8 = vadd.f32 %v4900_v32, %v9378_v45  ;;  %v7426_v12 = vadd.f32 %v5046_v53, %v9382_v42  ;;  %v4902_v61 = vpop.f32.mrb[35].mxu0  ;;  %v5048_v23 = vpop.f32.mrb[67].mxu1 }
 0x430   :  { %v7411_v0 = vadd.f32 %v4902_v61, %v9386_v4  ;;  %v7427_v51 = vadd.f32 %v5048_v23, %v9390_v55 }
 0x431   :  { %v9400_v52 = vpack.c.bf16 %v7410_v8, %v7408_v6  ;;  %v9402_v16 = vpack.c.bf16 %v7426_v12, %v7424_v59 }
 0x432   :  { %v9404_v24 = vpack.c.bf16 %v7411_v0, %v7409_v50  ;;  %v9406_v21 = vpack.c.bf16 %v7427_v51, %v7425_v34 }
 0x434   :  { %v4906_v29 = vpop.f32.mrb[36].mxu0  ;;  %v5052_v56 = vpop.f32.mrb[68].mxu1 }
 0x435   :  { %v4908_v28 = vpop.f32.mrb[37].mxu0  ;;  %v5054_v5 = vpop.f32.mrb[69].mxu1  ;;  %v7412_v38 = vadd.f32 %v4906_v29, %v9378_v45  ;;  %v7428_v2 = vadd.f32 %v5052_v56, %v9382_v42 }
 0x436   :  { %v4910_v27 = vpop.f32.mrb[38].mxu0  ;;  %v5056_v14 = vpop.f32.mrb[70].mxu1  ;;  %v7413_v19 = vadd.f32 %v4908_v28, %v9386_v4  ;;  %v7429_v62 = vadd.f32 %v5054_v5, %v9390_v55 }
 0x437   :  { %v7414_v7 = vadd.f32 %v4910_v27, %v9378_v45  ;;  %v7430_v25 = vadd.f32 %v5056_v14, %v9382_v42  ;;  %v4912_v18 = vpop.f32.mrb[39].mxu0  ;;  %v5058_v39 = vpop.f32.mrb[71].mxu1 }
 0x438   :  { %v7415_v30 = vadd.f32 %v4912_v18, %v9386_v4  ;;  %v7431_v35 = vadd.f32 %v5058_v39, %v9390_v55 }
 0x439   :  { %v9416_v9 = vpack.c.bf16 %v7414_v7, %v7412_v38  ;;  %v9418_v11 = vpack.c.bf16 %v7430_v25, %v7428_v2 }
 0x43a   :  { %v9420_v63 = vpack.c.bf16 %v7415_v30, %v7413_v19  ;;  %v9422_v57 = vpack.c.bf16 %v7431_v35, %v7429_v62  ;;  %v5408_v35 = vmul.bf16 %v9406_v21, %v9406_v21 }
 0x43c   :  { %v4916_v33 = vpop.f32.mrb[40].mxu0  ;;  %v5062_v1 = vpop.f32.mrb[72].mxu1  ;;  %v5410_v30 = vmul.bf16 %v9420_v63, %v9420_v63 }
 0x43d   :  { %v4918_v20 = vpop.f32.mrb[41].mxu0  ;;  %v5064_v48 = vpop.f32.mrb[73].mxu1  ;;  %v7416_v26 = vadd.f32 %v4916_v33, %v9378_v45  ;;  %v7432_v44 = vadd.f32 %v5062_v1, %v9382_v42 }
 0x43e   :  { %v4920_v13 = vpop.f32.mrb[42].mxu0  ;;  %v5066_v31 = vpop.f32.mrb[74].mxu1  ;;  %v7417_v53 = vadd.f32 %v4918_v20, %v9386_v4  ;;  %v7433_v6 = vadd.f32 %v5064_v48, %v9390_v55  ;;  %v5409_v48 = vmul.bf16 %v9416_v9, %v9416_v9  ;;  %v5426_v10 = vmul.bf16 %v5410_v30, %v9420_v63 }
 0x43f   :  { %v4922_v15 = vpop.f32.mrb[43].mxu0  ;;  %v5068_v58 = vpop.f32.mrb[75].mxu1  ;;  %v7418_v22 = vadd.f32 %v4920_v13, %v9378_v45  ;;  %v7434_v32 = vadd.f32 %v5066_v31, %v9382_v42  ;;  %v5424_v13 = vmul.bf16 %v5408_v35, %v9406_v21 }
 0x440   :  { %v7419_v59 = vadd.f32 %v4922_v15, %v9386_v4  ;;  %v7435_v8 = vadd.f32 %v5068_v58, %v9390_v55  ;;  %v5411_v58 = vmul.bf16 %v9418_v11, %v9418_v11 }
 0x441   :  { %v9432_v12 = vpack.c.bf16 %v7418_v22, %v7416_v26  ;;  %v9434_v61 = vpack.c.bf16 %v7434_v32, %v7432_v44  ;;  %v5425_v44 = vmul.bf16 %v5409_v48, %v9416_v9  ;;  %v5442_v32 = vmul.bf16 1027030327, %v5426_v10 }
 0x442   :  { %v9436_v23 = vpack.c.bf16 %v7419_v59, %v7417_v53  ;;  %v9438_v50 = vpack.c.bf16 %v7435_v8, %v7433_v6  ;;  %v5440_v53 = vmul.bf16 1027030327, %v5424_v13  ;;  %v5412_v6 = vmul.bf16 %v9422_v57, %v9422_v57 }
 0x444   :  { %v4926_v34 = vpop.f32.mrb[44].mxu0  ;;  %v5072_v0 = vpop.f32.mrb[76].mxu1  ;;  %v5414_v22 = vmul.bf16 %v9436_v23, %v9436_v23 }
 0x445   :  { %v4928_v51 = vpop.f32.mrb[45].mxu0  ;;  %v5074_v3 = vpop.f32.mrb[77].mxu1  ;;  %v7420_v56 = vadd.f32 %v4926_v34, %v9378_v45  ;;  %v7436_v28 = vadd.f32 %v5072_v0, %v9382_v42  ;;  %v5427_v34 = vmul.bf16 %v5411_v58, %v9418_v11 }
 0x446   :  { %v4930_v54 = vpop.f32.mrb[46].mxu0  ;;  %v5076_v29 = vpop.f32.mrb[78].mxu1  ;;  %v7421_v14 = vadd.f32 %v4928_v51, %v9386_v4  ;;  %v7437_v38 = vadd.f32 %v5074_v3, %v9390_v55  ;;  %v5441_v51 = vmul.bf16 1027030327, %v5425_v44  ;;  %v5430_v3 = vmul.bf16 %v5414_v22, %v9436_v23 }
 0x447   :  { %v7422_v5 = vadd.f32 %v4930_v54, %v9378_v45  ;;  %v7438_v46 = vadd.f32 %v5076_v29, %v9382_v42  ;;  %v4932_v37 = vpop.f32.mrb[47].mxu0  ;;  %v5078_v27 = vpop.f32.mrb[79].mxu1  ;;  %v5405_v45 = vmul.bf16 %v9400_v52, %v9400_v52  ;;  %v5407_v42 = vmul.bf16 %v9402_v16, %v9402_v16 }
 0x448   :  { %v7423_v2 = vadd.f32 %v4932_v37, %v9386_v4  ;;  %v7439_v7 = vadd.f32 %v5078_v27, %v9390_v55  ;;  %v5406_v4 = vmul.bf16 %v9404_v24, %v9404_v24  ;;  %v5458_v54 = vadd.bf16 %v5442_v32, %v9420_v63 }
 0x449   :  { %v9448_v25 = vpack.c.bf16 %v7422_v5, %v7420_v56  ;;  %v9450_v18 = vpack.c.bf16 %v7438_v46, %v7436_v28  ;;  %v5421_v62 = vmul.bf16 %v5405_v45, %v9400_v52  ;;  %v5423_v55 = vmul.bf16 %v5407_v42, %v9402_v16 }
 0x44a   :  { %v9452_v39 = vpack.c.bf16 %v7423_v2, %v7421_v14  ;;  %v9454_v19 = vpack.c.bf16 %v7439_v7, %v7437_v38  ;;  %v5422_v1 = vmul.bf16 %v5406_v4, %v9404_v24  ;;  %v5413_v29 = vmul.bf16 %v9432_v12, %v9432_v12 }
 0x44b   :  { %v5437_v33 = vmul.bf16 1027030327, %v5421_v62  ;;  %v5439_v20 = vmul.bf16 1027030327, %v5423_v55  ;;  %v5456_v56 = vadd.bf16 %v5440_v53, %v9406_v21  ;;  %v5428_v28 = vmul.bf16 %v5412_v6, %v9422_v57 }
 0x44c   :  { %v5438_v15 = vmul.bf16 1027030327, %v5422_v1  ;;  %v5443_v46 = vmul.bf16 1027030327, %v5427_v34  ;;  %v5457_v37 = vadd.bf16 %v5441_v51, %v9416_v9  ;;  %v5446_v27 = vmul.bf16 1027030327, %v5430_v3 }
 0x44d   :  { %v5453_v31 = vadd.bf16 %v5437_v33, %v9400_v52  ;;  %v5455_v26 = vadd.bf16 %v5439_v20, %v9402_v16  ;;  %v5417_v14 = vmul.bf16 %v9448_v25, %v9448_v25  ;;  %v5474_v38 = vmul.bf16 1061961548, %v5458_v54 }
 0x44e   :  { %v5454_v8 = vadd.bf16 %v5438_v15, %v9404_v24  ;;  %v5429_v2 = vmul.bf16 %v5413_v29, %v9432_v12  ;;  %v5415_v7 = vmul.bf16 %v9434_v61, %v9434_v61  ;;  %v5416_v45 = vmul.bf16 %v9438_v50, %v9438_v50 }
 0x44f   :  { %v5469_v59 = vmul.bf16 1061961548, %v5453_v31  ;;  %v5471_v0 = vmul.bf16 1061961548, %v5455_v26  ;;  %v5472_v42 = vmul.bf16 1061961548, %v5456_v56  ;;  %v5459_v4 = vadd.bf16 %v5443_v46, %v9418_v11 }
 0x450   :  { %v5470_v5 = vmul.bf16 1061961548, %v5454_v8  ;;  %v5444_v62 = vmul.bf16 1027030327, %v5428_v28  ;;  %v5418_v55 = vmul.bf16 %v9452_v39, %v9452_v39  ;;  %v5473_v30 = vmul.bf16 1061961548, %v5457_v37 }
 0x451   :  { %8283 = vtanh.bf16 %v5469_v59  ;;  %v5462_v35 = vadd.bf16 %v5446_v27, %v9436_v23  ;;  %v5433_v33 = vmul.bf16 %v5417_v14, %v9448_v25  ;;  %v5445_v1 = vmul.bf16 1027030327, %v5429_v2 }
 0x452   :  { %8285 = vtanh.bf16 %v5471_v0  ;;  %v5431_v20 = vmul.bf16 %v5415_v7, %v9434_v61  ;;  %v5432_v48 = vmul.bf16 %v5416_v45, %v9438_v50  ;;  %v5460_v10 = vadd.bf16 %v5444_v62, %v9422_v57 }
 0x453   :  { %8287 = vtanh.bf16 %v5470_v5  ;;  %v5419_v13 = vmul.bf16 %v9450_v18, %v9450_v18  ;;  %v5420_v31 = vmul.bf16 %v9454_v19, %v9454_v19  ;;  %v5434_v15 = vmul.bf16 %v5418_v55, %v9452_v39 }
 0x454   :  { %8289 = vtanh.bf16 %v5474_v38  ;;  %v5475_v58 = vmul.bf16 1061961548, %v5459_v4  ;;  %v5478_v26 = vmul.bf16 1061961548, %v5462_v35  ;;  %v5449_v44 = vmul.bf16 1027030327, %v5433_v33 }
 0x455   :  { %8291 = vtanh.bf16 %v5472_v42  ;;  %v5461_v22 = vadd.bf16 %v5445_v1, %v9432_v12  ;;  %v5447_v32 = vmul.bf16 1027030327, %v5431_v20  ;;  %v5448_v53 = vmul.bf16 1027030327, %v5432_v48 }
 0x456   :  { %8293 = vtanh.bf16 %v5473_v30  ;;  %v5476_v59 = vmul.bf16 1061961548, %v5460_v10  ;;  %v5435_v8 = vmul.bf16 %v5419_v13, %v9450_v18  ;;  %v5436_v34 = vmul.bf16 %v5420_v31, %v9454_v19 }
 0x457   :  { %v5450_v51 = vmul.bf16 1027030327, %v5434_v15  ;;  %v5465_v3 = vadd.bf16 %v5449_v44, %v9448_v25  ;;  %8295 = vtanh.bf16 %v5478_v26  ;;  %v5477_v54 = vmul.bf16 1061961548, %v5461_v22 }
 0x458   :  { %v5463_v29 = vadd.bf16 %v5447_v32, %v9434_v61  ;;  %v5464_v56 = vadd.bf16 %v5448_v53, %v9438_v50  ;;  %8297 = vtanh.bf16 %v5475_v58  ;;  %v5451_v28 = vmul.bf16 1027030327, %v5435_v8 }
 0x459   :  { %v5452_v5 = vmul.bf16 1027030327, %v5436_v34  ;;  %8299 = vtanh.bf16 %v5476_v59  ;;  %v5466_v27 = vadd.bf16 %v5450_v51, %v9452_v39  ;;  %v5481_v2 = vmul.bf16 1061961548, %v5465_v3 }
 0x45a   :  { %v5479_v45 = vmul.bf16 1061961548, %v5463_v29  ;;  %8301 = vtanh.bf16 %v5477_v54  ;;  %v5480_v42 = vmul.bf16 1061961548, %v5464_v56  ;;  %v5467_v62 = vadd.bf16 %v5451_v28, %v9450_v18 }
 0x45b   :  { %v9520_v4 = vadd.bf16 %v5452_v5, %v9454_v19  ;;  %v5482_v30 = vmul.bf16 1061961548, %v5466_v27  ;;  %v9525_v20 = vrot.slane %v9374_v17, %v162_v47  ;;  %8303 = vtanh.bf16 %v5481_v2 }
 0x45c   :  { %v8284_v6 = vpop.eup %8283  ;;  %v9530_v31 = vrot.slane %v9374_v17, %v170_v36  ;;  %v9535_v15 = vrot.slane %v9374_v17, %v166_v49  ;;  %v9540_v58 = vrot.slane %v9374_v17, %v174_v60  ;;  %8305 = vtanh.bf16 %v5479_v45 }
 0x45d   :  { %v8286_v0 = vpop.eup %8285  ;;  %v5501_v46 = vadd.bf16 1065369472, %v8284_v6  ;;  %v5483_v47 = vmul.bf16 1061961548, %v5467_v62  ;;  %v5484_v26 = vmul.bf16 1061961548, %v9520_v4  ;;  %8307 = vtanh.bf16 %v5480_v42 }
 0x45e   :  { %v8288_v37 = vpop.eup %8287  ;;  %v5503_v14 = vadd.bf16 1065369472, %v8286_v0  ;;  %8309 = vtanh.bf16 %v5482_v30 }
 0x45f   :  { %v8290_v38 = vpop.eup %8289  ;;  %v5517_v55 = vmul.bf16 1056980736, %v5501_v46  ;;  %v5502_v33 = vadd.bf16 1065369472, %v8288_v37  ;;  %8311 = vtanh.bf16 %v5483_v47 }
 0x460   :  { %v8292_v7 = vpop.eup %8291  ;;  %v5519_v35 = vmul.bf16 1056980736, %v5503_v14  ;;  %v5506_v48 = vadd.bf16 1065369472, %v8290_v38  ;;  %8313 = vtanh.bf16 %v5484_v26 }
 0x461   :  { %v8294_v1 = vpop.eup %8293  ;;  %v5504_v10 = vadd.bf16 1065369472, %v8292_v7  ;;  %v5533_v32 = vmul.bf16 %v5517_v55, %v9400_v52  ;;  %v5518_v59 = vmul.bf16 1056980736, %v5502_v33 }
 0x462   :  { %v8296_v36 = vpop.eup %8295  ;;  %v5535_v49 = vmul.bf16 %v5519_v35, %v9402_v16  ;;  %v5505_v8 = vadd.bf16 1065369472, %v8294_v1  ;;  %v9547_v51 = vmul.bf16 1056980736, %v5506_v48  ;;  %v8115_v1 = vld [vmem:[#allocation8 + $0x100] ss:$8 sps:$4 sm:$0xff]  }
 0x463   :  { %v8298_v40 = vpop.eup %8297  ;;  %v5520_v3 = vmul.bf16 1056980736, %v5504_v10  ;;  %v5510_v27 = vadd.bf16 1065369472, %v8296_v36  ;;  %v5534_v2 = vmul.bf16 %v5518_v59, %v9404_v24 }
 0x464   :  { %v8300_v52 = vpop.eup %8299  ;;  %v5507_v7 = vadd.bf16 1065369472, %v8298_v40 }
 0x465   :  { %v9556_v45 = vpop.eup %8301  ;;  %v5536_v4 = vmul.bf16 %v5520_v3, %v9406_v21  ;;  %v5508_v55 = vadd.bf16 1065369472, %v8300_v52  ;;  %v5538_v21 = vmul.bf16 %v9547_v51, %v9420_v63  ;;  %v9570_v26 = vmul.bf16 1056980736, %v5510_v27  ;;  %v8118_v52 = vld [vmem:[#allocation8 + $0x110] ss:$8 sps:$4 sm:$0xff]  }
 0x466   :  { %v9563_v24 = vpop.eup %8303 }
 0x4ad   :  { %v5188_v13 = vpop.f32.mrb[48].mxu0 }
 0x4ae   :  { %v5334_v44 = vpop.f32.mrb[80].mxu1  ;;  %v5190_v22 = vpop.f32.mrb[49].mxu0  ;;  %v7440_v60 = vadd.f32 %v5188_v13, %v9525_v20  ;;  %v8120_v13 = vld [vmem:[#allocation8 + $0x114] ss:$8 sps:$4 sm:$0xff]  }
 0x4af   :  { %v5336_v53 = vpop.f32.mrb[81].mxu1  ;;  %v5192_v6 = vpop.f32.mrb[50].mxu0  ;;  %v7456_v54 = vadd.f32 %v5334_v44, %v9530_v31  ;;  %v7441_v29 = vadd.f32 %v5190_v22, %v9535_v15  ;;  %v5521_v44 = vmul.bf16 1056980736, %v5505_v8 }
 0x4b0   :  { %v7442_v17 = vadd.f32 %v5192_v6, %v9525_v20  ;;  %v5338_v34 = vpop.f32.mrb[82].mxu1  ;;  %v5194_v0 = vpop.f32.mrb[51].mxu0  ;;  %v7457_v5 = vadd.f32 %v5336_v53, %v9540_v58  ;;  %v5509_v53 = vadd.bf16 1065369472, %v9556_v45  ;;  %v5523_v6 = vmul.bf16 1056980736, %v5507_v7 }
 0x4b1   :  { %v7458_v16 = vadd.f32 %v5338_v34, %v9530_v31  ;;  %v7443_v56 = vadd.f32 %v5194_v0, %v9535_v15  ;;  %v5340_v28 = vpop.f32.mrb[83].mxu1 }
 0x4b2   :  { %v5377_v46 = vpack.c.bf16 %v7442_v17, %v7440_v60  ;;  %v7459_v37 = vadd.f32 %v5340_v28, %v9540_v58  ;;  %v5524_v60 = vmul.bf16 1056980736, %v5508_v55  ;;  %v8123_v28 = vld [vmem:[#allocation8 + $0x124] ss:$8 sps:$4 sm:$0xff]   ;;  %v5539_v27 = vmul.bf16 %v5523_v6, %v9418_v11 }
 0x4b3   :  { %v5379_v14 = vpack.c.bf16 %v7458_v16, %v7456_v54  ;;  %v5378_v38 = vpack.c.bf16 %v7443_v56, %v7441_v29 }
 0x4b4   :  { %v5549_v42 = vadd.bf16 %v5533_v32, %v5377_v46  ;;  %v5380_v62 = vpack.c.bf16 %v7459_v37, %v7457_v5  ;;  %v5537_v5 = vmul.bf16 %v5521_v44, %v9416_v9  ;;  %v5540_v7 = vmul.bf16 %v5524_v60, %v9422_v57  ;;  %v8126_v9 = vld [vmem:[#allocation8 + $0x134] ss:$8 sps:$4 sm:$0xff]   ;;  %v8124_v60 = vld [vmem:[#allocation8 + $0x130] ss:$8 sps:$4 sm:$0xff]  }
 0x4b5   :  { %v9559_v30 = vadd.bf16 %v5535_v49, %v5379_v14  ;;  %v5198_v35 = vpop.f32.mrb[52].mxu0  ;;  %v5550_v33 = vadd.bf16 %v5534_v2, %v5378_v38  ;;  %v8306_v49 = vpop.eup %8305  ;;  %v5542_v57 = vmul.bf16 %v9570_v26, %v9436_v23 }
 0x4b6   :  { %v5344_v48 = vpop.f32.mrb[84].mxu1  ;;  %v5200_v10 = vpop.f32.mrb[53].mxu0  ;;  %v9561_v22 = vadd.bf16 %v5536_v4, %v5380_v62  ;;  %v7444_v47 = vadd.f32 %v5198_v35, %v9525_v20  ;;  %v5511_v14 = vadd.bf16 1065369472, %v8306_v49  ;;  %v8121_v4 = vld [vmem:[#allocation8 + $0x120] ss:$8 sps:$4 sm:$0xff]  }
 0x4b7   :  { %v5346_v32 = vpop.f32.mrb[85].mxu1  ;;  %v5202_v36 = vpop.f32.mrb[54].mxu0  ;;  %5993 = vmatprep.mubr.bf16.mxu0 %v5550_v33  ;;  %v7460_v34 = vadd.f32 %v5344_v48, %v9530_v31  ;;  %v7445_v0 = vadd.f32 %v5200_v10, %v9535_v15 }
 0x4b8   :  { %v7446_v59 = vadd.f32 %v5202_v36, %v9525_v20  ;;  %v5348_v8 = vpop.f32.mrb[86].mxu1  ;;  %v5204_v40 = vpop.f32.mrb[55].mxu0  ;;  %5994 = vmatmul.mubr.bf16.vlgmr.msra.gmra.mrb[64].mxu0 %v5549_v42  ;;  %v7461_v29 = vadd.f32 %v5346_v32, %v9540_v58  ;;  %v5527_v44 = vmul.bf16 1056980736, %v5511_v14 }
 0x4b9   :  { %v8308_v17 = vpop.eup %8307  ;;  %v7462_v63 = vadd.f32 %v5348_v8, %v9530_v31  ;;  %v7447_v51 = vadd.f32 %v5204_v40, %v9535_v15  ;;  %v5350_v3 = vpop.f32.mrb[87].mxu1  ;;  %6035 = vmatpush1.bf16.msra.mxu0 %v8115_v1  ;;  %v5525_v1 = vmul.bf16 1056980736, %v5509_v53 }
 0x4ba   :  { %v9576_v54 = vpop.eup %8309  ;;  %v5385_v16 = vpack.c.bf16 %v7446_v59, %v7444_v47  ;;  %v7463_v56 = vadd.f32 %v5350_v3, %v9540_v58  ;;  %6036 = vmatprep.subr.bf16.mxu0 %v8120_v13  ;;  %v5512_v45 = vadd.bf16 1065369472, %v8308_v17  ;;  %v5513_v13 = vadd.bf16 1065369472, %v9563_v24 }
 0x4bb   :  { %v5387_v46 = vpack.c.bf16 %v7462_v63, %v7460_v34  ;;  %v5386_v37 = vpack.c.bf16 %v7447_v51, %v7445_v0  ;;  %v8312_v32 = vpop.eup %8311  ;;  %v5514_v53 = vadd.bf16 1065369472, %v9576_v54  ;;  %v8129_v63 = vld [vmem:[#allocation8 + $0x144] ss:$8 sps:$4 sm:$0xff]   ;;  %v5541_v51 = vmul.bf16 %v5525_v1, %v9432_v12  ;;  %v8132_v12 = vld [vmem:[#allocation8 + $0x154] ss:$8 sps:$4 sm:$0xff]  }
 0x4bc   :  { %v5388_v38 = vpack.c.bf16 %v7463_v56, %v7461_v29  ;;  %v5553_v2 = vadd.bf16 %v5537_v5, %v5385_v16  ;;  %v5528_v47 = vmul.bf16 1056980736, %v5512_v45  ;;  %v8314_v59 = vpop.eup %8313  ;;  %v5543_v54 = vmul.bf16 %v5527_v44, %v9434_v61 }
 0x4bd   :  { %6037 = vmatpush1.bf16.msra.mxu0 %v8118_v52  ;;  %v5208_v42 = vpop.f32.mrb[56].mxu0  ;;  %v5554_v62 = vadd.bf16 %v5538_v21, %v5386_v37  ;;  %v9583_v55 = vadd.bf16 %v5539_v27, %v5387_v46  ;;  %v5515_v29 = vadd.bf16 1065369472, %v8312_v32  ;;  %v5516_v5 = vadd.bf16 1065369472, %v8314_v59 }
 0x4be   :  { %v5354_v35 = vpop.f32.mrb[88].mxu1  ;;  %v5210_v33 = vpop.f32.mrb[57].mxu0  ;;  %6038 = vmatprep.subr.bf16.mxu0 %v8123_v28  ;;  %v9585_v48 = vadd.bf16 %v5540_v7, %v5388_v38  ;;  %v7448_v36 = vadd.f32 %v5208_v42, %v9525_v20  ;;  %v5544_v28 = vmul.bf16 %v5528_v47, %v9438_v50  ;;  %v8127_v27 = vld [vmem:[#allocation8 + $0x140] ss:$8 sps:$4 sm:$0xff]   ;;  %v5529_v7 = vmul.bf16 1056980736, %v5513_v13 }
 0x4bf   :  { %v5356_v11 = vpop.f32.mrb[89].mxu1  ;;  %v5212_v10 = vpop.f32.mrb[58].mxu0  ;;  %6003 = vmatprep.mubr.bf16.mxu0 %v5554_v62  ;;  %v7464_v8 = vadd.f32 %v5354_v35, %v9530_v31  ;;  %v7449_v40 = vadd.f32 %v5210_v33, %v9535_v15  ;;  %v5530_v62 = vmul.bf16 1056980736, %v5514_v53  ;;  %v5532_v1 = vmul.bf16 1056980736, %v5516_v5 }
 0x4c0   :  { %v7450_v21 = vadd.f32 %v5212_v10, %v9525_v20  ;;  %v5358_v6 = vpop.f32.mrb[90].mxu1  ;;  %v5214_v49 = vpop.f32.mrb[59].mxu0  ;;  %6004 = vmatmul.mubr.bf16.gmra.mrb[68].mxu0 %v5553_v2  ;;  %v7465_v17 = vadd.f32 %v5356_v11, %v9540_v58  ;;  %v8130_v32 = vld [vmem:[#allocation8 + $0x150] ss:$8 sps:$4 sm:$0xff]   ;;  %v8163_v5 = vld [vmem:[#allocation10 + $0x40] sm:$0xff]  }
 0x4c1   :  { %v7466_v23 = vadd.f32 %v5358_v6, %v9530_v31  ;;  %v7451_v24 = vadd.f32 %v5214_v49, %v9535_v15  ;;  %v5360_v26 = vpop.f32.mrb[91].mxu1  ;;  %6039 = vmatpush1.bf16.msra.mxu0 %v8121_v4  ;;  %v5531_v4 = vmul.bf16 1056980736, %v5515_v29  ;;  %v8135_v6 = vld [vmem:[#allocation8 + $0x164] ss:$8 sps:$4 sm:$0xff]   ;;  %v5545_v49 = vmul.bf16 %v5529_v7, %v9448_v25  ;;  %7300 = vmatprep.subr.bf16.mxu1 %v8163_v5 }
 0x4c2   :  { %v5393_v34 = vpack.c.bf16 %v7450_v21, %v7448_v36  ;;  %v7467_v0 = vadd.f32 %v5360_v26, %v9540_v58  ;;  %6040 = vmatprep.subr.bf16.mxu0 %v8126_v9  ;;  %v5546_v59 = vmul.bf16 %v5530_v62, %v9452_v39  ;;  %v8136_v25 = vld [vmem:[#allocation8 + $0x170] ss:$8 sps:$4 sm:$0xff]   ;;  %v8141_v39 = vld [vmem:[#allocation8 + $0x184] ss:$8 sps:$4 sm:$0xff]  }
 0x4c3   :  { %v5395_v3 = vpack.c.bf16 %v7466_v23, %v7464_v8  ;;  %v5394_v52 = vpack.c.bf16 %v7451_v24, %v7449_v40  ;;  %v5548_v40 = vmul.bf16 %v5532_v1, %v9454_v19  ;;  %v8133_v24 = vld [vmem:[#allocation8 + $0x160] ss:$8 sps:$4 sm:$0xff]   ;;  %v8142_v19 = vld [vmem:[#allocation8 + $0x190] ss:$8 sps:$4 sm:$0xff]   ;;  %v8159_v29 = vld [vmem:[#allocation8 + $0x1e4] ss:$8 sps:$4 sm:$0xff]  }
 0x4c4   :  { %v5396_v16 = vpack.c.bf16 %v7467_v0, %v7465_v17  ;;  %v5557_v56 = vadd.bf16 %v5541_v51, %v5393_v34  ;;  %v8144_v17 = vld [vmem:[#allocation8 + $0x194] ss:$8 sps:$4 sm:$0xff]   ;;  %v8147_v34 = vld [vmem:[#allocation8 + $0x1a4] ss:$8 sps:$4 sm:$0xff]   ;;  %v8145_v0 = vld [vmem:[#allocation8 + $0x1a0] ss:$8 sps:$4 sm:$0xff]  }
 0x4c5   :  { %6041 = vmatpush1.bf16.msra.mxu0 %v8124_v60  ;;  %v5218_v46 = vpop.f32.mrb[60].mxu0  ;;  %v5558_v37 = vadd.bf16 %v5542_v57, %v5394_v52  ;;  %v9602_v14 = vadd.bf16 %v5543_v54, %v5395_v3  ;;  %v8148_v51 = vld [vmem:[#allocation8 + $0x1b0] ss:$8 sps:$4 sm:$0xff]   ;;  %v8153_v3 = vld [vmem:[#allocation8 + $0x1c4] ss:$8 sps:$4 sm:$0xff]  }
 0x4c6   :  { %v5364_v38 = vpop.f32.mrb[92].mxu1  ;;  %v5220_v2 = vpop.f32.mrb[61].mxu0  ;;  %6042 = vmatprep.subr.bf16.mxu0 %v8129_v63  ;;  %v9604_v45 = vadd.bf16 %v5544_v28, %v5396_v16  ;;  %v7452_v50 = vadd.f32 %v5218_v46, %v9525_v20  ;;  %v8150_v63 = vld [vmem:[#allocation8 + $0x1b4] ss:$8 sps:$4 sm:$0xff]   ;;  %v8154_v54 = vld [vmem:[#allocation8 + $0x1d0] ss:$8 sps:$4 sm:$0xff]  }
 0x4c7   :  { %v5366_v61 = vpop.f32.mrb[93].mxu1  ;;  %v5222_v42 = vpop.f32.mrb[62].mxu0  ;;  %6013 = vmatprep.mubr.bf16.mxu0 %v5558_v37  ;;  %v7468_v11 = vadd.f32 %v5364_v38, %v9530_v31  ;;  %v7453_v10 = vadd.f32 %v5220_v2, %v9535_v15  ;;  %v8156_v52 = vld [vmem:[#allocation8 + $0x1d4] ss:$8 sps:$4 sm:$0xff]   ;;  %v8157_v16 = vld [vmem:[#allocation8 + $0x1e0] ss:$8 sps:$4 sm:$0xff]  }
 0x4c8   :  { %v7454_v35 = vadd.f32 %v5222_v42, %v9525_v20  ;;  %v5368_v33 = vpop.f32.mrb[94].mxu1  ;;  %v5224_v9 = vpop.f32.mrb[63].mxu0  ;;  %6014 = vmatmul.mubr.bf16.gmra.mrb[72].mxu0 %v5557_v56  ;;  %v7469_v36 = vadd.f32 %v5366_v61, %v9540_v58  ;;  %v8162_v56 = vld [vmem:[#allocation8 + $0x1f4] ss:$8 sps:$4 sm:$0xff]   ;;  %v8160_v28 = vld [vmem:[#allocation8 + $0x1f0] ss:$8 sps:$4 sm:$0xff]  }
 0x4c9   :  { %v7470_v57 = vadd.f32 %v5368_v33, %v9530_v31  ;;  %v7455_v13 = vadd.f32 %v5224_v9, %v9535_v15  ;;  %v5370_v44 = vpop.f32.mrb[95].mxu1  ;;  %6043 = vmatpush1.bf16.msra.mxu0 %v8127_v27  ;;  %v5547_v31 = vmul.bf16 %v5531_v4, %v9450_v18  ;;  %v8139_v18 = vld [vmem:[#allocation8 + $0x180] ss:$8 sps:$4 sm:$0xff]   ;;  %v8167_v38 = vld [vmem:[#allocation10 + $0x50] sm:$0xff]   ;;  %v8177_v42 = vld [vmem:[#allocation10 + $0x78] sm:$0xff]  }
 0x4ca   :  { %v5401_v21 = vpack.c.bf16 %v7454_v35, %v7452_v50  ;;  %v7471_v20 = vadd.f32 %v5370_v44, %v9540_v58  ;;  %6044 = vmatprep.subr.bf16.mxu0 %v8132_v12  ;;  %v8138_v58 = vld [vmem:[#allocation8 + $0x174] ss:$8 sps:$4 sm:$0xff]   ;;  %v8164_v46 = vld [vmem:[#allocation10] sm:$0xff]   ;;  %v8165_v37 = vld [vmem:[#allocation10 + $0x48] sm:$0xff]  }
 0x4cb   :  { %v5403_v53 = vpack.c.bf16 %v7470_v57, %v7468_v11  ;;  %v5402_v47 = vpack.c.bf16 %v7455_v13, %v7453_v10  ;;  %7301 = vmatpush3.bf16.msra.mxu1 %v8164_v46  ;;  %v8166_v27 = vld [vmem:[#allocation10 + $0x8] sm:$0xff]   ;;  %v8171_v2 = vld [vmem:[#allocation10 + $0x60] sm:$0xff]   ;;  %v8176_v61 = vld [vmem:[#allocation10 + $0x30] sm:$0xff]  }
 0x4cc   :  { %v5404_v8 = vpack.c.bf16 %v7471_v20, %v7469_v36  ;;  %v5561_v15 = vadd.bf16 %v5545_v49, %v5401_v21  ;;  %7302 = vmatprep.subr.bf16.mxu1 %v8165_v37  ;;  %v8173_v12 = vld [vmem:[#allocation10 + $0x68] sm:$0xff]   ;;  %v8178_v62 = vld [vmem:[#allocation10 + $0x38] sm:$0xff]   ;;  %v5629_v4 = vld [vmem:[%s9744_s8] sm:$0x3] }
 0x4cd   :  { %6045 = vmatpush1.bf16.msra.mxu0 %v8130_v32  ;;  %v5562_v23 = vadd.bf16 %v5546_v59, %v5402_v47  ;;  %v5563_v26 = vadd.bf16 %v5547_v31, %v5403_v53  ;;  %v8174_v7 = vld [vmem:[#allocation10 + $0x28] sm:$0xff]   ;;  %v9628_v50 = vrot.slane %v5629_v4, %v8738_v41  ;;  %v9631_v33 = vrot.slane %v5629_v4, %v8746_v43 }
 0x4ce   :  { %6046 = vmatprep.subr.bf16.mxu0 %v8135_v6  ;;  %v5564_v60 = vadd.bf16 %v5548_v40, %v5404_v8 }
 0x4cf   :  { %6023 = vmatprep.mubr.bf16.mxu0 %v5562_v23  ;;  %7303 = vmatpush3.bf16.msra.mxu1 %v8166_v27 }
 0x4d0   :  { %6024 = vmatmul.mubr.bf16.gmra.mrb[76].mxu0 %v5561_v15  ;;  %7304 = vmatprep.subr.bf16.mxu1 %v8167_v38 }
 0x4d1   :  { %6047 = vmatpush1.bf16.msra.mxu0 %v8133_v24  ;;  %6066 = vmatprep.mubr.bf16.mxu0 %v9561_v22  ;;  %v8151_v22 = vld [vmem:[#allocation8 + $0x1c0] ss:$8 sps:$4 sm:$0xff]  }
 0x4d2   :  { %6048 = vmatprep.subr.bf16.mxu0 %v8138_v58 }
 0x4d5   :  { %6049 = vmatpush1.bf16.msra.mxu0 %v8136_v25 }
 0x4d6   :  { %6050 = vmatprep.subr.bf16.mxu0 %v8141_v39 }
 0x4d9   :  { %6051 = vmatpush1.bf16.msra.mxu0 %v8139_v18 }
 0x4da   :  { %6052 = vmatprep.subr.bf16.mxu0 %v8144_v17 }
 0x4dd   :  { %6053 = vmatpush1.bf16.msra.mxu0 %v8142_v19 }
 0x4de   :  { %6054 = vmatprep.subr.bf16.mxu0 %v8147_v34 }
 0x4e1   :  { %6055 = vmatpush1.bf16.msra.mxu0 %v8145_v0 }
 0x4e2   :  { %6056 = vmatprep.subr.bf16.mxu0 %v8150_v63 }
 0x4e5   :  { %6057 = vmatpush1.bf16.msra.mxu0 %v8148_v51 }
 0x4e6   :  { %6058 = vmatprep.subr.bf16.mxu0 %v8153_v3 }
 0x4e9   :  { %6059 = vmatpush1.bf16.msra.mxu0 %v8151_v22 }
 0x4ea   :  { %6060 = vmatprep.subr.bf16.mxu0 %v8156_v52 }
 0x4ed   :  { %6061 = vmatpush1.bf16.msra.mxu0 %v8154_v54 }
 0x4ee   :  { %6062 = vmatprep.subr.bf16.mxu0 %v8159_v29 }
 0x4f1   :  { %6063 = vmatpush1.bf16.msra.mxu0 %v8157_v16 }
 0x4f2   :  { %6064 = vmatprep.subr.bf16.mxu0 %v8162_v56 }
 0x4f5   :  { %6065 = vmatpush1.bf16.msra.mxu0 %v8160_v28 }
 0x4f8   :  { %6067 = vmatmul.mubr.bf16.vlgmr.msra.gmra.mrb[64].mxu0 %v9559_v30  ;;  %v8168_v30 = vld [vmem:[#allocation10 + $0x10] sm:$0xff]  }
 0x4f9   :  { %6076 = vmatprep.mubr.bf16.mxu0 %v9585_v48  ;;  %v8169_v48 = vld [vmem:[#allocation10 + $0x58] sm:$0xff]   ;;  %7305 = vmatpush3.bf16.msra.mxu1 %v8168_v30 }
 0x4fa   :  { %7306 = vmatprep.subr.bf16.mxu1 %v8169_v48 }
 0x500   :  { %6077 = vmatmul.mubr.bf16.gmra.mrb[68].mxu0 %v9583_v55  ;;  %v8170_v55 = vld [vmem:[#allocation10 + $0x18] sm:$0xff]  }
 0x501   :  { %6086 = vmatprep.mubr.bf16.mxu0 %v9604_v45  ;;  %7307 = vmatpush3.bf16.msra.mxu1 %v8170_v55  ;;  %v8175_v45 = vld [vmem:[#allocation10 + $0x70] sm:$0xff]  }
 0x502   :  { %7308 = vmatprep.subr.bf16.mxu1 %v8171_v2 }
 0x508   :  { %6087 = vmatmul.mubr.bf16.gmra.mrb[72].mxu0 %v9602_v14  ;;  %v8172_v14 = vld [vmem:[#allocation10 + $0x20] sm:$0xff]  }
 0x509   :  { %6096 = vmatprep.mubr.bf16.mxu0 %v5564_v60  ;;  %7309 = vmatpush3.bf16.msra.mxu1 %v8172_v14 }
 0x50a   :  { %7310 = vmatprep.subr.bf16.mxu1 %v8173_v12 }
 0x50d   :  { %7311 = vmatpush3.bf16.msra.mxu1 %v8174_v7 }
 0x50e   :  { %7312 = vmatprep.subr.bf16.mxu1 %v8175_v45 }
 0x510   :  { %6097 = vmatmul.mubr.bf16.gmra.mrb[76].mxu0 %v5563_v26 }
 0x511   :  { %7313 = vmatpush3.bf16.msra.mxu1 %v8176_v61 }
 0x512   :  { %7314 = vmatprep.subr.bf16.mxu1 %v8177_v42 }
 0x515   :  { %7315 = vmatpush3.bf16.msra.mxu1 %v8178_v62 }
 0x5cb   :  { %v6068_v35 = vpop.f32.mrb[64].mxu0 }
 0x5cc   :  { %v6070_v9 = vpop.f32.mrb[65].mxu0  ;;  %v7472_v11 = vadd.f32 %v6068_v35, %v9628_v50 }
 0x5cd   :  { %v6072_v1 = vpop.f32.mrb[66].mxu0  ;;  %v7473_v13 = vadd.f32 %v6070_v9, %v9631_v33 }
 0x5ce   :  { %v7474_v10 = vadd.f32 %v6072_v1, %v9628_v50  ;;  %v6074_v57 = vpop.f32.mrb[67].mxu0 }
 0x5cf   :  { %v7475_v44 = vadd.f32 %v6074_v57, %v9631_v33 }
 0x5d0   :  { %v9637_v32 = vpack.c.bf16 %v7474_v10, %v7472_v11 }
 0x5d1   :  { %v9639_v36 = vpack.c.bf16 %v7475_v44, %v7473_v13 }
 0x5d2   :  { %v6115_v41 = vmul.bf16 %v9637_v32, %v9637_v32 }
 0x5d3   :  { %v6116_v43 = vmul.bf16 %v9639_v36, %v9639_v36  ;;  %v6078_v21 = vpop.f32.mrb[68].mxu0 }
 0x5d4   :  { %v6123_v20 = vmul.bf16 %v6115_v41, %v9637_v32  ;;  %v6080_v6 = vpop.f32.mrb[69].mxu0  ;;  %v7476_v59 = vadd.f32 %v6078_v21, %v9628_v50 }
 0x5d5   :  { %v6124_v49 = vmul.bf16 %v6116_v43, %v9639_v36  ;;  %v6082_v53 = vpop.f32.mrb[70].mxu0  ;;  %v7477_v40 = vadd.f32 %v6080_v6, %v9631_v33 }
 0x5d6   :  { %v6131_v47 = vmul.bf16 1027030327, %v6123_v20  ;;  %v7478_v31 = vadd.f32 %v6082_v53, %v9628_v50  ;;  %v6084_v8 = vpop.f32.mrb[71].mxu0 }
 0x5d7   :  { %v6132_v15 = vmul.bf16 1027030327, %v6124_v49  ;;  %v7479_v23 = vadd.f32 %v6084_v8, %v9631_v33 }
 0x5d8   :  { %v6139_v24 = vadd.bf16 %v6131_v47, %v9637_v32  ;;  %v9652_v26 = vpack.c.bf16 %v7478_v31, %v7476_v59 }
 0x5d9   :  { %v9654_v58 = vpack.c.bf16 %v7479_v23, %v7477_v40  ;;  %v6140_v60 = vadd.bf16 %v6132_v15, %v9639_v36 }
 0x5da   :  { %v6147_v25 = vmul.bf16 1061961548, %v6139_v24  ;;  %v6117_v39 = vmul.bf16 %v9652_v26, %v9652_v26 }
 0x5db   :  { %v6118_v18 = vmul.bf16 %v9654_v58, %v9654_v58  ;;  %v6088_v17 = vpop.f32.mrb[72].mxu0  ;;  %v6148_v19 = vmul.bf16 1061961548, %v6140_v60 }
 0x5dc   :  { %8315 = vtanh.bf16 %v6147_v25  ;;  %v6125_v34 = vmul.bf16 %v6117_v39, %v9652_v26  ;;  %v6090_v0 = vpop.f32.mrb[73].mxu0  ;;  %v7480_v22 = vadd.f32 %v6088_v17, %v9628_v50 }
 0x5dd   :  { %v6126_v63 = vmul.bf16 %v6118_v18, %v9654_v58  ;;  %v6092_v51 = vpop.f32.mrb[74].mxu0  ;;  %8317 = vtanh.bf16 %v6148_v19  ;;  %v7481_v16 = vadd.f32 %v6090_v0, %v9631_v33 }
 0x5de   :  { %v6133_v3 = vmul.bf16 1027030327, %v6125_v34  ;;  %v7482_v52 = vadd.f32 %v6092_v51, %v9628_v50  ;;  %v6094_v54 = vpop.f32.mrb[75].mxu0 }
 0x5df   :  { %v6134_v29 = vmul.bf16 1027030327, %v6126_v63  ;;  %v7483_v56 = vadd.f32 %v6094_v54, %v9631_v33 }
 0x5e0   :  { %v9667_v28 = vpack.c.bf16 %v7482_v52, %v7480_v22  ;;  %v6141_v5 = vadd.bf16 %v6133_v3, %v9652_v26 }
 0x5e1   :  { %v9670_v46 = vpack.c.bf16 %v7483_v56, %v7481_v16  ;;  %v6142_v37 = vadd.bf16 %v6134_v29, %v9654_v58 }
 0x5e2   :  { %v6119_v27 = vmul.bf16 %v9667_v28, %v9667_v28  ;;  %v6149_v38 = vmul.bf16 1061961548, %v6141_v5 }
 0x5e3   :  { %v6120_v30 = vmul.bf16 %v9670_v46, %v9670_v46  ;;  %v6098_v48 = vpop.f32.mrb[76].mxu0  ;;  %v6150_v55 = vmul.bf16 1061961548, %v6142_v37 }
 0x5e4   :  { %v6127_v2 = vmul.bf16 %v6119_v27, %v9667_v28  ;;  %v6100_v14 = vpop.f32.mrb[77].mxu0  ;;  %8319 = vtanh.bf16 %v6149_v38  ;;  %v7484_v61 = vadd.f32 %v6098_v48, %v9628_v50  ;;  %v8182_v48 = vld [vmem:[%s9747_s11 + $0x18] sm:$0xff]  }
 0x5e5   :  { %v6128_v12 = vmul.bf16 %v6120_v30, %v9670_v46  ;;  %v6102_v7 = vpop.f32.mrb[78].mxu0  ;;  %8321 = vtanh.bf16 %v6150_v55  ;;  %v7485_v9 = vadd.f32 %v6100_v14, %v9631_v33  ;;  %v8179_v30 = vld [vmem:[%s9747_s11] sm:$0xff]   ;;  %v8185_v14 = vld [vmem:[%s9747_s11 + $0x30] sm:$0xff]  }
 0x5e6   :  { %v6135_v45 = vmul.bf16 1027030327, %v6127_v2  ;;  %v7486_v42 = vadd.f32 %v6102_v7, %v9628_v50  ;;  %v6104_v62 = vpop.f32.mrb[79].mxu0  ;;  %7352 = vmatprep.subr.bf16.mxu1 %v8179_v30  ;;  %v8183_v55 = vld [vmem:[%s9747_s11 + $0x20] sm:$0xff]   ;;  %v8184_v2 = vld [vmem:[%s9747_s11 + $0x28] sm:$0xff]  }
 0x5e7   :  { %v8316_v4 = vpop.eup %8315  ;;  %v6136_v35 = vmul.bf16 1027030327, %v6128_v12  ;;  %v7487_v1 = vadd.f32 %v6104_v62, %v9631_v33  ;;  %v8186_v12 = vld [vmem:[%s9747_s11 + $0x38] sm:$0xff]   ;;  %v7274_v62 = vld [vmem:[%s9746_s10] ss:$0 sm:$0xff] }
 0x5e8   :  { %v8318_v11 = vpop.eup %8317  ;;  %v6163_v10 = vadd.bf16 1065369472, %v8316_v4  ;;  %v6113_v57 = vpack.c.bf16 %v7486_v42, %v7484_v61  ;;  %v6143_v13 = vadd.bf16 %v6135_v45, %v9667_v28 }
 0x5e9   :  { %v6114_v44 = vpack.c.bf16 %v7487_v1, %v7485_v9  ;;  %v6164_v41 = vadd.bf16 1065369472, %v8318_v11  ;;  %v6144_v43 = vadd.bf16 %v6136_v35, %v9670_v46 }
 0x5ea   :  { %v6171_v21 = vmul.bf16 1056980736, %v6163_v10  ;;  %v6121_v20 = vmul.bf16 %v6113_v57, %v6113_v57  ;;  %v6151_v6 = vmul.bf16 1061961548, %v6143_v13 }
 0x5eb   :  { %v6122_v50 = vmul.bf16 %v6114_v44, %v6114_v44  ;;  %v6172_v49 = vmul.bf16 1056980736, %v6164_v41  ;;  %v6152_v53 = vmul.bf16 1061961548, %v6144_v43 }
 0x5ec   :  { %v6129_v47 = vmul.bf16 %v6121_v20, %v6113_v57  ;;  %8323 = vtanh.bf16 %v6151_v6  ;;  %v6179_v31 = vmul.bf16 %v6171_v21, %v9637_v32 }
 0x5ed   :  { %v6130_v59 = vmul.bf16 %v6122_v50, %v6114_v44  ;;  %v6180_v33 = vmul.bf16 %v6172_v49, %v9639_v36  ;;  %8325 = vtanh.bf16 %v6152_v53 }
 0x5ee   :  { %v6137_v8 = vmul.bf16 1027030327, %v6129_v47 }
 0x5ef   :  { %v8320_v15 = vpop.eup %8319  ;;  %v6138_v40 = vmul.bf16 1027030327, %v6130_v59  ;;  %6354 = vmatprep.mubr.bf16.mxu1 %v6180_v33 }
 0x5f0   :  { %v8322_v23 = vpop.eup %8321  ;;  %6355 = vmatmul.mubr.bf16.vlgmr.msra.gmra.mrb[96].mxu1 %v6179_v31  ;;  %v6165_v24 = vadd.bf16 1065369472, %v8320_v15  ;;  %v6145_v60 = vadd.bf16 %v6137_v8, %v6113_v57 }
 0x5f1   :  { %v6166_v25 = vadd.bf16 1065369472, %v8322_v23  ;;  %v6146_v39 = vadd.bf16 %v6138_v40, %v6114_v44  ;;  %7353 = vmatpush3.bf16.msra.mxu1 %v8179_v30 }
 0x5f2   :  { %v6173_v18 = vmul.bf16 1056980736, %v6165_v24  ;;  %v6153_v17 = vmul.bf16 1061961548, %v6145_v60 }
 0x5f3   :  { %v6174_v19 = vmul.bf16 1056980736, %v6166_v25  ;;  %v6154_v34 = vmul.bf16 1061961548, %v6146_v39 }
 0x5f4   :  { %8327 = vtanh.bf16 %v6153_v17  ;;  %v6181_v32 = vmul.bf16 %v6173_v18, %v9652_v26 }
 0x5f5   :  { %v6182_v36 = vmul.bf16 %v6174_v19, %v9654_v58  ;;  %8329 = vtanh.bf16 %v6154_v34 }
 0x5f7   :  { %v8324_v0 = vpop.eup %8323  ;;  %6362 = vmatprep.mubr.bf16.mxu1 %v6182_v36 }
 0x5f8   :  { %v8326_v63 = vpop.eup %8325  ;;  %6363 = vmatmul.mubr.bf16.gmra.mrb[100].mxu1 %v6181_v32  ;;  %v6167_v51 = vadd.bf16 1065369472, %v8324_v0 }
 0x5f9   :  { %v6168_v3 = vadd.bf16 1065369472, %v8326_v63 }
 0x5fa   :  { %v6175_v22 = vmul.bf16 1056980736, %v6167_v51 }
 0x5fb   :  { %v6176_v52 = vmul.bf16 1056980736, %v6168_v3 }
 0x5fc   :  { %v6183_v29 = vmul.bf16 %v6175_v22, %v9667_v28  ;;  %v8180_v28 = vld [vmem:[%s9747_s11 + $0x8] sm:$0xff]  }
 0x5fd   :  { %v6184_v54 = vmul.bf16 %v6176_v52, %v9670_v46  ;;  %7354 = vmatprep.subr.bf16.mxu1 %v8180_v28  ;;  %v8181_v46 = vld [vmem:[%s9747_s11 + $0x10] sm:$0xff]  }
 0x5fe   :  { %7355 = vmatpush3.bf16.msra.mxu1 %v8180_v28 }
 0x5ff   :  { %v8328_v16 = vpop.eup %8327  ;;  %6370 = vmatprep.mubr.bf16.mxu1 %v6184_v54  ;;  %7356 = vmatprep.subr.bf16.mxu1 %v8181_v46 }
 0x600   :  { %v8330_v56 = vpop.eup %8329  ;;  %6371 = vmatmul.mubr.bf16.gmra.mrb[104].mxu1 %v6183_v29  ;;  %v6169_v58 = vadd.bf16 1065369472, %v8328_v16 }
 0x601   :  { %v6170_v5 = vadd.bf16 1065369472, %v8330_v56 }
 0x602   :  { %v6177_v37 = vmul.bf16 1056980736, %v6169_v58  ;;  %7357 = vmatpush3.bf16.msra.mxu1 %v8181_v46 }
 0x603   :  { %v6178_v26 = vmul.bf16 1056980736, %v6170_v5  ;;  %7358 = vmatprep.subr.bf16.mxu1 %v8182_v48 }
 0x604   :  { %v6185_v38 = vmul.bf16 %v6177_v37, %v6113_v57 }
 0x605   :  { %v6186_v27 = vmul.bf16 %v6178_v26, %v6114_v44 }
 0x606   :  { %7359 = vmatpush3.bf16.msra.mxu1 %v8182_v48 }
 0x607   :  { %6378 = vmatprep.mubr.bf16.mxu1 %v6186_v27  ;;  %7360 = vmatprep.subr.bf16.mxu1 %v8183_v55 }
 0x608   :  { %6379 = vmatmul.mubr.bf16.gmra.mrb[108].mxu1 %v6185_v38 }
 0x60a   :  { %7361 = vmatpush3.bf16.msra.mxu1 %v8183_v55 }
 0x60b   :  { %7362 = vmatprep.subr.bf16.mxu1 %v8184_v2 }
 0x60e   :  { %7363 = vmatpush3.bf16.msra.mxu1 %v8184_v2 }
 0x60f   :  { %7364 = vmatprep.subr.bf16.mxu1 %v8185_v14 }
 0x612   :  { %7365 = vmatpush3.bf16.msra.mxu1 %v8185_v14 }
 0x613   :  { %7366 = vmatprep.subr.bf16.mxu1 %v8186_v12 }
 0x616   :  { %7367 = vmatpush3.bf16.msra.mxu1 %v8186_v12 }
 0x6c3   :  { %v7316_v7 = vpop.f32.mrb[96].mxu1 }
 0x6c4   :  { %v7317_v45 = vpop.f32.mrb[97].mxu1 }
 0x6c5   :  { %v7318_v61 = vadd.f32 %v7317_v45, %v7316_v7  ;;  %v7319_v42 = vpop.f32.mrb[98].mxu1 }
 0x6c6   :  { %v7320_v4 = vpop.f32.mrb[99].mxu1 }
 0x6c7   :  { %v7321_v35 = vadd.f32 %v7320_v4, %v7319_v42  ;;  %v6357_v9 = vadd.f32 %v7318_v61, %v7274_v62 }
 0x6c9   :  { %v6360_v1 = vadd.f32 %v7321_v35, %v7274_v62 }
 0x6cb   :  { %v6387_v11 = vpack.c.bf16 %v6360_v1, %v6357_v9  ;;  %v7322_v10 = vpop.f32.mrb[100].mxu1 }
 0x6cc   :  { %v7323_v57 = vpop.f32.mrb[101].mxu1 }
 0x6cd   :  { %v6391_v13 = vmul.bf16 %v6387_v11, %v6387_v11  ;;  %v7324_v44 = vadd.f32 %v7323_v57, %v7322_v10  ;;  %v7325_v41 = vpop.f32.mrb[102].mxu1 }
 0x6ce   :  { %v7326_v43 = vpop.f32.mrb[103].mxu1 }
 0x6cf   :  { %v6395_v21 = vmul.bf16 %v6391_v13, %v6387_v11  ;;  %v7327_v20 = vadd.f32 %v7326_v43, %v7325_v41  ;;  %v6365_v6 = vadd.f32 %v7324_v44, %v7274_v62 }
 0x6d1   :  { %v6368_v50 = vadd.f32 %v7327_v20, %v7274_v62  ;;  %v6399_v49 = vmul.bf16 1027030327, %v6395_v21 }
 0x6d3   :  { %v6388_v53 = vpack.c.bf16 %v6368_v50, %v6365_v6  ;;  %v7328_v47 = vpop.f32.mrb[104].mxu1  ;;  %v6403_v59 = vadd.bf16 %v6399_v49, %v6387_v11 }
 0x6d4   :  { %v7329_v33 = vpop.f32.mrb[105].mxu1 }
 0x6d5   :  { %v6392_v31 = vmul.bf16 %v6388_v53, %v6388_v53  ;;  %v7330_v8 = vadd.f32 %v7329_v33, %v7328_v47  ;;  %v7331_v15 = vpop.f32.mrb[106].mxu1  ;;  %v6407_v40 = vmul.bf16 1061961548, %v6403_v59 }
 0x6d6   :  { %v7332_v23 = vpop.f32.mrb[107].mxu1 }
 0x6d7   :  { %v6396_v24 = vmul.bf16 %v6392_v31, %v6388_v53  ;;  %v7333_v60 = vadd.f32 %v7332_v23, %v7331_v15  ;;  %8331 = vtanh.bf16 %v6407_v40  ;;  %v6373_v39 = vadd.f32 %v7330_v8, %v7274_v62 }
 0x6d9   :  { %v6400_v25 = vmul.bf16 1027030327, %v6396_v24  ;;  %v6376_v18 = vadd.f32 %v7333_v60, %v7274_v62 }
 0x6db   :  { %v6404_v17 = vadd.bf16 %v6400_v25, %v6388_v53  ;;  %v6389_v19 = vpack.c.bf16 %v6376_v18, %v6373_v39  ;;  %v7334_v34 = vpop.f32.mrb[108].mxu1 }
 0x6dc   :  { %v7335_v36 = vpop.f32.mrb[109].mxu1 }
 0x6dd   :  { %v6408_v32 = vmul.bf16 1061961548, %v6404_v17  ;;  %v6393_v0 = vmul.bf16 %v6389_v19, %v6389_v19  ;;  %v7336_v63 = vadd.f32 %v7335_v36, %v7334_v34  ;;  %v7337_v51 = vpop.f32.mrb[110].mxu1 }
 0x6de   :  { %v7338_v3 = vpop.f32.mrb[111].mxu1 }
 0x6df   :  { %8333 = vtanh.bf16 %v6408_v32  ;;  %v6397_v22 = vmul.bf16 %v6393_v0, %v6389_v19  ;;  %v7339_v52 = vadd.f32 %v7338_v3, %v7337_v51  ;;  %v6381_v54 = vadd.f32 %v7336_v63, %v7274_v62 }
 0x6e1   :  { %v6384_v29 = vadd.f32 %v7339_v52, %v7274_v62  ;;  %v6401_v16 = vmul.bf16 1027030327, %v6397_v22 }
 0x6e2   :  { %v8332_v56 = vpop.eup %8331 }
 0x6e3   :  { %v6390_v58 = vpack.c.bf16 %v6384_v29, %v6381_v54  ;;  %v6415_v5 = vadd.bf16 1065369472, %v8332_v56  ;;  %v6405_v37 = vadd.bf16 %v6401_v16, %v6389_v19 }
 0x6e5   :  { %v6394_v26 = vmul.bf16 %v6390_v58, %v6390_v58  ;;  %v6419_v27 = vmul.bf16 1056980736, %v6415_v5  ;;  %v6409_v38 = vmul.bf16 1061961548, %v6405_v37 }
 0x6e7   :  { %v6398_v30 = vmul.bf16 %v6394_v26, %v6390_v58  ;;  %v6423_v28 = vmul.bf16 %v6419_v27, %v6387_v11  ;;  %8335 = vtanh.bf16 %v6409_v38  ;;  %v7291_v11 = vld [vmem:[%s9748_s12] ss:$0 sm:$0xff]  ;;  %s8525_s12 = smov [#allocation11]  }
 0x6e8   :  { %s6648_s30 = sshll.u32 %s8525_s12, 4  ;;  %s6649_s30 = int_to_ptr.vmem [resolvable:$true] %s6648_s30 }
 0x6e9   :  { %7368 = vmatprep.mubr.bf16.mxu1 %v6423_v28  ;;  %v6402_v46 = vmul.bf16 1027030327, %v6398_v30  ;;  %s8481_s2 = scalar_lea.vmem %s6649_s30, 1024  ;;  %p8486_p13 = scmp.lt.s32.totalorder %s6649_s30, %s6649_s30 }
 0x6ea   :  { %v8334_v48 = vpop.eup %8333  ;;  %p8482_p12 = scmp.ne.s32.totalorder %s6649_s30, %s8481_s2  ;;  %p8487_p0 = scmp.lt.s32.totalorder %s8481_s2, %s8481_s2 }
 0x6eb   :  { %v6416_v55 = vadd.bf16 1065369472, %v8334_v48  ;;  %v6406_v2 = vadd.bf16 %v6402_v46, %v6390_v58 }
 0x6ec   :  { %p8488_p1 = por %p8487_p0, %p8486_p13 }
 0x6ed   :  { %v6420_v14 = vmul.bf16 1056980736, %v6416_v55  ;;  %v6410_v12 = vmul.bf16 1061961548, %v6406_v2 }
 0x6ee   :  { %p8489_p2 = pnand %p8488_p1, %p8482_p12 }
 0x6ef   :  { %v6424_v7 = vmul.bf16 %v6420_v14, %v6388_v53  ;;  %8337 = vtanh.bf16 %v6410_v12 }
 0x6f1   :  { %7369 = vmatmul.mubr.bf16.vlgmr.msra.gmra.mrb[112].mxu1 %v6424_v7 }
 0x6f2   :  { %v8336_v45 = vpop.eup %8335 }
 0x6f3   :  { %v6417_v61 = vadd.bf16 1065369472, %v8336_v45 }
 0x6f5   :  { %v6421_v42 = vmul.bf16 1056980736, %v6417_v61 }
 0x6f7   :  { %v6425_v62 = vmul.bf16 %v6421_v42, %v6389_v19 }
 0x6f9   :  { %7372 = vmatprep.mubr.bf16.mxu1 %v6425_v62 }
 0x6fa   :  { %v8338_v4 = vpop.eup %8337 }
 0x6fb   :  { %v6418_v35 = vadd.bf16 1065369472, %v8338_v4 }
 0x6fd   :  { %v6422_v9 = vmul.bf16 1056980736, %v6418_v35 }
 0x6ff   :  { %v6426_v1 = vmul.bf16 %v6422_v9, %v6390_v58 }
 0x701   :  { %7373 = vmatmul.mubr.bf16.gmra.mrb[116].mxu1 %v6426_v1 }
 0x7c4   :  { %v7370_v10 = vpop.f32.mrb[112].mxu1 }
 0x7c5   :  { %v6541_v57 = vadd.f32 %v7370_v10, %v7291_v11  ;;  %v6532_v13 = vpop.f32.mrb[113].mxu1 }
 0x7c6   :  { %v6533_v44 = vadd.f32 %v7291_v11, %v6532_v13  ;;  %v7371_v41 = vpop.f32.mrb[114].mxu1 }
 0x7c7   :  { %6567 = vmax.xlane.f32.xlu1 %v6541_v57  ;;  %v6535_v43 = vpop.f32.mrb[115].mxu1  ;;  %v6544_v21 = vadd.f32 %v7371_v41, %v7291_v11 }
 0x7c8   :  { %6563 = vmax.xlane.f32.xlu0 %v6533_v44  ;;  %v6536_v20 = vadd.f32 %v7291_v11, %v6535_v43 }
 0x7cb   :  { %6569 = vmax.xlane.f32.xlu1 %v6544_v21 }
 0x7cc   :  { %6565 = vmax.xlane.f32.xlu0 %v6536_v20 }
 0x7d4   :  { %v7374_v6 = vpop.f32.mrb[116].mxu1 }
 0x7d5   :  { %v6548_v50 = vpop.f32.mrb[117].mxu1  ;;  %v6557_v33 = vadd.f32 %v7374_v6, %v7291_v11 }
 0x7d6   :  { %v6549_v49 = vadd.f32 %v7291_v11, %v6548_v50  ;;  %v7375_v53 = vpop.f32.mrb[118].mxu1 }
 0x7d7   :  { %v6551_v47 = vpop.f32.mrb[119].mxu1  ;;  %v6560_v31 = vadd.f32 %v7375_v53, %v7291_v11 }
 0x7d8   :  { %v6552_v59 = vadd.f32 %v7291_v11, %v6551_v47  ;;  %6571 = vmax.xlane.f32.xlu0 %v6549_v49 }
 0x7da   :  { %6573 = vmax.xlane.f32.xlu1 %v6552_v59 }
 0x7dc   :  { %6575 = vmax.xlane.f32.xlu0 %v6557_v33 }
 0x7de   :  { %6577 = vmax.xlane.f32.xlu1 %v6560_v31 }
 0x854   :  { %v6568_v8 = vpop.xlane.xlu1 %6567 }
 0x855   :  { %v6581_v15 = vsub.f32 %v6541_v57, %v6568_v8  ;;  %v6564_v40 = vpop.xlane.xlu0 %6563 }
 0x856   :  { %v6579_v23 = vsub.f32 %v6533_v44, %v6564_v40 }
 0x857   :  { %v6591_v24 = vmul.f32 1.442695, %v6581_v15 }
 0x858   :  { %v6587_v60 = vmul.f32 1.442695, %v6579_v23  ;;  %v6570_v25 = vpop.xlane.xlu1 %6569 }
 0x859   :  { %8339 = vpow2.f32 %v6591_v24  ;;  %v6582_v39 = vsub.f32 %v6544_v21, %v6570_v25  ;;  %v6566_v18 = vpop.xlane.xlu0 %6565 }
 0x85a   :  { %v6580_v17 = vsub.f32 %v6536_v20, %v6566_v18  ;;  %8341 = vpow2.f32 %v6587_v60 }
 0x85b   :  { %v6593_v19 = vmul.f32 1.442695, %v6582_v39 }
 0x85c   :  { %v6589_v34 = vmul.f32 1.442695, %v6580_v17 }
 0x85d   :  { %8343 = vpow2.f32 %v6593_v19 }
 0x85e   :  { %8345 = vpow2.f32 %v6589_v34 }
 0x863   :  { %v8340_v36 = vpop.eup %8339 }
 0x864   :  { %6607 = vadd.xlane.f32.xlu0 %v8340_v36  ;;  %v8342_v0 = vpop.eup %8341 }
 0x865   :  { %v6572_v32 = vpop.xlane.xlu0 %6571 }
 0x866   :  { %v6583_v63 = vsub.f32 %v6549_v49, %v6572_v32 }
 0x867   :  { %v8344_v51 = vpop.eup %8343  ;;  %v6574_v3 = vpop.xlane.xlu1 %6573 }
 0x868   :  { %v6595_v22 = vmul.f32 1.442695, %v6583_v63  ;;  %v6584_v52 = vsub.f32 %v6552_v59, %v6574_v3  ;;  %6609 = vadd.xlane.f32.xlu1 %v8344_v51  ;;  %6603 = vadd.xlane.f32.xlu0 %v8342_v0  ;;  %v8346_v56 = vpop.eup %8345 }
 0x869   :  { %v6576_v54 = vpop.xlane.xlu0 %6575 }
 0x86a   :  { %8347 = vpow2.f32 %v6595_v22  ;;  %v6597_v29 = vmul.f32 1.442695, %v6584_v52  ;;  %v6585_v16 = vsub.f32 %v6557_v33, %v6576_v54 }
 0x86b   :  { %v6578_v58 = vpop.xlane.xlu1 %6577 }
 0x86c   :  { %8349 = vpow2.f32 %v6597_v29  ;;  %v6599_v5 = vmul.f32 1.442695, %v6585_v16  ;;  %v6586_v37 = vsub.f32 %v6560_v31, %v6578_v58  ;;  %6605 = vadd.xlane.f32.xlu1 %v8346_v56 }
 0x86e   :  { %8351 = vpow2.f32 %v6599_v5  ;;  %v6601_v26 = vmul.f32 1.442695, %v6586_v37 }
 0x870   :  { %8353 = vpow2.f32 %v6601_v26 }
 0x874   :  { %v8348_v27 = vpop.eup %8347 }
 0x875   :  { %6611 = vadd.xlane.f32.xlu0 %v8348_v27 }
 0x876   :  { %v8350_v38 = vpop.eup %8349 }
 0x877   :  { %6613 = vadd.xlane.f32.xlu1 %v8350_v38 }
 0x878   :  { %v8352_v30 = vpop.eup %8351 }
 0x879   :  { %6615 = vadd.xlane.f32.xlu0 %v8352_v30 }
 0x87a   :  { %v8354_v28 = vpop.eup %8353 }
 0x87b   :  { %6617 = vadd.xlane.f32.xlu1 %v8354_v28 }
 0x8f1   :  { %v6608_v46 = vpop.xlane.xlu0 %6607 }
 0x8f2   :  { %8355 = vrcp.f32 %v6608_v46 }
 0x8f5   :  { %v6610_v48 = vpop.xlane.xlu1 %6609  ;;  %v6604_v55 = vpop.xlane.xlu0 %6603 }
 0x8f6   :  { %8357 = vrcp.f32 %v6610_v48 }
 0x8f7   :  { %8359 = vrcp.f32 %v6604_v55 }
 0x8f9   :  { %v6606_v2 = vpop.xlane.xlu1 %6605 }
 0x8fa   :  { %8361 = vrcp.f32 %v6606_v2 }
 0x8fc   :  { %v8356_v14 = vpop.eup %8355 }
 0x8fd   :  { %v6629_v12 = vmul.f32 %v8356_v14, %v8340_v36 }
 0x8ff   :  { %6637 = vst [vmem:[#allocation11 + $0x10] sm:$0xff] %v6629_v12 }
 0x900   :  { %v8358_v7 = vpop.eup %8357 }
 0x901   :  { %v8360_v45 = vpop.eup %8359  ;;  %v6630_v61 = vmul.f32 %v8358_v7, %v8344_v51 }
 0x902   :  { %v6627_v42 = vmul.f32 %v8360_v45, %v8342_v0  ;;  %v6612_v62 = vpop.xlane.xlu0 %6611 }
 0x903   :  { %6638 = vst [vmem:[#allocation11 + $0x18] sm:$0xff] %v6630_v61  ;;  %8363 = vrcp.f32 %v6612_v62 }
 0x904   :  { %v8362_v4 = vpop.eup %8361  ;;  %6635 = vst [vmem:[#allocation11] sm:$0xff] %v6627_v42  ;;  %v6614_v35 = vpop.xlane.xlu1 %6613 }
 0x905   :  { %v6628_v9 = vmul.f32 %v8362_v4, %v8346_v56  ;;  %8365 = vrcp.f32 %v6614_v35 }
 0x906   :  { %v6616_v1 = vpop.xlane.xlu0 %6615 }
 0x907   :  { %6636 = vst [vmem:[#allocation11 + $0x8] sm:$0xff] %v6628_v9  ;;  %8367 = vrcp.f32 %v6616_v1 }
 0x908   :  { %v6618_v11 = vpop.xlane.xlu1 %6617 }
 0x909   :  { %8369 = vrcp.f32 %v6618_v11 }
 0x90d   :  { %v8364_v10 = vpop.eup %8363 }
 0x90e   :  { %v6631_v57 = vmul.f32 %v8364_v10, %v8348_v27 }
 0x90f   :  { %v8366_v13 = vpop.eup %8365 }
 0x910   :  { %6639 = vst [vmem:[#allocation11 + $0x20] sm:$0xff] %v6631_v57  ;;  %v6632_v44 = vmul.f32 %v8366_v13, %v8350_v38 }
 0x911   :  { %v8368_v41 = vpop.eup %8367 }
 0x912   :  { %6640 = vst [vmem:[#allocation11 + $0x28] sm:$0xff] %v6632_v44  ;;  %v6633_v43 = vmul.f32 %v8368_v41, %v8352_v30 }
 0x913   :  { %v8370_v21 = vpop.eup %8369 }
 0x914   :  { %6641 = vst [vmem:[#allocation11 + $0x30] sm:$0xff] %v6633_v43  ;;  %v6634_v20 = vmul.f32 %v8370_v21, %v8354_v28 }
 0x916   :  { %6642 = vst [vmem:[#allocation11 + $0x38] sm:$0xff] %v6634_v20 }
 0x917   :  { %8492 = shalt.err (!%p8489_p2)
}
 0x918   :  { %s8493_s15 = scalar_lea.hbm %s9749_s13, 1024 }
 0x919   :  { %p8494_p3 = scmp.ne.s32.totalorder %s9749_s13, %s8493_s15  ;;  %p8497_p4 = scmp.lt.u32.totalorder %s8493_s15, %s9749_s13 }
 0x91b   :  { %p8499_p5 = pnand %p8497_p4, %p8494_p3 }
 0x91d   :  { %8502 = shalt.err (!%p8499_p5)
}
 0x91e   :  { %6654 = dma.vmem_to_hbm [thread:$0]  %s6649_s30, 1024, %s9749_s13, [#allocation4], %s8515_s3, %s8515_s3, %s8516_s26  }
 0x91f   :  { %8509 = dma.done.wait [#allocation4], 1024  }
 0x920   :  { %8510 = vsyncadd [#allocation4], 4294966272 }
 0x921   :  { %6658 = vsyncpa [#allocation3], 1 }
 0x922   :  { %6659 = vsyncpa [#allocation6], 1 }
 0x923   :  { %6660 = vsyncpa [#allocation9], 1 }
 0x924   :  { %6661 = vsyncpa [#allocation4], 1 }

</bundles_post_ra>
